<compile_context>
chip_gen: v5e
topology: v5e:2x2
jax: 0.10.0
libtpu: 0.0.40
codegen_flags: <defaults>
</compile_context>

<pallas_src>
import functools

import jax
import jax.numpy as jnp
from jax.experimental import pallas as pl
from jax.experimental.pallas import tpu as pltpu

_EPS = 1e-5                      # BatchNorm eps (eval mode, mean=0, var=1)
_VMEM_LIMIT = 32 * 1024 * 1024   # everything here is tiny; safe on all chips


# ----------------------------------------------------------------------------
# helpers
# ----------------------------------------------------------------------------
def _const_spec(x):
    """BlockSpec for a fully-resident operand (same block at every grid step)."""
    zeros = (0,) * x.ndim
    return pl.BlockSpec(x.shape, lambda n, _z=zeros: _z)


def _conv3x3(pad_ref, x, w_ref, sh_ref, H, W):
    """3x3 conv (pad=1) + additive shift, as ONE matmul over in-VMEM im2col.

    pad_ref : (H+2, W+2, Cin) f32 VMEM scratch (zeroed here, interior filled).
    x       : (H*W, Cin) f32 value, row-major t = y*W + x.
    w_ref   : (9*Cin, Cout) bf16 weight, row r = (ih*3 + iw)*Cin + ci.
    sh_ref  : (1, Cout) f32 shift (BN beta + conv_bias*BN_scale).
    """
    T, Cin = x.shape
    pad_ref[...] = jnp.zeros(pad_ref.shape, pad_ref.dtype)           # halo = 0
    pad_ref[1:H + 1, 1:W + 1, :] = x.reshape(H, W, Cin)              # interior
    cols = [pad_ref[ih:ih + H, iw:iw + W, :].reshape(T, Cin)
            for ih in range(3) for iw in range(3)]
    im2col = jnp.concatenate(cols, axis=-1).astype(jnp.bfloat16)     # (T, 9*Cin)
    return jnp.dot(im2col, w_ref[...],
                   preferred_element_type=jnp.float32) + sh_ref[...]


# ----------------------------------------------------------------------------
# Fused per-image kernel: pointwise product -> conv `w` -> Residual
# ----------------------------------------------------------------------------
def _fused_kernel(*refs, H, W, C, has_l):
    if has_l:
        (u_ref, s_ref, l_ref, wpw_ref, wpsh_ref, ww_ref, wsh_ref,
         bn1s_ref, bn1b_ref, wc1_ref, ash_ref, wsk_ref, sksh_ref,
         wc2_ref, dsh_ref, wc3_ref, c3b_ref, o_ref, pp_scr, ap_scr) = refs
    else:
        (u_ref, s_ref, wpw_ref, wpsh_ref, ww_ref, wsh_ref,
         bn1s_ref, bn1b_ref, wc1_ref, ash_ref, wsk_ref, sksh_ref,
         wc2_ref, dsh_ref, wc3_ref, c3b_ref, o_ref, pp_scr, ap_scr) = refs

    f32, bf16 = jnp.float32, jnp.bfloat16
    u_bf = u_ref[0]                                       # (T, C) bf16
    s_bf = s_ref[0]

    # ---- pointwise stage: prod = w_1(u) * w_2(s) [* w_3(maxpool(l))] --------
    # one block-diagonal matmul over the lane-concatenated inputs.
    if has_l:
        cat_in = jnp.concatenate([u_bf, s_bf, l_ref[0]], axis=-1)    # (T, 2C+C/2)
    else:
        cat_in = jnp.concatenate([u_bf, s_bf], axis=-1)              # (T, 2C)
    h = jnp.dot(cat_in, wpw_ref[...], preferred_element_type=f32) + wpsh_ref[...]
    prod = h[:, :C] * h[:, C:2 * C]
    if has_l:
        prod = prod * h[:, 2 * C:3 * C]                              # (T, C) f32

    # ---- b = relu(BN(conv3x3_w(prod))) ---------------------------------------
    b = jnp.maximum(_conv3x3(pp_scr, prod, ww_ref, wsh_ref, H, W), 0.0)  # (T, C)

    # ---- Residual(3*in_c, out_c) on the virtual cat([u, s, b]) --------------
    usb = jnp.concatenate([u_bf.astype(f32), s_bf.astype(f32), b], axis=-1)  # (T,3C)
    r = jnp.maximum(usb * bn1s_ref[...] + bn1b_ref[...], 0.0)        # bn1 + relu
    a = jnp.maximum(                                                  # conv1+bn2+relu
        jnp.dot(r.astype(bf16), wc1_ref[...], preferred_element_type=f32)
        + ash_ref[...], 0.0)                                          # (T, oc2)
    skip = (jnp.dot(usb.astype(bf16), wsk_ref[...], preferred_element_type=f32)
            + sksh_ref[...])                                          # skip_layer
    d = jnp.maximum(_conv3x3(ap_scr, a, wc2_ref, dsh_ref, H, W), 0.0)  # conv2+bn3+relu
    out = (jnp.dot(d.astype(bf16), wc3_ref[...], preferred_element_type=f32)
           + c3b_ref[...] + skip)                                     # conv3 + residual
    o_ref[0] = out.astype(o_ref.dtype)


# ----------------------------------------------------------------------------
# Parameter construction (deterministic, eval-mode BN folded)
# ----------------------------------------------------------------------------
def make_sufusion_params(key, in_c, out_c):
    assert in_c % 2 == 0 and out_c % 2 == 0
    oc2 = out_c // 2
    hc = in_c // 2
    cat_c = 3 * in_c
    keys = iter(jax.random.split(key, 32))
    nk = lambda: next(keys)
    f32, bf16 = jnp.float32, jnp.bfloat16

    def conv1x1(cin, cout):                  # torch Conv2d(cin, cout, 1, bias=True)
        w = 0.1 * jax.random.normal(nk(), (cout, cin), f32)
        b = 0.05 * jax.random.normal(nk(), (cout,), f32)
        return w.T, b                        # (cin, cout), (cout,)

    def conv3x3(cin, cout):                  # torch Conv2d(cin, cout, 3, padding=1)
        w = 0.1 * jax.random.normal(nk(), (cout, cin, 3, 3), f32)
        b = 0.05 * jax.random.normal(nk(), (cout,), f32)
        # im2col row order: r = (ih*3 + iw)*cin + ci  <-  w[co, ci, ih, iw]
        taps = jnp.transpose(w, (2, 3, 1, 0)).reshape(9 * cin, cout)
        return taps, b

    def bn(c):                               # eval mode: running mean=0, var=1
        g = 1.0 + 0.05 * jax.random.normal(nk(), (c,), f32)
        beta = 0.05 * jax.random.normal(nk(), (c,), f32)
        return g / jnp.sqrt(1.0 + _EPS), beta

    # w_1 / w_2 / w_3 : Conv(k=1, bn=True, relu=False)
    w1w, w1b = conv1x1(in_c, in_c); g1, be1 = bn(in_c)
    w2w, w2b = conv1x1(in_c, in_c); g2, be2 = bn(in_c)
    w3w, w3b = conv1x1(hc, in_c);   g3, be3 = bn(in_c)
    w1s, sh1 = w1w * g1[None, :], be1 + w1b * g1
    w2s, sh2 = w2w * g2[None, :], be2 + w2b * g2
    w3s, sh3 = w3w * g3[None, :], be3 + w3b * g3
    z = lambda r, c: jnp.zeros((r, c), f32)
    w12 = jnp.concatenate(                   # block-diag for cat([u, s])
        [jnp.concatenate([w1s, z(in_c, in_c)], 1),
         jnp.concatenate([z(in_c, in_c), w2s], 1)], 0)               # (2C, 2C)
    w123 = jnp.concatenate(                  # block-diag for cat([u, s, lp])
        [jnp.concatenate([w1s, z(in_c, in_c), z(in_c, in_c)], 1),
         jnp.concatenate([z(in_c, in_c), w2s, z(in_c, in_c)], 1),
         jnp.concatenate([z(hc, in_c), z(hc, in_c), w3s], 1)], 0)    # (2C+hc, 3C)

    # w : Conv(k=3, bn=True, relu=True)
    www, wwb = conv3x3(in_c, in_c); gw, bew = bn(in_c)

    # residual = Residual(3*in_c, out_c)
    g_bn1, b_bn1 = bn(cat_c)
    c1w, c1b = conv1x1(cat_c, oc2); g_bn2, b_bn2 = bn(oc2)           # conv1 + bn2
    c2w, c2b = conv3x3(oc2, oc2);   g_bn3, b_bn3 = bn(oc2)           # conv2 + bn3
    c3w, c3b = conv1x1(oc2, out_c)                                   # conv3
    if cat_c != out_c:                                               # need_skip
        skw, skb = conv1x1(cat_c, out_c)
    else:
        # TODO(synk): identity skip expressed as an eye matmul; special-case to
        # a plain copy if 3*in_c == out_c is ever a real configuration.
        skw, skb = jnp.eye(cat_c, dtype=f32), jnp.zeros((out_c,), f32)

    return dict(
        # fused pointwise 1x1 convs (BN scale folded into weight columns)
        w12_w=w12.astype(bf16),
        w12_sh=jnp.concatenate([sh1, sh2]).reshape(1, 2 * in_c),
        w123_w=w123.astype(bf16),
        w123_sh=jnp.concatenate([sh1, sh2, sh3]).reshape(1, 3 * in_c),
        # `w` 3x3 conv in im2col layout (BN folded)
        w_w=(www * gw[None, :]).astype(bf16),
        w_sh=(bew + wwb * gw).reshape(1, in_c),
        # residual.bn1 over the virtual cat([u, s, b])
        bn1_s=g_bn1.reshape(1, cat_c), bn1_b=b_bn1.reshape(1, cat_c),
        # residual.conv1 (bn2 folded) as a single (3C, oc2) matmul
        wc1_w=(c1w * g_bn2[None, :]).astype(bf16),
        a_sh=(b_bn2 + c1b * g_bn2).reshape(1, oc2),
        # residual.conv2 (3x3, bn3 folded) in im2col layout
        wc2_w=(c2w * g_bn3[None, :]).astype(bf16),
        d_sh=(b_bn3 + c2b * g_bn3).reshape(1, oc2),
        # residual.conv3
        wc3_w=c3w.astype(bf16), c3_b=c3b.reshape(1, out_c),
        # residual.skip_layer (1x1 conv + bias, no bn)
        wsk_w=skw.astype(bf16), sk_sh=skb.reshape(1, out_c),
    )


# ----------------------------------------------------------------------------
# Forward wrapper
# ----------------------------------------------------------------------------
def sufusion_forward(params, u_nchw, s_nchw, l_nchw=None):
    """SUFusionBlock_2.forward (NCHW in / NCHW out), eval mode."""
    N, C, H, W = u_nchw.shape
    T = H * W
    has_l = l_nchw is not None
    oc2 = params['wc3_w'].shape[0]
    out_c = params['wc3_w'].shape[1]

    def to_rows(x):  # NCHW -> (N, H*W, C), bf16 (MXU operands are bf16 anyway)
        n, c = x.shape[0], x.shape[1]
        return jnp.transpose(x, (0, 2, 3, 1)).reshape(n, -1, c).astype(jnp.bfloat16)

    inputs = [to_rows(u_nchw), to_rows(s_nchw)]
    if has_l:
        # TODO(synk): MaxPool2d(3,2,1) kept as lax.reduce_window in the wrapper
        # (tiny, bandwidth-bound); folding the strided max into the kernel would
        # only remove one small XLA op.
        lf = jnp.transpose(l_nchw, (0, 2, 3, 1)).astype(jnp.float32)
        lp = jax.lax.reduce_window(lf, -jnp.inf, jax.lax.max,
                                   (1, 3, 3, 1), (1, 2, 2, 1),
                                   ((0, 0), (1, 1), (1, 1), (0, 0)))
        inputs.append(lp.reshape(N, T, C // 2).astype(jnp.bfloat16))

    weights = [params['w123_w'] if has_l else params['w12_w'],
               params['w123_sh'] if has_l else params['w12_sh'],
               params['w_w'], params['w_sh'],
               params['bn1_s'], params['bn1_b'],
               params['wc1_w'], params['a_sh'],
               params['wsk_w'], params['sk_sh'],
               params['wc2_w'], params['d_sh'],
               params['wc3_w'], params['c3_b']]

    def row_spec(ch):
        return pl.BlockSpec((1, T, ch), lambda n: (n, 0, 0))

    in_specs = [row_spec(C), row_spec(C)]
    if has_l:
        in_specs.append(row_spec(C // 2))
    in_specs += [_const_spec(wt) for wt in weights]

    y = pl.pallas_call(
        functools.partial(_fused_kernel, H=H, W=W, C=C, has_l=has_l),
        out_shape=jax.ShapeDtypeStruct((N, T, out_c), jnp.float32),
        grid=(N,),
        in_specs=in_specs,
        out_specs=pl.BlockSpec((1, T, out_c), lambda n: (n, 0, 0)),
        scratch_shapes=[pltpu.VMEM((H + 2, W + 2, C), jnp.float32),    # prod halo
                        pltpu.VMEM((H + 2, W + 2, oc2), jnp.float32)],  # a halo
        compiler_params=pltpu.CompilerParams(
            dimension_semantics=("parallel",),   # N=2 -> one image per v7x TC
            vmem_limit_bytes=_VMEM_LIMIT),
    )(*inputs, *weights)

    return jnp.transpose(y.reshape(N, H, W, out_c), (0, 3, 1, 2))


# ----------------------------------------------------------------------------
if __name__ == "__main__":
    key = jax.random.PRNGKey(0)
    kp, ku, ks, kl = jax.random.split(key, 4)

    in_c, out_c = 16, 16
    B, H, W = 2, 16, 16

    params = make_sufusion_params(kp, in_c, out_c)
    u = jax.random.normal(ku, (B, in_c, H, W), jnp.float32)
    s = jax.random.normal(ks, (B, in_c, H, W), jnp.float32)
    # l must have in_c//2 channels (w_3) and 2x spatial (maxpool stride 2).
    l = jax.random.normal(kl, (B, in_c // 2, 2 * H, 2 * W), jnp.float32)

    fwd = jax.jit(lambda p, uu, ss: sufusion_forward(p, uu, ss))
    fwd_l = jax.jit(lambda p, uu, ss, ll: sufusion_forward(p, uu, ss, ll))

    y0 = fwd(params, u, s)        # forward(u, s)
    y1 = fwd_l(params, u, s, l)   # forward(u, s, l)
    jax.block_until_ready((y0, y1))

    assert y0.shape == (B, out_c, H, W)
    assert y1.shape == (B, out_c, H, W)
    assert bool(jnp.all(jnp.isfinite(y0))) and bool(jnp.all(jnp.isfinite(y1)))
    print("KERNEL_OK")
</pallas_src>

<mosaic_0001>
module attributes {stable_mosaic.version = 11 : i64} {
  func.func @_fused_kernel(%arg0: i32, %arg1: memref<1x256x16xbf16, #tpu.memory_space<vmem>>, %arg2: memref<1x256x16xbf16, #tpu.memory_space<vmem>>, %arg3: memref<32x32xbf16, #tpu.memory_space<vmem>>, %arg4: memref<1x32xf32, #tpu.memory_space<vmem>>, %arg5: memref<144x16xbf16, #tpu.memory_space<vmem>>, %arg6: memref<1x16xf32, #tpu.memory_space<vmem>>, %arg7: memref<1x48xf32, #tpu.memory_space<vmem>>, %arg8: memref<1x48xf32, #tpu.memory_space<vmem>>, %arg9: memref<48x8xbf16, #tpu.memory_space<vmem>>, %arg10: memref<1x8xf32, #tpu.memory_space<vmem>>, %arg11: memref<48x16xbf16, #tpu.memory_space<vmem>>, %arg12: memref<1x16xf32, #tpu.memory_space<vmem>>, %arg13: memref<72x8xbf16, #tpu.memory_space<vmem>>, %arg14: memref<1x8xf32, #tpu.memory_space<vmem>>, %arg15: memref<8x16xbf16, #tpu.memory_space<vmem>>, %arg16: memref<1x16xf32, #tpu.memory_space<vmem>>, %arg17: memref<1x256x16xf32, #tpu.memory_space<vmem>>, %arg18: memref<18x18x16xf32, #tpu.memory_space<vmem>>, %arg19: memref<18x18x8xf32, #tpu.memory_space<vmem>>) attributes {dimension_semantics = [#tpu.dimension_semantics<parallel>], iteration_bounds = array<i64: 2>, scalar_prefetch = 0 : i64, scratch_operands = 2 : i64, tpu.core_type = #tpu.core_type<tc>, window_params = [{transform_indices = @transform_0, window_bounds = array<i64: 1, 256, 16>}, {transform_indices = @transform_1, window_bounds = array<i64: 1, 256, 16>}, {pipeline_mode = #tpu.pipeline_mode<synchronous>, transform_indices = @transform_2, window_bounds = array<i64: 32, 32>}, {pipeline_mode = #tpu.pipeline_mode<synchronous>, transform_indices = @transform_3, window_bounds = array<i64: 1, 32>}, {pipeline_mode = #tpu.pipeline_mode<synchronous>, transform_indices = @transform_4, window_bounds = array<i64: 144, 16>}, {pipeline_mode = #tpu.pipeline_mode<synchronous>, transform_indices = @transform_5, window_bounds = array<i64: 1, 16>}, {pipeline_mode = #tpu.pipeline_mode<synchronous>, transform_indices = @transform_6, window_bounds = array<i64: 1, 48>}, {pipeline_mode = #tpu.pipeline_mode<synchronous>, transform_indices = @transform_7, window_bounds = array<i64: 1, 48>}, {pipeline_mode = #tpu.pipeline_mode<synchronous>, transform_indices = @transform_8, window_bounds = array<i64: 48, 8>}, {pipeline_mode = #tpu.pipeline_mode<synchronous>, transform_indices = @transform_9, window_bounds = array<i64: 1, 8>}, {pipeline_mode = #tpu.pipeline_mode<synchronous>, transform_indices = @transform_10, window_bounds = array<i64: 48, 16>}, {pipeline_mode = #tpu.pipeline_mode<synchronous>, transform_indices = @transform_11, window_bounds = array<i64: 1, 16>}, {pipeline_mode = #tpu.pipeline_mode<synchronous>, transform_indices = @transform_12, window_bounds = array<i64: 72, 8>}, {pipeline_mode = #tpu.pipeline_mode<synchronous>, transform_indices = @transform_13, window_bounds = array<i64: 1, 8>}, {pipeline_mode = #tpu.pipeline_mode<synchronous>, transform_indices = @transform_14, window_bounds = array<i64: 8, 16>}, {pipeline_mode = #tpu.pipeline_mode<synchronous>, transform_indices = @transform_15, window_bounds = array<i64: 1, 16>}, {transform_indices = @transform_16, window_bounds = array<i64: 1, 256, 16>}]} {
    %c0 = arith.constant 0 : index
    %c0_0 = arith.constant 0 : index
    %c0_1 = arith.constant 0 : index
    %0 = vector.load %arg1[%c0, %c0_0, %c0_1] : memref<1x256x16xbf16, #tpu.memory_space<vmem>>, vector<1x256x16xbf16>
    %1 = vector.shape_cast %0 : vector<1x256x16xbf16> to vector<256x16xbf16>
    %c0_2 = arith.constant 0 : index
    %c0_3 = arith.constant 0 : index
    %c0_4 = arith.constant 0 : index
    %2 = vector.load %arg2[%c0_2, %c0_3, %c0_4] : memref<1x256x16xbf16, #tpu.memory_space<vmem>>, vector<1x256x16xbf16>
    %3 = vector.shape_cast %2 : vector<1x256x16xbf16> to vector<256x16xbf16>
    %4 = tpu.concatenate %1, %3 in 1 : vector<256x16xbf16>, vector<256x16xbf16> -> vector<256x32xbf16>
    %c0_5 = arith.constant 0 : index
    %c0_6 = arith.constant 0 : index
    %5 = vector.load %arg3[%c0_5, %c0_6] : memref<32x32xbf16, #tpu.memory_space<vmem>>, vector<32x32xbf16>
    %cst = arith.constant dense<0.000000e+00> : vector<256x32xf32>
    %6 = tpu.matmul %4, %5, %cst {dimension_numbers = #tpu.dot_dimension_numbers<[1], [0], [0], [1], [0, 0, 1, 1], [], []>} : vector<256x32xbf16>, vector<32x32xbf16>, vector<256x32xf32> -> vector<256x32xf32>
    %c0_7 = arith.constant 0 : index
    %c0_8 = arith.constant 0 : index
    %7 = vector.load %arg4[%c0_7, %c0_8] : memref<1x32xf32, #tpu.memory_space<vmem>>, vector<1x32xf32>
    %8 = vector.broadcast %7 : vector<1x32xf32> to vector<256x32xf32>
    %9 = arith.addf %6, %8 : vector<256x32xf32>
    %10 = vector.extract_strided_slice %9 {offsets = [0, 0], sizes = [256, 16], strides = [1, 1]} : vector<256x32xf32> to vector<256x16xf32>
    %11 = vector.extract_strided_slice %9 {offsets = [0, 16], sizes = [256, 16], strides = [1, 1]} : vector<256x32xf32> to vector<256x16xf32>
    %12 = arith.mulf %10, %11 : vector<256x16xf32>
    %cst_9 = arith.constant 0.000000e+00 : f32
    %13 = vector.broadcast %cst_9 : f32 to vector<18x18x16xf32>
    %c0_10 = arith.constant 0 : index
    %c0_11 = arith.constant 0 : index
    %c0_12 = arith.constant 0 : index
    %14 = vector.load %arg18[%c0_10, %c0_11, %c0_12] : memref<18x18x16xf32, #tpu.memory_space<vmem>>, vector<18x18x16xf32>
    tpu.vector_store %arg18[%c0_10, %c0_11, %c0_12], %13 {strides = array<i32>} : memref<18x18x16xf32, #tpu.memory_space<vmem>>, vector<18x18x16xf32>,
    %15 = vector.shape_cast %12 : vector<256x16xf32> to vector<16x16x16xf32>
    %c1 = arith.constant 1 : index
    %c1_13 = arith.constant 1 : index
    %c0_14 = arith.constant 0 : index
    %16 = vector.load %arg18[%c1, %c1_13, %c0_14] : memref<18x18x16xf32, #tpu.memory_space<vmem>>, vector<16x16x16xf32>
    tpu.vector_store %arg18[%c1, %c1_13, %c0_14], %15 {strides = array<i32>} : memref<18x18x16xf32, #tpu.memory_space<vmem>>, vector<16x16x16xf32>,
    %c0_15 = arith.constant 0 : index
    %c0_16 = arith.constant 0 : index
    %c0_17 = arith.constant 0 : index
    %17 = vector.load %arg18[%c0_15, %c0_16, %c0_17] : memref<18x18x16xf32, #tpu.memory_space<vmem>>, vector<16x16x16xf32>
    %18 = vector.shape_cast %17 : vector<16x16x16xf32> to vector<256x16xf32>
    %c0_18 = arith.constant 0 : index
    %c1_19 = arith.constant 1 : index
    %c0_20 = arith.constant 0 : index
    %19 = vector.load %arg18[%c0_18, %c1_19, %c0_20] : memref<18x18x16xf32, #tpu.memory_space<vmem>>, vector<16x16x16xf32>
    %20 = vector.shape_cast %19 : vector<16x16x16xf32> to vector<256x16xf32>
    %c0_21 = arith.constant 0 : index
    %c2 = arith.constant 2 : index
    %c0_22 = arith.constant 0 : index
    %21 = vector.load %arg18[%c0_21, %c2, %c0_22] : memref<18x18x16xf32, #tpu.memory_space<vmem>>, vector<16x16x16xf32>
    %22 = vector.shape_cast %21 : vector<16x16x16xf32> to vector<256x16xf32>
    %c1_23 = arith.constant 1 : index
    %c0_24 = arith.constant 0 : index
    %c0_25 = arith.constant 0 : index
    %23 = vector.load %arg18[%c1_23, %c0_24, %c0_25] : memref<18x18x16xf32, #tpu.memory_space<vmem>>, vector<16x16x16xf32>
    %24 = vector.shape_cast %23 : vector<16x16x16xf32> to vector<256x16xf32>
    %c1_26 = arith.constant 1 : index
    %c1_27 = arith.constant 1 : index
    %c0_28 = arith.constant 0 : index
    %25 = vector.load %arg18[%c1_26, %c1_27, %c0_28] : memref<18x18x16xf32, #tpu.memory_space<vmem>>, vector<16x16x16xf32>
    %26 = vector.shape_cast %25 : vector<16x16x16xf32> to vector<256x16xf32>
    %c1_29 = arith.constant 1 : index
    %c2_30 = arith.constant 2 : index
    %c0_31 = arith.constant 0 : index
    %27 = vector.load %arg18[%c1_29, %c2_30, %c0_31] : memref<18x18x16xf32, #tpu.memory_space<vmem>>, vector<16x16x16xf32>
    %28 = vector.shape_cast %27 : vector<16x16x16xf32> to vector<256x16xf32>
    %c2_32 = arith.constant 2 : index
    %c0_33 = arith.constant 0 : index
    %c0_34 = arith.constant 0 : index
    %29 = vector.load %arg18[%c2_32, %c0_33, %c0_34] : memref<18x18x16xf32, #tpu.memory_space<vmem>>, vector<16x16x16xf32>
    %30 = vector.shape_cast %29 : vector<16x16x16xf32> to vector<256x16xf32>
    %c2_35 = arith.constant 2 : index
    %c1_36 = arith.constant 1 : index
    %c0_37 = arith.constant 0 : index
    %31 = vector.load %arg18[%c2_35, %c1_36, %c0_37] : memref<18x18x16xf32, #tpu.memory_space<vmem>>, vector<16x16x16xf32>
    %32 = vector.shape_cast %31 : vector<16x16x16xf32> to vector<256x16xf32>
    %c2_38 = arith.constant 2 : index
    %c2_39 = arith.constant 2 : index
    %c0_40 = arith.constant 0 : index
    %33 = vector.load %arg18[%c2_38, %c2_39, %c0_40] : memref<18x18x16xf32, #tpu.memory_space<vmem>>, vector<16x16x16xf32>
    %34 = vector.shape_cast %33 : vector<16x16x16xf32> to vector<256x16xf32>
    %35 = tpu.concatenate %18, %20, %22, %24, %26, %28, %30, %32, %34 in 1 : vector<256x16xf32>, vector<256x16xf32>, vector<256x16xf32>, vector<256x16xf32>, vector<256x16xf32>, vector<256x16xf32>, vector<256x16xf32>, vector<256x16xf32>, vector<256x16xf32> -> vector<256x144xf32>
    %36 = arith.truncf %35 : vector<256x144xf32> to vector<256x144xbf16>
    %c0_41 = arith.constant 0 : index
    %c0_42 = arith.constant 0 : index
    %37 = vector.load %arg5[%c0_41, %c0_42] : memref<144x16xbf16, #tpu.memory_space<vmem>>, vector<144x16xbf16>
    %cst_43 = arith.constant dense<0.000000e+00> : vector<256x16xf32>
    %38 = tpu.matmul %36, %37, %cst_43 {dimension_numbers = #tpu.dot_dimension_numbers<[1], [0], [0], [1], [0, 0, 1, 1], [], []>} : vector<256x144xbf16>, vector<144x16xbf16>, vector<256x16xf32> -> vector<256x16xf32>
    %c0_44 = arith.constant 0 : index
    %c0_45 = arith.constant 0 : index
    %39 = vector.load %arg6[%c0_44, %c0_45] : memref<1x16xf32, #tpu.memory_space<vmem>>, vector<1x16xf32>
    %40 = vector.broadcast %39 : vector<1x16xf32> to vector<256x16xf32>
    %41 = arith.addf %38, %40 : vector<256x16xf32>
    %cst_46 = arith.constant 0.000000e+00 : f32
    %42 = vector.broadcast %cst_46 : f32 to vector<256x16xf32>
    %43 = arith.maximumf %41, %42 : vector<256x16xf32>
    %44 = arith.extf %1 : vector<256x16xbf16> to vector<256x16xf32>
    %45 = arith.extf %3 : vector<256x16xbf16> to vector<256x16xf32>
    %46 = tpu.concatenate %44, %45, %43 in 1 : vector<256x16xf32>, vector<256x16xf32>, vector<256x16xf32> -> vector<256x48xf32>
    %c0_47 = arith.constant 0 : index
    %c0_48 = arith.constant 0 : index
    %47 = vector.load %arg7[%c0_47, %c0_48] : memref<1x48xf32, #tpu.memory_space<vmem>>, vector<1x48xf32>
    %48 = vector.broadcast %47 : vector<1x48xf32> to vector<256x48xf32>
    %49 = arith.mulf %46, %48 : vector<256x48xf32>
    %c0_49 = arith.constant 0 : index
    %c0_50 = arith.constant 0 : index
    %50 = vector.load %arg8[%c0_49, %c0_50] : memref<1x48xf32, #tpu.memory_space<vmem>>, vector<1x48xf32>
    %51 = vector.broadcast %50 : vector<1x48xf32> to vector<256x48xf32>
    %52 = arith.addf %49, %51 : vector<256x48xf32>
    %cst_51 = arith.constant 0.000000e+00 : f32
    %53 = vector.broadcast %cst_51 : f32 to vector<256x48xf32>
    %54 = arith.maximumf %52, %53 : vector<256x48xf32>
    %55 = arith.truncf %54 : vector<256x48xf32> to vector<256x48xbf16>
    %c0_52 = arith.constant 0 : index
    %c0_53 = arith.constant 0 : index
    %56 = vector.load %arg9[%c0_52, %c0_53] : memref<48x8xbf16, #tpu.memory_space<vmem>>, vector<48x8xbf16>
    %cst_54 = arith.constant dense<0.000000e+00> : vector<256x8xf32>
    %57 = tpu.matmul %55, %56, %cst_54 {dimension_numbers = #tpu.dot_dimension_numbers<[1], [0], [0], [1], [0, 0, 1, 1], [], []>} : vector<256x48xbf16>, vector<48x8xbf16>, vector<256x8xf32> -> vector<256x8xf32>
    %c0_55 = arith.constant 0 : index
    %c0_56 = arith.constant 0 : index
    %58 = vector.load %arg10[%c0_55, %c0_56] : memref<1x8xf32, #tpu.memory_space<vmem>>, vector<1x8xf32>
    %59 = vector.broadcast %58 : vector<1x8xf32> to vector<256x8xf32>
    %60 = arith.addf %57, %59 : vector<256x8xf32>
    %cst_57 = arith.constant 0.000000e+00 : f32
    %61 = vector.broadcast %cst_57 : f32 to vector<256x8xf32>
    %62 = arith.maximumf %60, %61 : vector<256x8xf32>
    %63 = arith.truncf %46 : vector<256x48xf32> to vector<256x48xbf16>
    %c0_58 = arith.constant 0 : index
    %c0_59 = arith.constant 0 : index
    %64 = vector.load %arg11[%c0_58, %c0_59] : memref<48x16xbf16, #tpu.memory_space<vmem>>, vector<48x16xbf16>
    %cst_60 = arith.constant dense<0.000000e+00> : vector<256x16xf32>
    %65 = tpu.matmul %63, %64, %cst_60 {dimension_numbers = #tpu.dot_dimension_numbers<[1], [0], [0], [1], [0, 0, 1, 1], [], []>} : vector<256x48xbf16>, vector<48x16xbf16>, vector<256x16xf32> -> vector<256x16xf32>
    %c0_61 = arith.constant 0 : index
    %c0_62 = arith.constant 0 : index
    %66 = vector.load %arg12[%c0_61, %c0_62] : memref<1x16xf32, #tpu.memory_space<vmem>>, vector<1x16xf32>
    %67 = vector.broadcast %66 : vector<1x16xf32> to vector<256x16xf32>
    %68 = arith.addf %65, %67 : vector<256x16xf32>
    %cst_63 = arith.constant 0.000000e+00 : f32
    %69 = vector.broadcast %cst_63 : f32 to vector<18x18x8xf32>
    %c0_64 = arith.constant 0 : index
    %c0_65 = arith.constant 0 : index
    %c0_66 = arith.constant 0 : index
    %70 = vector.load %arg19[%c0_64, %c0_65, %c0_66] : memref<18x18x8xf32, #tpu.memory_space<vmem>>, vector<18x18x8xf32>
    tpu.vector_store %arg19[%c0_64, %c0_65, %c0_66], %69 {strides = array<i32>} : memref<18x18x8xf32, #tpu.memory_space<vmem>>, vector<18x18x8xf32>,
    %71 = vector.shape_cast %62 : vector<256x8xf32> to vector<16x16x8xf32>
    %c1_67 = arith.constant 1 : index
    %c1_68 = arith.constant 1 : index
    %c0_69 = arith.constant 0 : index
    %72 = vector.load %arg19[%c1_67, %c1_68, %c0_69] : memref<18x18x8xf32, #tpu.memory_space<vmem>>, vector<16x16x8xf32>
    tpu.vector_store %arg19[%c1_67, %c1_68, %c0_69], %71 {strides = array<i32>} : memref<18x18x8xf32, #tpu.memory_space<vmem>>, vector<16x16x8xf32>,
    %c0_70 = arith.constant 0 : index
    %c0_71 = arith.constant 0 : index
    %c0_72 = arith.constant 0 : index
    %73 = vector.load %arg19[%c0_70, %c0_71, %c0_72] : memref<18x18x8xf32, #tpu.memory_space<vmem>>, vector<16x16x8xf32>
    %74 = vector.shape_cast %73 : vector<16x16x8xf32> to vector<256x8xf32>
    %c0_73 = arith.constant 0 : index
    %c1_74 = arith.constant 1 : index
    %c0_75 = arith.constant 0 : index
    %75 = vector.load %arg19[%c0_73, %c1_74, %c0_75] : memref<18x18x8xf32, #tpu.memory_space<vmem>>, vector<16x16x8xf32>
    %76 = vector.shape_cast %75 : vector<16x16x8xf32> to vector<256x8xf32>
    %c0_76 = arith.constant 0 : index
    %c2_77 = arith.constant 2 : index
    %c0_78 = arith.constant 0 : index
    %77 = vector.load %arg19[%c0_76, %c2_77, %c0_78] : memref<18x18x8xf32, #tpu.memory_space<vmem>>, vector<16x16x8xf32>
    %78 = vector.shape_cast %77 : vector<16x16x8xf32> to vector<256x8xf32>
    %c1_79 = arith.constant 1 : index
    %c0_80 = arith.constant 0 : index
    %c0_81 = arith.constant 0 : index
    %79 = vector.load %arg19[%c1_79, %c0_80, %c0_81] : memref<18x18x8xf32, #tpu.memory_space<vmem>>, vector<16x16x8xf32>
    %80 = vector.shape_cast %79 : vector<16x16x8xf32> to vector<256x8xf32>
    %c1_82 = arith.constant 1 : index
    %c1_83 = arith.constant 1 : index
    %c0_84 = arith.constant 0 : index
    %81 = vector.load %arg19[%c1_82, %c1_83, %c0_84] : memref<18x18x8xf32, #tpu.memory_space<vmem>>, vector<16x16x8xf32>
    %82 = vector.shape_cast %81 : vector<16x16x8xf32> to vector<256x8xf32>
    %c1_85 = arith.constant 1 : index
    %c2_86 = arith.constant 2 : index
    %c0_87 = arith.constant 0 : index
    %83 = vector.load %arg19[%c1_85, %c2_86, %c0_87] : memref<18x18x8xf32, #tpu.memory_space<vmem>>, vector<16x16x8xf32>
    %84 = vector.shape_cast %83 : vector<16x16x8xf32> to vector<256x8xf32>
    %c2_88 = arith.constant 2 : index
    %c0_89 = arith.constant 0 : index
    %c0_90 = arith.constant 0 : index
    %85 = vector.load %arg19[%c2_88, %c0_89, %c0_90] : memref<18x18x8xf32, #tpu.memory_space<vmem>>, vector<16x16x8xf32>
    %86 = vector.shape_cast %85 : vector<16x16x8xf32> to vector<256x8xf32>
    %c2_91 = arith.constant 2 : index
    %c1_92 = arith.constant 1 : index
    %c0_93 = arith.constant 0 : index
    %87 = vector.load %arg19[%c2_91, %c1_92, %c0_93] : memref<18x18x8xf32, #tpu.memory_space<vmem>>, vector<16x16x8xf32>
    %88 = vector.shape_cast %87 : vector<16x16x8xf32> to vector<256x8xf32>
    %c2_94 = arith.constant 2 : index
    %c2_95 = arith.constant 2 : index
    %c0_96 = arith.constant 0 : index
    %89 = vector.load %arg19[%c2_94, %c2_95, %c0_96] : memref<18x18x8xf32, #tpu.memory_space<vmem>>, vector<16x16x8xf32>
    %90 = vector.shape_cast %89 : vector<16x16x8xf32> to vector<256x8xf32>
    %91 = tpu.concatenate %74, %76, %78, %80, %82, %84, %86, %88, %90 in 1 : vector<256x8xf32>, vector<256x8xf32>, vector<256x8xf32>, vector<256x8xf32>, vector<256x8xf32>, vector<256x8xf32>, vector<256x8xf32>, vector<256x8xf32>, vector<256x8xf32> -> vector<256x72xf32>
    %92 = arith.truncf %91 : vector<256x72xf32> to vector<256x72xbf16>
    %c0_97 = arith.constant 0 : index
    %c0_98 = arith.constant 0 : index
    %93 = vector.load %arg13[%c0_97, %c0_98] : memref<72x8xbf16, #tpu.memory_space<vmem>>, vector<72x8xbf16>
    %cst_99 = arith.constant dense<0.000000e+00> : vector<256x8xf32>
    %94 = tpu.matmul %92, %93, %cst_99 {dimension_numbers = #tpu.dot_dimension_numbers<[1], [0], [0], [1], [0, 0, 1, 1], [], []>} : vector<256x72xbf16>, vector<72x8xbf16>, vector<256x8xf32> -> vector<256x8xf32>
    %c0_100 = arith.constant 0 : index
    %c0_101 = arith.constant 0 : index
    %95 = vector.load %arg14[%c0_100, %c0_101] : memref<1x8xf32, #tpu.memory_space<vmem>>, vector<1x8xf32>
    %96 = vector.broadcast %95 : vector<1x8xf32> to vector<256x8xf32>
    %97 = arith.addf %94, %96 : vector<256x8xf32>
    %cst_102 = arith.constant 0.000000e+00 : f32
    %98 = vector.broadcast %cst_102 : f32 to vector<256x8xf32>
    %99 = arith.maximumf %97, %98 : vector<256x8xf32>
    %100 = arith.truncf %99 : vector<256x8xf32> to vector<256x8xbf16>
    %c0_103 = arith.constant 0 : index
    %c0_104 = arith.constant 0 : index
    %101 = vector.load %arg15[%c0_103, %c0_104] : memref<8x16xbf16, #tpu.memory_space<vmem>>, vector<8x16xbf16>
    %cst_105 = arith.constant dense<0.000000e+00> : vector<256x16xf32>
    %102 = tpu.matmul %100, %101, %cst_105 {dimension_numbers = #tpu.dot_dimension_numbers<[1], [0], [0], [1], [0, 0, 1, 1], [], []>} : vector<256x8xbf16>, vector<8x16xbf16>, vector<256x16xf32> -> vector<256x16xf32>
    %c0_106 = arith.constant 0 : index
    %c0_107 = arith.constant 0 : index
    %103 = vector.load %arg16[%c0_106, %c0_107] : memref<1x16xf32, #tpu.memory_space<vmem>>, vector<1x16xf32>
    %104 = vector.broadcast %103 : vector<1x16xf32> to vector<256x16xf32>
    %105 = arith.addf %102, %104 : vector<256x16xf32>
    %106 = arith.addf %105, %68 : vector<256x16xf32>
    %c0_108 = arith.constant 0 : index
    %c0_109 = arith.constant 0 : index
    %c0_110 = arith.constant 0 : index
    %107 = vector.load %arg17[%c0_108, %c0_109, %c0_110] : memref<1x256x16xf32, #tpu.memory_space<vmem>>, vector<1x256x16xf32>
    %108 = vector.shape_cast %107 : vector<1x256x16xf32> to vector<256x16xf32>
    %109 = vector.shape_cast %106 : vector<256x16xf32> to vector<1x256x16xf32>
    tpu.vector_store %arg17[%c0_108, %c0_109, %c0_110], %109 {strides = array<i32>} : memref<1x256x16xf32, #tpu.memory_space<vmem>>, vector<1x256x16xf32>,
    return
  }
  func.func @transform_0(%arg0: i32) -> (i32, i32, i32) {
    %c0_i32 = arith.constant 0 : i32
    %c0_i32_0 = arith.constant 0 : i32
    %c0_i32_1 = arith.constant 0 : i32
    return %arg0, %c0_i32, %c0_i32_0 : i32, i32, i32
  }
  func.func @transform_1(%arg0: i32) -> (i32, i32, i32) {
    %c0_i32 = arith.constant 0 : i32
    %c0_i32_0 = arith.constant 0 : i32
    %c0_i32_1 = arith.constant 0 : i32
    return %arg0, %c0_i32, %c0_i32_0 : i32, i32, i32
  }
  func.func @transform_2(%arg0: i32) -> (i32, i32) {
    %c0_i32 = arith.constant 0 : i32
    %c0_i32_0 = arith.constant 0 : i32
    %c0_i32_1 = arith.constant 0 : i32
    return %c0_i32, %c0_i32_0 : i32, i32
  }
  func.func @transform_3(%arg0: i32) -> (i32, i32) {
    %c0_i32 = arith.constant 0 : i32
    %c0_i32_0 = arith.constant 0 : i32
    %c0_i32_1 = arith.constant 0 : i32
    return %c0_i32, %c0_i32_0 : i32, i32
  }
  func.func @transform_4(%arg0: i32) -> (i32, i32) {
    %c0_i32 = arith.constant 0 : i32
    %c0_i32_0 = arith.constant 0 : i32
    %c0_i32_1 = arith.constant 0 : i32
    return %c0_i32, %c0_i32_0 : i32, i32
  }
  func.func @transform_5(%arg0: i32) -> (i32, i32) {
    %c0_i32 = arith.constant 0 : i32
    %c0_i32_0 = arith.constant 0 : i32
    %c0_i32_1 = arith.constant 0 : i32
    return %c0_i32, %c0_i32_0 : i32, i32
  }
  func.func @transform_6(%arg0: i32) -> (i32, i32) {
    %c0_i32 = arith.constant 0 : i32
    %c0_i32_0 = arith.constant 0 : i32
    %c0_i32_1 = arith.constant 0 : i32
    return %c0_i32, %c0_i32_0 : i32, i32
  }
  func.func @transform_7(%arg0: i32) -> (i32, i32) {
    %c0_i32 = arith.constant 0 : i32
    %c0_i32_0 = arith.constant 0 : i32
    %c0_i32_1 = arith.constant 0 : i32
    return %c0_i32, %c0_i32_0 : i32, i32
  }
  func.func @transform_8(%arg0: i32) -> (i32, i32) {
    %c0_i32 = arith.constant 0 : i32
    %c0_i32_0 = arith.constant 0 : i32
    %c0_i32_1 = arith.constant 0 : i32
    return %c0_i32, %c0_i32_0 : i32, i32
  }
  func.func @transform_9(%arg0: i32) -> (i32, i32) {
    %c0_i32 = arith.constant 0 : i32
    %c0_i32_0 = arith.constant 0 : i32
    %c0_i32_1 = arith.constant 0 : i32
    return %c0_i32, %c0_i32_0 : i32, i32
  }
  func.func @transform_10(%arg0: i32) -> (i32, i32) {
    %c0_i32 = arith.constant 0 : i32
    %c0_i32_0 = arith.constant 0 : i32
    %c0_i32_1 = arith.constant 0 : i32
    return %c0_i32, %c0_i32_0 : i32, i32
  }
  func.func @transform_11(%arg0: i32) -> (i32, i32) {
    %c0_i32 = arith.constant 0 : i32
    %c0_i32_0 = arith.constant 0 : i32
    %c0_i32_1 = arith.constant 0 : i32
    return %c0_i32, %c0_i32_0 : i32, i32
  }
  func.func @transform_12(%arg0: i32) -> (i32, i32) {
    %c0_i32 = arith.constant 0 : i32
    %c0_i32_0 = arith.constant 0 : i32
    %c0_i32_1 = arith.constant 0 : i32
    return %c0_i32, %c0_i32_0 : i32, i32
  }
  func.func @transform_13(%arg0: i32) -> (i32, i32) {
    %c0_i32 = arith.constant 0 : i32
    %c0_i32_0 = arith.constant 0 : i32
    %c0_i32_1 = arith.constant 0 : i32
    return %c0_i32, %c0_i32_0 : i32, i32
  }
  func.func @transform_14(%arg0: i32) -> (i32, i32) {
    %c0_i32 = arith.constant 0 : i32
    %c0_i32_0 = arith.constant 0 : i32
    %c0_i32_1 = arith.constant 0 : i32
    return %c0_i32, %c0_i32_0 : i32, i32
  }
  func.func @transform_15(%arg0: i32) -> (i32, i32) {
    %c0_i32 = arith.constant 0 : i32
    %c0_i32_0 = arith.constant 0 : i32
    %c0_i32_1 = arith.constant 0 : i32
    return %c0_i32, %c0_i32_0 : i32, i32
  }
  func.func @transform_16(%arg0: i32) -> (i32, i32, i32) {
    %c0_i32 = arith.constant 0 : i32
    %c0_i32_0 = arith.constant 0 : i32
    %c0_i32_1 = arith.constant 0 : i32
    return %arg0, %c0_i32, %c0_i32_0 : i32, i32, i32
  }
}

</mosaic_0001>

<bundles_post_ra>
// kernel: _lambda_.1
= control target key start
LH: loop header
LB: loop body
LE: loop exit
PB: predicated region body
PF: predicated region fallthrough
CT: control target
= control target key end

     0   :  { %s7885_s21 = smov 0   ;;  %s10919_s0 = inlined_call_operand.vmem [shape: bf16[2,256,16], index: 0, kind: input, shape index: {}]   ;;  %s10920_s1 = inlined_call_operand.vmem [shape: bf16[2,256,16], index: 1, kind: input, shape index: {}]   ;;  %s10921_s2 = inlined_call_operand.vmem [shape: bf16[32,32], index: 2, kind: input, shape index: {}]   ;;  %s10922_s3 = inlined_call_operand.vmem [shape: f32[1,32], index: 3, kind: input, shape index: {}]   ;;  %s10923_s4 = inlined_call_operand.vmem [shape: bf16[144,16], index: 4, kind: input, shape index: {}]   ;;  %s10924_s5 = inlined_call_operand.vmem [shape: f32[1,16], index: 5, kind: input, shape index: {}]   ;;  %s10925_s6 = inlined_call_operand.vmem [shape: f32[1,48], index: 6, kind: input, shape index: {}]   ;;  %s10926_s7 = inlined_call_operand.vmem [shape: f32[1,48], index: 7, kind: input, shape index: {}]   ;;  %s10927_s8 = inlined_call_operand.vmem [shape: bf16[48,8], index: 8, kind: input, shape index: {}]   ;;  %s10928_s9 = inlined_call_operand.vmem [shape: f32[1,8], index: 9, kind: input, shape index: {}]   ;;  %s10929_s10 = inlined_call_operand.vmem [shape: bf16[48,16], index: 10, kind: input, shape index: {}]   ;;  %s10930_s11 = inlined_call_operand.vmem [shape: f32[1,16], index: 11, kind: input, shape index: {}]   ;;  %s10931_s12 = inlined_call_operand.vmem [shape: bf16[72,8], index: 12, kind: input, shape index: {}]   ;;  %s10932_s13 = inlined_call_operand.vmem [shape: f32[1,8], index: 13, kind: input, shape index: {}]   ;;  %s10933_s14 = inlined_call_operand.vmem [shape: bf16[8,16], index: 14, kind: input, shape index: {}]   ;;  %s10934_s15 = inlined_call_operand.vmem [shape: f32[1,16], index: 15, kind: input, shape index: {}]   ;;  %s10935_s16 = inlined_call_operand.vmem [shape: f32[2,256,16], index: 16, kind: output, shape index: {}]  }
   0x1   :  { %10942 = sst [smem:[#allocation19_spill]] %s10919_s0 }
   0x2 LB: > { %s6083_s22 = sadd.s32 4294967295, %s7786_s21   ;;  %p6087_p0 = scmp.ge.s32.totalorder %s7786_s21, 1  ;;  %s7786_s21 = sphi %s7885_s21, %s26_s21  }
   0x3   : > { %p472_p1 = scmp.lt.s32.totalorder %s7786_s21, 3 }
   0x5   : > { %p473_p2 = pnand %p6087_p0, %p472_p1 }
   0x7   : > { %476 = sbr.rel (%p473_p2) target bundleno = 2198 (0x896), region = 84 }
   0xc   : > { %p527_p3 = scmp.lt.s32.totalorder %s6083_s22, 1  ;;  %s7788_s27 = smov 16   ;;  %v6440_v6 = vld [vmem:[%s10921_s2 + $0x8] sm:$0xff]  ;;  %v6439_v7 = vld [vmem:[%s10921_s2] sm:$0xff]  ;;  %vm799_vm0 = vcmask 130048   ;;  %vm868_vm1 = vcmask 261120  }
   0xd   : > { %907 = vmatpush.bf16.msra.mxu0 %v6440_v6  ;;  %6460 = vmatpush.bf16.msra.mxu1 %v6440_v6  ;;  %s10943_s19 = sld [smem:[#allocation19_spill]]  ;;  %vm1152_vm2 = vcmask 123904   ;;  %v10936_v53 = vmov 0.0   ;;  %s7791_s28 = smov 112   ;;  %vm2487_vm3 = vcmask 392192   ;;  %vm2520_vm4 = vcmask 523264  }
   0xe   : > { %s10984_s22 = smov (!%p527_p3, %s6083_s22), 1  ;;  %1150 = vst.msk [vmem:[#allocation2] sm:$0xff] %vm799_vm0, %v10936_v53  ;;  %s7792_s29 = smov 64   ;;  %vm2553_vm5 = vcmask 654336   ;;  %vm2586_vm6 = vcmask 785408   ;;  %vm2619_vm7 = vcmask 916480  }
   0xf   : > { %s6404_s23 = sshll.u32 %s10984_s22, 7  ;;  %1151 = vst.msk [vmem:[#allocation2 + $0x8] sm:$0xff] %vm799_vm0, %v10936_v53  ;;  %s7793_s30 = smov 48   ;;  %vm3900_vm8 = vcmask 64512   ;;  %vm3903_vm9 = vcmask 58368   ;;  %vm5666_vm10 = vcmask 1043456  }
  0x10   : > { %s7901_s26 = scalar_lea.vmem %s10920_s1, %s6404_s23  ;;  %1153 = vst.msk [vmem:[#allocation2 + $0x10] sm:$0x3] %vm1152_vm2, %v10936_v53  ;;  %s7794_s0 = smov 80   ;;  %vm5366_vm11 = vcmask 195584   ;;  %vm5431_vm12 = vcmask 326656   ;;  %vm5496_vm13 = vcmask 457728  }
  0x11   : > { %v6423_v0 = vld [vmem:[%s7901_s26] sm:$0xff]  ;;  %v6425_v1 = vld [vmem:[%s7901_s26 + $0x10] sm:$0xff]  ;;  %v6424_v3 = vld [vmem:[%s7901_s26 + $0x8] sm:$0xff]  ;;  %908 = vmatpush.bf16.msra.mxu0 %v6439_v7  ;;  %6461 = vmatpush.bf16.msra.mxu1 %v6439_v7  ;;  %1154 = vst.msk [vmem:[#allocation2 + $0x18] sm:$0xff] %vm799_vm0, %v10936_v53  ;;  %s7796_s24 = smov 8   ;;  %vm5617_vm14 = vcmask 588800  }
  0x12   : > { %767 = vrot.lane.b32.xlu0 %v6423_v0, %s7788_s27  ;;  %771 = vrot.lane.b32.xlu1 %v6425_v1, %s7788_s27  ;;  %v6427_v2 = vld [vmem:[%s7901_s26 + $0x20] sm:$0xff]  ;;  %v6426_v4 = vld [vmem:[%s7901_s26 + $0x18] sm:$0xff]  ;;  %1155 = vst.msk [vmem:[#allocation2 + $0x20] sm:$0xff] %vm799_vm0, %v10936_v53 }
  0x13   : > { %775 = vrot.lane.b32.xlu2 %v6427_v2, %s7788_s27  ;;  %v6428_v5 = vld [vmem:[%s7901_s26 + $0x28] sm:$0xff]  ;;  %v6429_v8 = vld [vmem:[%s7901_s26 + $0x30] sm:$0xff]  ;;  %v6430_v9 = vld [vmem:[%s7901_s26 + $0x38] sm:$0xff]  ;;  %s7946_s20 = scalar_lea.vmem %s10943_s19, %s6404_s23  ;;  %1156 = vst.msk [vmem:[#allocation2 + $0x28] sm:$0x3] %vm1152_vm2, %v10936_v53  ;;  %s7790_s23 = smov 32  }
  0x14   : > { %v6431_v10 = vld [vmem:[%s7901_s26 + $0x40] sm:$0xff]  ;;  %v6432_v11 = vld [vmem:[%s7901_s26 + $0x48] sm:$0xff]  ;;  %v6433_v12 = vld [vmem:[%s7901_s26 + $0x50] sm:$0xff]  ;;  %1157 = vst.msk [vmem:[#allocation2 + $0x30] sm:$0xff] %vm799_vm0, %v10936_v53  ;;  %s7795_s19 = smov 96  }
  0x15   : > { %v6434_v13 = vld [vmem:[%s7901_s26 + $0x58] sm:$0xff]  ;;  %v6435_v14 = vld [vmem:[%s7901_s26 + $0x60] sm:$0xff]  ;;  %v6436_v15 = vld [vmem:[%s7901_s26 + $0x68] sm:$0xff]  ;;  %1158 = vst.msk [vmem:[#allocation2 + $0x38] sm:$0xff] %vm799_vm0, %v10936_v53 }
  0x16   : > { %v6437_v16 = vld [vmem:[%s7901_s26 + $0x70] sm:$0xff]  ;;  %v6438_v17 = vld [vmem:[%s7901_s26 + $0x78] sm:$0xff]  ;;  %v6407_v18 = vld [vmem:[%s7946_s20] sm:$0xff]  ;;  %1159 = vst.msk [vmem:[#allocation2 + $0x40] sm:$0x3] %vm1152_vm2, %v10936_v53 }
  0x17   : > { %v6408_v23 = vld [vmem:[%s7946_s20 + $0x8] sm:$0xff]  ;;  %v6409_v30 = vld [vmem:[%s7946_s20 + $0x10] sm:$0xff]  ;;  %v6419_v31 = vld [vmem:[%s7946_s20 + $0x60] sm:$0xff]  ;;  %1160 = vst.msk [vmem:[#allocation2 + $0x48] sm:$0xff] %vm799_vm0, %v10936_v53 }
  0x18   : > { %v6420_v38 = vld [vmem:[%s7946_s20 + $0x68] sm:$0xff]  ;;  %v6410_v40 = vld [vmem:[%s7946_s20 + $0x18] sm:$0xff]  ;;  %v6421_v44 = vld [vmem:[%s7946_s20 + $0x70] sm:$0xff]  ;;  %1161 = vst.msk [vmem:[#allocation2 + $0x50] sm:$0xff] %vm799_vm0, %v10936_v53 }
  0x19   : > { %v6411_v46 = vld [vmem:[%s7946_s20 + $0x20] sm:$0xff]  ;;  %v6422_v49 = vld [vmem:[%s7946_s20 + $0x78] sm:$0xff]  ;;  %v6412_v51 = vld [vmem:[%s7946_s20 + $0x28] sm:$0xff]  ;;  %1162 = vst.msk [vmem:[#allocation2 + $0x58] sm:$0x3] %vm1152_vm2, %v10936_v53 }
  0x1a   : > { %769 = vrot.lane.b32.xlu0 %v6424_v3, %s7788_s27  ;;  %773 = vrot.lane.b32.xlu1 %v6426_v4, %s7788_s27  ;;  %v1302_v55 = vld [vmem:[#allocation2 + $0x2] sm:$0xff]  ;;  %v1303_v56 = vld [vmem:[#allocation2 + $0xa] sm:$0xff]  ;;  %1163 = vst.msk [vmem:[#allocation2 + $0x60] sm:$0xff] %vm799_vm0, %v10936_v53  ;;  %v6414_v63 = vld [vmem:[%s7946_s20 + $0x38] sm:$0xff] }
  0x1b   : > { %777 = vrot.lane.b32.xlu2 %v6428_v5, %s7788_s27  ;;  %v6491_v57 = vpack.i.bf16 %v1303_v56, %v1302_v55  ;;  %v6413_v58 = vld [vmem:[%s7946_s20 + $0x30] sm:$0xff]  ;;  %1164 = vst.msk [vmem:[#allocation2 + $0x68] sm:$0xff] %vm799_vm0, %v10936_v53  ;;  %v1270_v60 = vld [vmem:[#allocation2 + $0x1] sm:$0xff]  ;;  %v8093_v1 = vld [vmem:[%s10922_s3] ss:$0 sm:$0xff] }
  0x1c   : > { %1165 = vst.msk [vmem:[#allocation2 + $0x70] sm:$0x3] %vm1152_vm2, %v10936_v53  ;;  %v1271_v61 = vld [vmem:[#allocation2 + $0x9] sm:$0xff]  ;;  %v6415_v2 = vld [vmem:[%s7946_s20 + $0x40] sm:$0xff] }
  0x1d   : > { %1166 = vst.msk [vmem:[#allocation2 + $0x78] sm:$0xff] %vm799_vm0, %v10936_v53  ;;  %v6486_v62 = vpack.i.bf16 %v1271_v61, %v1270_v60 }
  0x1e   : > { %1167 = vst.msk [vmem:[#allocation2 + $0x80] sm:$0xff] %vm799_vm0, %v10936_v53 }
  0x1f   : > { %1168 = vst.msk [vmem:[#allocation2 + $0x88] sm:$0x3] %vm1152_vm2, %v10936_v53 }
  0x20   : > { %1169 = vst.msk [vmem:[#allocation2 + $0x90] sm:$0xff] %vm799_vm0, %v10936_v53 }
  0x21   : > { %1170 = vst.msk [vmem:[#allocation2 + $0x98] sm:$0xff] %vm799_vm0, %v10936_v53 }
  0x22   : > { %779 = vrot.lane.b32.xlu0 %v6429_v8, %s7788_s27  ;;  %781 = vrot.lane.b32.xlu1 %v6430_v9, %s7788_s27  ;;  %1171 = vst.msk [vmem:[#allocation2 + $0xa0] sm:$0x3] %vm1152_vm2, %v10936_v53  ;;  %v6416_v8 = vld [vmem:[%s7946_s20 + $0x48] sm:$0xff] }
  0x23   : > { %783 = vrot.lane.b32.xlu2 %v6431_v10, %s7788_s27  ;;  %1172 = vst.msk [vmem:[#allocation2 + $0xa8] sm:$0xff] %vm799_vm0, %v10936_v53 }
  0x24   : > { %1173 = vst.msk [vmem:[#allocation2 + $0xb0] sm:$0xff] %vm799_vm0, %v10936_v53 }
  0x25   : > { %1174 = vst.msk [vmem:[#allocation2 + $0xb8] sm:$0x3] %vm1152_vm2, %v10936_v53 }
  0x26   : > { %1175 = vst.msk [vmem:[#allocation2 + $0xc0] sm:$0xff] %vm799_vm0, %v10936_v53 }
  0x27   : > { %1176 = vst.msk [vmem:[#allocation2 + $0xc8] sm:$0xff] %vm799_vm0, %v10936_v53 }
  0x28   : > { %1177 = vst.msk [vmem:[#allocation2 + $0xd0] sm:$0x3] %vm1152_vm2, %v10936_v53 }
  0x29   : > { %1178 = vst.msk [vmem:[#allocation2 + $0xd8] sm:$0xff] %vm799_vm0, %v10936_v53 }
  0x2a   : > { %785 = vrot.lane.b32.xlu0 %v6432_v11, %s7788_s27  ;;  %787 = vrot.lane.b32.xlu1 %v6433_v12, %s7788_s27  ;;  %1179 = vst.msk [vmem:[#allocation2 + $0xe0] sm:$0xff] %vm799_vm0, %v10936_v53 }
  0x2b   : > { %789 = vrot.lane.b32.xlu2 %v6434_v13, %s7788_s27  ;;  %1180 = vst.msk [vmem:[#allocation2 + $0xe8] sm:$0x3] %vm1152_vm2, %v10936_v53  ;;  %v6417_v13 = vld [vmem:[%s7946_s20 + $0x50] sm:$0xff] }
  0x2c   : > { %1181 = vst.msk [vmem:[#allocation2 + $0xf0] sm:$0xff] %vm799_vm0, %v10936_v53 }
  0x2d   : > { %1182 = vst.msk [vmem:[#allocation2 + $0xf8] sm:$0xff] %vm799_vm0, %v10936_v53 }
  0x2e   : > { %1183 = vst.msk [vmem:[#allocation2 + $0x100] sm:$0x3] %vm1152_vm2, %v10936_v53 }
  0x2f   : > { %1184 = vst.msk [vmem:[#allocation2 + $0x108] sm:$0xff] %vm799_vm0, %v10936_v53 }
  0x30   : > { %1185 = vst.msk [vmem:[#allocation2 + $0x110] sm:$0xff] %vm799_vm0, %v10936_v53 }
  0x31   : > { %1186 = vst.msk [vmem:[#allocation2 + $0x118] sm:$0x3] %vm1152_vm2, %v10936_v53 }
  0x32   : > { %791 = vrot.lane.b32.xlu0 %v6435_v14, %s7788_s27  ;;  %793 = vrot.lane.b32.xlu1 %v6436_v15, %s7788_s27  ;;  %1187 = vst.msk [vmem:[#allocation2 + $0x120] sm:$0xff] %vm799_vm0, %v10936_v53 }
  0x33   : > { %795 = vrot.lane.b32.xlu2 %v6437_v16, %s7788_s27  ;;  %1188 = vst.msk [vmem:[#allocation2 + $0x128] sm:$0xff] %vm799_vm0, %v10936_v53 }
  0x34   : > { %1189 = vst.msk [vmem:[#allocation2 + $0x130] sm:$0x3] %vm1152_vm2, %v10936_v53 }
  0x35   : > { %1190 = vst.msk [vmem:[#allocation2 + $0x138] sm:$0xff] %vm799_vm0, %v10936_v53 }
  0x36   : > { %1191 = vst.msk [vmem:[#allocation2 + $0x140] sm:$0xff] %vm799_vm0, %v10936_v53 }
  0x37   : > { %1192 = vst.msk [vmem:[#allocation2 + $0x148] sm:$0x3] %vm1152_vm2, %v10936_v53 }
  0x38   : > { %1193 = vst.msk [vmem:[#allocation2 + $0x150] sm:$0xff] %vm799_vm0, %v10936_v53 }
  0x39   : > { %1194 = vst.msk [vmem:[#allocation2 + $0x158] sm:$0xff] %vm799_vm0, %v10936_v53 }
  0x3a   : > { %797 = vrot.lane.b32.xlu0 %v6438_v17, %s7788_s27  ;;  %6492 = vrot.lane.b32.xlu1 %v6491_v57, %s7790_s23  ;;  %1195 = vst.msk [vmem:[#allocation2 + $0x160] sm:$0x3] %vm1152_vm2, %v10936_v53 }
  0x3b   : > { %1196 = vst.msk [vmem:[#allocation2 + $0x168] sm:$0xff] %vm799_vm0, %v10936_v53 }
  0x3c   : > { %1197 = vst.msk [vmem:[#allocation2 + $0x170] sm:$0xff] %vm799_vm0, %v10936_v53 }
  0x3d   : > { %1198 = vst.msk [vmem:[#allocation2 + $0x178] sm:$0x3] %vm1152_vm2, %v10936_v53 }
  0x3e   : > { %1199 = vst.msk [vmem:[#allocation2 + $0x180] sm:$0xff] %vm799_vm0, %v10936_v53 }
  0x3f   : > { %1200 = vst.msk [vmem:[#allocation2 + $0x188] sm:$0xff] %vm799_vm0, %v10936_v53 }
  0x40   : > { %1201 = vst.msk [vmem:[#allocation2 + $0x190] sm:$0x3] %vm1152_vm2, %v10936_v53 }
  0x41   : > { %1202 = vst.msk [vmem:[#allocation2 + $0x198] sm:$0xff] %vm799_vm0, %v10936_v53 }
  0x42   : > { %6487 = vrot.lane.b32.xlu0 %v6486_v62, %s7788_s27  ;;  %1203 = vst.msk [vmem:[#allocation2 + $0x1a0] sm:$0xff] %vm799_vm0, %v10936_v53 }
  0x43   : > { %1204 = vst.msk [vmem:[#allocation2 + $0x1a8] sm:$0x3] %vm1152_vm2, %v10936_v53 }
  0x6d   : > { %v776_v27 = vpop.permute.xlu2 %775 }
  0x6e   : > { %v814_v48 = vsel %vm799_vm0, %v6411_v46, %v776_v27 }
  0x75   : > { %v778_v32 = vpop.permute.xlu2 %777 }
  0x76   : > { %v817_v54 = vsel %vm799_vm0, %v6412_v51, %v778_v32 }
  0x7d   : > { %v7968_v37 = vpop.permute.xlu2 %783 }
  0x7e   : > { %v826_v5 = vsel %vm799_vm0, %v6415_v2, %v7968_v37 }
  0x84   : > { %v768_v19 = vpop.permute.xlu0 %767  ;;  %v772_v21 = vpop.permute.xlu1 %771 }
  0x85   : > { %v802_v20 = vsel %vm799_vm0, %v6407_v18, %v768_v19  ;;  %v808_v34 = vsel %vm799_vm0, %v6409_v30, %v772_v21  ;;  %v7976_v43 = vpop.permute.xlu2 %789 }
  0x86   : > { %6230 = vmatmul.msk.bf16.vlgmr.msra.gmra.mxu0 %vm868_vm1, %v802_v20 }
  0x8c   : > { %v770_v22 = vpop.permute.xlu0 %769  ;;  %v774_v24 = vpop.permute.xlu1 %773 }
  0x8d   : > { %v805_v26 = vsel %vm799_vm0, %v6408_v23, %v770_v22  ;;  %v811_v42 = vsel %vm799_vm0, %v6410_v40, %v774_v24  ;;  %v796_v45 = vpop.permute.xlu2 %795  ;;  %v6418_v22 = vld [vmem:[%s7946_s20 + $0x58] sm:$0xff] }
  0x8e   : > { %v844_v47 = vsel %vm799_vm0, %v6421_v44, %v796_v45  ;;  %v835_v27 = vsel %vm799_vm0, %v6418_v22, %v7976_v43 }
  0x94   : > { %v7952_v25 = vpop.permute.xlu0 %779  ;;  %v7958_v29 = vpop.permute.xlu1 %781 }
  0x95   : > { %v820_v59 = vsel %vm799_vm0, %v6413_v58, %v7952_v25  ;;  %v823_v0 = vsel %vm799_vm0, %v6414_v63, %v7958_v29 }
  0x96   : > { %6231 = vmatmul.msk.bf16.gmra.mxu0 %vm868_vm1, %v805_v26 }
  0x9c   : > { %v7956_v28 = vpop.permute.xlu0 %785  ;;  %v7966_v36 = vpop.permute.xlu1 %787 }
  0x9d   : > { %v829_v11 = vsel %vm799_vm0, %v6416_v8, %v7956_v28  ;;  %v832_v17 = vsel %vm799_vm0, %v6417_v13, %v7966_v36 }
  0xa4   : > { %v792_v33 = vpop.permute.xlu0 %791  ;;  %v794_v39 = vpop.permute.xlu1 %793 }
  0xa5   : > { %v838_v35 = vsel %vm799_vm0, %v6419_v31, %v792_v33  ;;  %v841_v41 = vsel %vm799_vm0, %v6420_v38, %v794_v39 }
  0xa6   : > { %6232 = vmatmul.msk.bf16.gmra.mxu0 %vm868_vm1, %v808_v34  ;;  %6242 = vmatmul.msk.bf16.vlgmr.msra.gmra.mxu1 %vm868_vm1, %v838_v35 }
  0xac   : > { %v798_v50 = vpop.permute.xlu0 %797  ;;  %v8241_v57 = vpop.permute.xlu1 %6492 }
  0xad   : > { %v847_v52 = vsel %vm799_vm0, %v6422_v49, %v798_v50 }
  0xb6   : > { %6233 = vmatmul.msk.bf16.gmra.mxu0 %vm868_vm1, %v811_v42  ;;  %6243 = vmatmul.msk.bf16.gmra.mxu1 %vm868_vm1, %v841_v41 }
  0xc6   : > { %6234 = vmatmul.msk.bf16.gmra.mxu0 %vm868_vm1, %v814_v48  ;;  %6244 = vmatmul.msk.bf16.gmra.mxu1 %vm868_vm1, %v844_v47 }
  0xd6   : > { %6235 = vmatmul.msk.bf16.gmra.mxu0 %vm868_vm1, %v817_v54  ;;  %6245 = vmatmul.msk.bf16.gmra.mxu1 %vm868_vm1, %v847_v52 }
  0xe6   : > { %6236 = vmatmul.msk.bf16.gmra.mxu0 %vm868_vm1, %v820_v59 }
  0xf6   : > { %6237 = vmatmul.msk.bf16.gmra.mxu0 %vm868_vm1, %v823_v0  ;;  %v8255_v0 = vpop.permute.xlu0 %6487 }
 0x103   : > { %v910_v3 = vpop.f32.mrf.mxu0 }
 0x104   : > { %v8105_v4 = vadd.f32 %v8093_v1, %v910_v3 }
 0x106   : > { %6238 = vmatmul.msk.bf16.gmra.mxu0 %vm868_vm1, %v826_v5  ;;  %1022 = vrot.lane.b32.xlu1 %v8105_v4, %s7791_s28 }
 0x10b   : > { %v912_v6 = vpop.f32.mrf.mxu0 }
 0x10c   : > { %v8123_v7 = vadd.f32 %v8093_v1, %v912_v6 }
 0x10e   : > { %1024 = vrot.lane.b32.xlu2 %v8123_v7, %s7791_s28 }
 0x113   : > { %v915_v9 = vpop.f32.mrf.mxu0 }
 0x114   : > { %v8129_v10 = vadd.f32 %v8093_v1, %v915_v9 }
 0x116   : > { %6239 = vmatmul.msk.bf16.gmra.mxu0 %vm868_vm1, %v829_v11  ;;  %1026 = vrot.lane.b32.xlu0 %v8129_v10, %s7791_s28 }
 0x11b   : > { %v917_v12 = vpop.f32.mrf.mxu0 }
 0x11c   : > { %v8146_v20 = vadd.f32 %v8093_v1, %v917_v12 }
 0x123   : > { %v920_v14 = vpop.f32.mrf.mxu0  ;;  %v970_v15 = vpop.f32.mrf.mxu1 }
 0x124   : > { %v8138_v16 = vadd.f32 %v8093_v1, %v970_v15  ;;  %v8160_v26 = vadd.f32 %v8093_v1, %v920_v14 }
 0x126   : > { %6240 = vmatmul.msk.bf16.gmra.mxu0 %vm868_vm1, %v832_v17  ;;  %1070 = vrot.lane.b32.xlu1 %v8138_v16, %s7791_s28 }
 0x12b   : > { %v922_v18 = vpop.f32.mrf.mxu0  ;;  %v972_v19 = vpop.f32.mrf.mxu1 }
 0x12c   : > { %v8149_v21 = vadd.f32 %v8093_v1, %v972_v19  ;;  %v8170_v30 = vadd.f32 %v8093_v1, %v922_v18 }
 0x12e   : > { %1072 = vrot.lane.b32.xlu2 %v8149_v21, %s7791_s28  ;;  %1028 = vrot.lane.b32.xlu1 %v8146_v20, %s7791_s28 }
 0x133   : > { %v925_v23 = vpop.f32.mrf.mxu0  ;;  %v975_v24 = vpop.f32.mrf.mxu1 }
 0x134   : > { %v8157_v25 = vadd.f32 %v8093_v1, %v975_v24  ;;  %v8180_v34 = vadd.f32 %v8093_v1, %v925_v23 }
 0x136   : > { %6241 = vmatmul.msk.bf16.gmra.mxu0 %vm868_vm1, %v835_v27  ;;  %1074 = vrot.lane.b32.xlu0 %v8157_v25, %s7791_s28 }
 0x137   : > { %1030 = vrot.lane.b32.xlu2 %v8160_v26, %s7791_s28 }
 0x13b   : > { %v927_v28 = vpop.f32.mrf.mxu0  ;;  %v977_v29 = vpop.f32.mrf.mxu1 }
 0x13c   : > { %v8173_v31 = vadd.f32 %v8093_v1, %v977_v29  ;;  %v8190_v38 = vadd.f32 %v8093_v1, %v927_v28 }
 0x13e   : > { %1032 = vrot.lane.b32.xlu0 %v8170_v30, %s7791_s28  ;;  %1076 = vrot.lane.b32.xlu1 %v8173_v31, %s7791_s28 }
 0x143   : > { %v930_v32 = vpop.f32.mrf.mxu0  ;;  %v980_v33 = vpop.f32.mrf.mxu1 }
 0x144   : > { %v8183_v35 = vadd.f32 %v8093_v1, %v980_v33  ;;  %v8200_v42 = vadd.f32 %v8093_v1, %v930_v32 }
 0x146   : > { %1078 = vrot.lane.b32.xlu2 %v8183_v35, %s7791_s28  ;;  %1034 = vrot.lane.b32.xlu1 %v8180_v34, %s7791_s28 }
 0x14b   : > { %v932_v36 = vpop.f32.mrf.mxu0  ;;  %v982_v37 = vpop.f32.mrf.mxu1 }
 0x14c   : > { %v8193_v39 = vadd.f32 %v8093_v1, %v982_v37  ;;  %v8216_v48 = vadd.f32 %v8093_v1, %v932_v36 }
 0x14e   : > { %1080 = vrot.lane.b32.xlu0 %v8193_v39, %s7791_s28  ;;  %1036 = vrot.lane.b32.xlu2 %v8190_v38, %s7791_s28 }
 0x153   : > { %v935_v40 = vpop.f32.mrf.mxu0  ;;  %v985_v41 = vpop.f32.mrf.mxu1 }
 0x154   : > { %v8203_v43 = vadd.f32 %v8093_v1, %v985_v41  ;;  %v8225_v50 = vadd.f32 %v8093_v1, %v935_v40 }
 0x156   : > { %1038 = vrot.lane.b32.xlu0 %v8200_v42, %s7791_s28  ;;  %1082 = vrot.lane.b32.xlu1 %v8203_v43, %s7791_s28 }
 0x15b   : > { %v937_v44 = vpop.f32.mrf.mxu0  ;;  %v987_v45 = vpop.f32.mrf.mxu1 }
 0x15c   : > { %v8210_v46 = vadd.f32 %v8093_v1, %v937_v44  ;;  %v8213_v47 = vadd.f32 %v8093_v1, %v987_v45 }
 0x15e   : > { %1044 = vrot.lane.b32.xlu0 %v8210_v46, %s7791_s28  ;;  %1084 = vrot.lane.b32.xlu2 %v8213_v47, %s7791_s28 }
 0x15f   : > { %1040 = vrot.lane.b32.xlu1 %v8216_v48, %s7791_s28 }
 0x163   : > { %v940_v49 = vpop.f32.mrf.mxu0 }
 0x164   : > { %v8228_v51 = vadd.f32 %v8093_v1, %v940_v49 }
 0x166   : > { %1042 = vrot.lane.b32.xlu2 %v8225_v50, %s7791_s28 }
 0x167   : > { %1046 = vrot.lane.b32.xlu1 %v8228_v51, %s7791_s28 }
 0x168   : > { %v1025_v52 = vpop.permute.xlu2 %1024 }
 0x169   : > { %v1119_v54 = vmul.f32 %v1025_v52, %v8123_v7 }
 0x16b   : > { %1207 = vst.msk [vmem:[#allocation2 + $0x21] sm:$0xff] %vm799_vm0, %v1119_v54  ;;  %v942_v55 = vpop.f32.mrf.mxu0 }
 0x16c   : > { %v8237_v56 = vadd.f32 %v8093_v1, %v942_v55 }
 0x16e   : > { %1048 = vrot.lane.b32.xlu2 %v8237_v56, %s7791_s28 }
 0x172   : > { %v1367_v3 = vld [vmem:[#allocation2 + $0x21] sm:$0xff] }
 0x173   : > { %v945_v58 = vpop.f32.mrf.mxu0  ;;  %v1305_v13 = vld [vmem:[#allocation2 + $0x22] sm:$0xff] }
 0x174   : > { %v8244_v59 = vadd.f32 %v8093_v1, %v945_v58 }
 0x176   : > { %1050 = vrot.lane.b32.xlu0 %v8244_v59, %s7791_s28 }
 0x178   : > { %v1023_v60 = vpop.permute.xlu1 %1022 }
 0x179   : > { %v1118_v61 = vmul.f32 %v1023_v60, %v8105_v4 }
 0x17b   : > { %1206 = vst.msk [vmem:[#allocation2 + $0x19] sm:$0xff] %vm799_vm0, %v1118_v61  ;;  %v947_v62 = vpop.f32.mrf.mxu0 }
 0x17c   : > { %v8251_v63 = vadd.f32 %v8093_v1, %v947_v62 }
 0x17e   : > { %1052 = vrot.lane.b32.xlu1 %v8251_v63, %s7791_s28 }
 0x182   : > { %v1366_v2 = vld [vmem:[#allocation2 + $0x19] sm:$0xff] }
 0x183   : > { %v950_v5 = vpop.f32.mrf.mxu0  ;;  %v6526_v6 = vpack.i.bf16 %v1367_v3, %v1366_v2  ;;  %v1304_v12 = vld [vmem:[#allocation2 + $0x1a] sm:$0xff] }
 0x184   : > { %v8258_v7 = vadd.f32 %v8093_v1, %v950_v5  ;;  %v6506_v14 = vpack.i.bf16 %v1305_v13, %v1304_v12  ;;  %v8282_v36 = vld [vmem:[#allocation2 + $0x20] sm:$0xff] }
 0x185   : > { %6527 = vrot.lane.b32.xlu0 %v6526_v6, %s7792_s29 }
 0x186   : > { %1054 = vrot.lane.b32.xlu2 %v8258_v7, %s7791_s28  ;;  %6497 = vrot.lane.b32.xlu1 %v6526_v6, %s7788_s27 }
 0x188   : > { %v1027_v4 = vpop.permute.xlu0 %1026  ;;  %v1073_v8 = vpop.permute.xlu2 %1072 }
 0x189   : > { %v1120_v9 = vmul.f32 %v1027_v4, %v8129_v10  ;;  %v1143_v11 = vmul.f32 %v1073_v8, %v8149_v21  ;;  %v8313_v8 = vld [vmem:[%s10923_s4 + $0x40] sm:$0xff] }
 0x18a   : > { %6462 = vmatpush.bf16.msra.mxu2 %v8313_v8 }
 0x18b   : > { %1208 = vst.msk [vmem:[#allocation2 + $0x31] sm:$0xff] %vm799_vm0, %v1120_v9 }
 0x18c   : > { %1231 = vst.msk [vmem:[#allocation2 + $0x141] sm:$0xff] %vm799_vm0, %v1143_v11 }
 0x18e   : > { %6507 = vrot.lane.b32.xlu2 %v6506_v14, %s7790_s23 }
 0x191   : > { %v1031_v15 = vpop.permute.xlu2 %1030 }
 0x192   : > { %v1122_v17 = vmul.f32 %v1031_v15, %v8160_v26  ;;  %v1368_v4 = vld [vmem:[#allocation2 + $0x31] sm:$0xff] }
 0x193   : > { %v1391_v24 = vld [vmem:[#allocation2 + $0x141] sm:$0xff] }
 0x194   : > { %1210 = vst.msk [vmem:[#allocation2 + $0x49] sm:$0xff] %vm799_vm0, %v1122_v17  ;;  %v1329_v29 = vld [vmem:[#allocation2 + $0x142] sm:$0xff] }
 0x198   : > { %v1071_v18 = vpop.permute.xlu1 %1070 }
 0x199   : > { %v1142_v19 = vmul.f32 %v1071_v18, %v8138_v16  ;;  %v952_v16 = vpop.f32.mrf.mxu0 }
 0x19a   : > { %v8287_v41 = vadd.f32 %v8093_v1, %v952_v16 }
 0x19b   : > { %1230 = vst.msk [vmem:[#allocation2 + $0x139] sm:$0xff] %vm799_vm0, %v1142_v19 }
 0x1a0   : > { %v1079_v10 = vpop.permute.xlu2 %1078  ;;  %v1029_v21 = vpop.permute.xlu1 %1028 }
 0x1a1   : > { %v1146_v22 = vmul.f32 %v1079_v10, %v8183_v35  ;;  %v1121_v23 = vmul.f32 %v1029_v21, %v8146_v20  ;;  %v8280_v20 = vld [vmem:[#allocation2 + $0x18] sm:$0xff]  ;;  %v955_v55 = vpop.f32.mrf.mxu0  ;;  %v8326_v21 = vld [vmem:[#allocation2 + $0x30] sm:$0xff] }
 0x1a2   : > { %v1390_v27 = vld [vmem:[#allocation2 + $0x139] sm:$0xff]  ;;  %v6516_v44 = vpack.i.bf16 %v8282_v36, %v8280_v20  ;;  %v8301_v2 = vadd.f32 %v8093_v1, %v955_v55 }
 0x1a3   : > { %v1328_v28 = vld [vmem:[#allocation2 + $0x13a] sm:$0xff]  ;;  %1234 = vst.msk [vmem:[#allocation2 + $0x169] sm:$0xff] %vm799_vm0, %v1146_v22  ;;  %v6531_v26 = vpack.i.bf16 %v1391_v24, %v1390_v27 }
 0x1a4   : > { %v6511_v32 = vpack.i.bf16 %v1329_v29, %v1328_v28  ;;  %1209 = vst.msk [vmem:[#allocation2 + $0x39] sm:$0xff] %vm799_vm0, %v1121_v23  ;;  %v1359_v49 = vld [vmem:[#allocation2 + $0x140] sm:$0xff] }
 0x1a5   : > { %6532 = vrot.lane.b32.xlu0 %v6531_v26, %s7792_s29  ;;  %6502 = vrot.lane.b32.xlu1 %v6531_v26, %s7788_s27 }
 0x1a6   : > { %6512 = vrot.lane.b32.xlu2 %v6511_v32, %s7790_s23 }
 0x1a8   : > { %v1075_v33 = vpop.permute.xlu0 %1074  ;;  %v1037_v35 = vpop.permute.xlu2 %1036 }
 0x1a9   : > { %v1144_v37 = vmul.f32 %v1075_v33, %v8157_v25  ;;  %v1125_v40 = vmul.f32 %v1037_v35, %v8190_v38  ;;  %v1358_v25 = vld [vmem:[#allocation2 + $0x138] sm:$0xff] }
 0x1aa   : > { %v6521_v61 = vpack.i.bf16 %v1359_v49, %v1358_v25 }
 0x1ab   : > { %1232 = vst.msk [vmem:[#allocation2 + $0x151] sm:$0xff] %vm799_vm0, %v1144_v37  ;;  %v1306_v52 = vld [vmem:[#allocation2 + $0x32] sm:$0xff]  ;;  %v1307_v54 = vld [vmem:[#allocation2 + $0x3a] sm:$0xff] }
 0x1ac   : > { %1213 = vst.msk [vmem:[#allocation2 + $0x69] sm:$0xff] %vm799_vm0, %v1125_v40  ;;  %v6551_v62 = vpack.i.bf16 %v1307_v54, %v1306_v52  ;;  %v1369_v5 = vld [vmem:[#allocation2 + $0x39] sm:$0xff]  ;;  %v1276_v54 = vld [vmem:[#allocation2 + $0x49] sm:$0xff] }
 0x1ad   : > { %1056 = vrot.lane.b32.xlu0 %v8287_v41, %s7791_s28  ;;  %6537 = vrot.lane.b32.xlu1 %v6506_v14, %s7794_s0  ;;  %v6571_v9 = vpack.i.bf16 %v1369_v5, %v1368_v4  ;;  %v8323_v18 = vld [vmem:[#allocation2 + $0x38] sm:$0xff] }
 0x1ae   : > { %6517 = vrot.lane.b32.xlu2 %v6516_v44, %s7793_s30  ;;  %v6561_v22 = vpack.i.bf16 %v8323_v18, %v8326_v21 }
 0x1b0   : > { %v1033_v38 = vpop.permute.xlu0 %1032  ;;  %v1077_v45 = vpop.permute.xlu1 %1076 }
 0x1b1   : > { %v1123_v58 = vmul.f32 %v1033_v38, %v8170_v30  ;;  %v1145_v60 = vmul.f32 %v1077_v45, %v8173_v31 }
 0x1b2   : > { %v1392_v19 = vld [vmem:[#allocation2 + $0x151] sm:$0xff] }
 0x1b3   : > { %1211 = vst.msk [vmem:[#allocation2 + $0x51] sm:$0xff] %vm799_vm0, %v1123_v58  ;;  %v1360_v32 = vld [vmem:[#allocation2 + $0x150] sm:$0xff] }
 0x1b4   : > { %1233 = vst.msk [vmem:[#allocation2 + $0x159] sm:$0xff] %vm799_vm0, %v1145_v60 }
 0x1b5   : > { %6552 = vrot.lane.b32.xlu0 %v6551_v62, %s7790_s23  ;;  %1058 = vrot.lane.b32.xlu1 %v8301_v2, %s7791_s28 }
 0x1b6   : > { %6522 = vrot.lane.b32.xlu2 %v6521_v61, %s7793_s30 }
 0x1b8   : > { %v1085_v3 = vpop.permute.xlu2 %1084  ;;  %v1035_v30 = vpop.permute.xlu1 %1034 }
 0x1b9   : > { %v1149_v31 = vmul.f32 %v1085_v3, %v8213_v47  ;;  %v1124_v6 = vmul.f32 %v1035_v30, %v8180_v34 }
 0x1ba   : > { %v1308_v35 = vld [vmem:[#allocation2 + $0x4a] sm:$0xff]  ;;  %v1309_v37 = vld [vmem:[#allocation2 + $0x52] sm:$0xff] }
 0x1bb   : > { %1237 = vst.msk [vmem:[#allocation2 + $0x189] sm:$0xff] %vm799_vm0, %v1149_v31  ;;  %v1330_v11 = vld [vmem:[#allocation2 + $0x152] sm:$0xff]  ;;  %v1331_v12 = vld [vmem:[#allocation2 + $0x15a] sm:$0xff]  ;;  %v6606_v25 = vpack.i.bf16 %v1309_v37, %v1308_v35  ;;  %v8374_v31 = vld [vmem:[#allocation2 + $0x48] sm:$0xff] }
 0x1bc   : > { %1212 = vst.msk [vmem:[#allocation2 + $0x61] sm:$0xff] %vm799_vm0, %v1124_v6  ;;  %v6556_v13 = vpack.i.bf16 %v1331_v12, %v1330_v11  ;;  %v1393_v14 = vld [vmem:[#allocation2 + $0x159] sm:$0xff]  ;;  %v1277_v49 = vld [vmem:[#allocation2 + $0x51] sm:$0xff]  ;;  %v1300_v6 = vld [vmem:[#allocation2 + $0x169] sm:$0xff] }
 0x1bd   : > { %6572 = vrot.lane.b32.xlu1 %v6571_v9, %s7792_s29  ;;  %v6576_v10 = vpack.i.bf16 %v1393_v14, %v1392_v19  ;;  %v1361_v29 = vld [vmem:[#allocation2 + $0x158] sm:$0xff]  ;;  %v6596_v61 = vpack.i.bf16 %v1277_v49, %v1276_v54  ;;  %v8371_v30 = vld [vmem:[#allocation2 + $0x50] sm:$0xff] }
 0x1be   : > { %6542 = vrot.lane.b32.xlu2 %v6571_v9, %s7788_s27  ;;  %6557 = vrot.lane.b32.xlu0 %v6556_v13, %s7790_s23  ;;  %v6566_v16 = vpack.i.bf16 %v1361_v29, %v1360_v32  ;;  %v6616_v4 = vpack.i.bf16 %v8371_v30, %v8374_v31  ;;  %v6447_v54 = vld [vmem:[%s10923_s4 + $0x30] sm:$0xff] }
 0x1c0   : > { %v1081_v34 = vpop.permute.xlu0 %1080  ;;  %v1043_v47 = vpop.permute.xlu2 %1042 }
 0x1c1   : > { %v1147_v15 = vmul.f32 %v1081_v34, %v8193_v39  ;;  %v1128_v17 = vmul.f32 %v1043_v47, %v8225_v50  ;;  %v957_v39 = vpop.f32.mrf.mxu0  ;;  %v1362_v47 = vld [vmem:[#allocation2 + $0x168] sm:$0xff] }
 0x1c2   : > { %v8356_v52 = vadd.f32 %v8093_v1, %v957_v39 }
 0x1c3   : > { %1235 = vst.msk [vmem:[#allocation2 + $0x171] sm:$0xff] %vm799_vm0, %v1147_v15  ;;  %v1310_v35 = vld [vmem:[#allocation2 + $0x62] sm:$0xff] }
 0x1c4   : > { %1216 = vst.msk [vmem:[#allocation2 + $0x91] sm:$0xff] %vm799_vm0, %v1128_v17  ;;  %v8422_v37 = vld [vmem:[#allocation2 + $0x60] sm:$0xff] }
 0x1c5   : > { %6577 = vrot.lane.b32.xlu1 %v6576_v10, %s7792_s29 }
 0x1c6   : > { %6547 = vrot.lane.b32.xlu2 %v6576_v10, %s7788_s27  ;;  %6562 = vrot.lane.b32.xlu0 %v6561_v22, %s7793_s30  ;;  %v1372_v10 = vld [vmem:[#allocation2 + $0x61] sm:$0xff] }
 0x1c8   : > { %v1039_v50 = vpop.permute.xlu0 %1038  ;;  %v1049_v23 = vpop.permute.xlu2 %1048 }
 0x1c9   : > { %v1126_v24 = vmul.f32 %v1039_v50, %v8200_v42  ;;  %v1131_v27 = vmul.f32 %v1049_v23, %v8237_v56  ;;  %v1083_v28 = vpop.permute.xlu1 %1082  ;;  %v960_v56 = vpop.f32.mrf.mxu0 }
 0x1ca   : > { %v1148_v26 = vmul.f32 %v1083_v28, %v8203_v43  ;;  %v8347_v44 = vadd.f32 %v8093_v1, %v960_v56  ;;  %v1332_v38 = vld [vmem:[#allocation2 + $0x16a] sm:$0xff]  ;;  %v1333_v45 = vld [vmem:[#allocation2 + $0x172] sm:$0xff] }
 0x1cb   : > { %1214 = vst.msk [vmem:[#allocation2 + $0x79] sm:$0xff] %vm799_vm0, %v1126_v24  ;;  %v6611_v60 = vpack.i.bf16 %v1333_v45, %v1332_v38  ;;  %v1301_v5 = vld [vmem:[#allocation2 + $0x171] sm:$0xff] }
 0x1cc   : > { %1219 = vst.msk [vmem:[#allocation2 + $0xb1] sm:$0xff] %vm799_vm0, %v1131_v27  ;;  %v1363_v12 = vld [vmem:[#allocation2 + $0x170] sm:$0xff]  ;;  %v6448_v45 = vld [vmem:[%s10923_s4 + $0x38] sm:$0xff] }
 0x1cd   : > { %1236 = vst.msk [vmem:[#allocation2 + $0x181] sm:$0xff] %vm799_vm0, %v1148_v26  ;;  %6587 = vrot.lane.b32.xlu1 %v6561_v22, %s7795_s19  ;;  %v6621_v14 = vpack.i.bf16 %v1363_v12, %v1362_v47  ;;  %v1373_v22 = vld [vmem:[#allocation2 + $0x69] sm:$0xff]  ;;  %2808 = vmatpush.bf16.msrb.mxu1 %v6448_v45  ;;  %v1282_v45 = vld [vmem:[#allocation2 + $0x91] sm:$0xff] }
 0x1ce   : > { %6582 = vrot.lane.b32.xlu2 %v6551_v62, %s7794_s0  ;;  %6567 = vrot.lane.b32.xlu0 %v6566_v16, %s7793_s30  ;;  %v6671_v39 = vpack.i.bf16 %v1373_v22, %v1372_v10  ;;  %v1397_v26 = vld [vmem:[#allocation2 + $0x189] sm:$0xff] }
 0x1cf   : > { %v6442_v22 = vld [vmem:[%s10923_s4 + $0x8] sm:$0xff] }
 0x1d0   : > { %v1045_v42 = vpop.permute.xlu0 %1044 }
 0x1d1   : > { %v1129_v33 = vmul.f32 %v1045_v42, %v8210_v46  ;;  %v1041_v43 = vpop.permute.xlu1 %1040  ;;  %v962_v17 = vpop.f32.mrf.mxu0  ;;  %2809 = vmatpush.bf16.msrb.mxu1 %v6447_v54 }
 0x1d2   : > { %v1127_v40 = vmul.f32 %v1041_v43, %v8216_v48  ;;  %v8406_v32 = vadd.f32 %v8093_v1, %v962_v17 }
 0x1d3   : > { %1217 = vst.msk [vmem:[#allocation2 + $0x99] sm:$0xff] %vm799_vm0, %v1129_v33  ;;  %v8408_v42 = vld [vmem:[#allocation2 + $0xb2] sm:$0xff] }
 0x1d4   : > { %1215 = vst.msk [vmem:[#allocation2 + $0x81] sm:$0xff] %vm799_vm0, %v1127_v40  ;;  %v1396_v24 = vld [vmem:[#allocation2 + $0x181] sm:$0xff] }
 0x1d5   : > { %6607 = vrot.lane.b32.xlu1 %v6606_v25, %s7790_s23  ;;  %v6676_v16 = vpack.i.bf16 %v1397_v26, %v1396_v24  ;;  %v8424_v40 = vld [vmem:[#allocation2 + $0x68] sm:$0xff] }
 0x1d6   : > { %6592 = vrot.lane.b32.xlu2 %v6571_v9, %s7791_s28  ;;  %1062 = vrot.lane.b32.xlu0 %v8347_v44, %s7791_s28  ;;  %v6601_v9 = vpack.i.bf16 %v1301_v5, %v1300_v6  ;;  %v6686_v38 = vpack.i.bf16 %v8424_v40, %v8422_v37  ;;  %v1364_v5 = vld [vmem:[#allocation2 + $0x180] sm:$0xff]  ;;  %v1365_v6 = vld [vmem:[#allocation2 + $0x188] sm:$0xff] }
 0x1d9   : > { %v1047_v46 = vpop.permute.xlu1 %1046  ;;  %v965_v23 = vpop.f32.mrf.mxu0 }
 0x1da   : > { %v1130_v48 = vmul.f32 %v1047_v46, %v8228_v51  ;;  %v8382_v13 = vld [vmem:[#allocation2 + $0x92] sm:$0xff]  ;;  %v8384_v34 = vld [vmem:[#allocation2 + $0x9a] sm:$0xff] }
 0x1db   : > { %v8358_v55 = vld [vmem:[#allocation2 + $0x7a] sm:$0xff]  ;;  %v8360_v58 = vld [vmem:[#allocation2 + $0x82] sm:$0xff]  ;;  %v2661_v15 = vpack.c.bf16 %v8384_v34, %v8382_v13 }
 0x1dc   : > { %1218 = vst.msk [vmem:[#allocation2 + $0xa9] sm:$0xff] %vm799_vm0, %v1130_v48  ;;  %v2659_v62 = vpack.c.bf16 %v8360_v58, %v8358_v55  ;;  %v8473_v17 = vld [vmem:[#allocation2 + $0x80] sm:$0xff] }
 0x1dd   : > { %6612 = vrot.lane.b32.xlu1 %v6611_v60, %s7790_s23 }
 0x1de   : > { %1060 = vrot.lane.b32.xlu2 %v8356_v52, %s7791_s28  ;;  %6597 = vrot.lane.b32.xlu0 %v6596_v61, %s7788_s27 }
 0x1df   : > { %6285 = vmatmul.msk.bf16.vlgmr.msra.gmra.mxu2 %vm799_vm0, %v2659_v62  ;;  %v6446_v62 = vld [vmem:[%s10923_s4 + $0x28] sm:$0xff] }
 0x1e0   : > { %v1055_v51 = vpop.permute.xlu2 %1054  ;;  %2810 = vmatpush.bf16.msrb.mxu1 %v6446_v62  ;;  %v8525_v62 = vld [vmem:[#allocation2 + $0x98] sm:$0xff] }
 0x1e1   : > { %v1134_v3 = vmul.f32 %v1055_v51, %v8258_v7  ;;  %v967_v48 = vpop.f32.mrf.mxu0 }
 0x1e2   : > { %v8440_v60 = vadd.f32 %v8093_v1, %v967_v48 }
 0x1e3   : > { %1222 = vst.msk [vmem:[#allocation2 + $0xd9] sm:$0xff] %vm799_vm0, %v1134_v3  ;;  %v8400_v27 = vld [vmem:[#allocation2 + $0xaa] sm:$0xff] }
 0x1e4   : > { %v2663_v33 = vpack.c.bf16 %v8408_v42, %v8400_v27 }
 0x1e5   : > { %6617 = vrot.lane.b32.xlu1 %v6616_v4, %s7793_s30 }
 0x1e6   : > { %6627 = vrot.lane.b32.xlu2 %v6596_v61, %s7792_s29  ;;  %6602 = vrot.lane.b32.xlu0 %v6601_v9, %s7788_s27 }
 0x1e8   : > { %v1051_v11 = vpop.permute.xlu0 %1050  ;;  %v8398_v50 = vpop.permute.xlu2 %6507 }
 0x1e9   : > { %v1132_v7 = vmul.f32 %v1051_v11, %v8244_v59  ;;  %v6701_v11 = vpack.i.bf16 %v8360_v58, %v8358_v55  ;;  %v1374_v55 = vld [vmem:[#allocation2 + $0x79] sm:$0xff] }
 0x1eb   : > { %1220 = vst.msk [vmem:[#allocation2 + $0xc1] sm:$0xff] %vm799_vm0, %v1132_v7  ;;  %v6444_v7 = vld [vmem:[%s10923_s4 + $0x18] sm:$0xff] }
 0x1ed   : > { %6622 = vrot.lane.b32.xlu1 %v6621_v14, %s7793_s30 }
 0x1ee   : > { %6632 = vrot.lane.b32.xlu2 %v6601_v9, %s7792_s29  ;;  %6637 = vrot.lane.b32.xlu0 %v6606_v25, %s7794_s0  ;;  %v1311_v25 = vld [vmem:[#allocation2 + $0x6a] sm:$0xff]  ;;  %v6445_v9 = vld [vmem:[%s10923_s4 + $0x20] sm:$0xff] }
 0x1ef   : > { %6286 = vmatmul.msk.bf16.gmra.mxu2 %vm799_vm0, %v2661_v15  ;;  %v6656_v46 = vpack.i.bf16 %v1311_v25, %v1310_v35  ;;  %2811 = vmatpush.bf16.msrb.mxu1 %v6445_v9  ;;  %v1375_v15 = vld [vmem:[#allocation2 + $0x81] sm:$0xff] }
 0x1f0   : > { %v1053_v59 = vpop.permute.xlu1 %1052  ;;  %v6711_v58 = vpack.i.bf16 %v1375_v15, %v1374_v55  ;;  %v1238_v9 = vld [vmem:[#allocation2] sm:$0xff] }
 0x1f1   : > { %v1133_v19 = vmul.f32 %v1053_v59, %v8251_v63  ;;  %v8403_v63 = vadd.f32 %v8093_v1, %v965_v23  ;;  %v8475_v59 = vld [vmem:[#allocation2 + $0x78] sm:$0xff] }
 0x1f2   : > { %v6706_v10 = vpack.i.bf16 %v8473_v17, %v8475_v59 }
 0x1f3   : > { %1221 = vst.msk [vmem:[#allocation2 + $0xc9] sm:$0xff] %vm799_vm0, %v1133_v19  ;;  %2812 = vmatpush.bf16.msrb.mxu1 %v6444_v7  ;;  %v6443_v19 = vld [vmem:[%s10923_s4 + $0x10] sm:$0xff] }
 0x1f5   : > { %6642 = vrot.lane.b32.xlu1 %v6616_v4, %s7795_s19  ;;  %v6666_v4 = vpack.i.bf16 %v1365_v6, %v1364_v5  ;;  %v8527_v5 = vld [vmem:[#allocation2 + $0x90] sm:$0xff]  ;;  %v8531_v6 = vpack.i.bf16 %v8408_v42, %v8400_v27  ;;  %v6495_v27 = vunpack.i.h.bf16 %v8241_v57  ;;  %v6494_v42 = vunpack.i.l.bf16 %v8241_v57 }
 0x1f6   : > { %6647 = vrot.lane.b32.xlu2 %v6596_v61, %s7791_s28  ;;  %6672 = vrot.lane.b32.xlu0 %v6671_v39, %s7792_s29 }
 0x1f7   : > { %v8449_v51 = vpop.permute.xlu0 %6527  ;;  %2813 = vmatpush.bf16.msrb.mxu1 %v6443_v19  ;;  %v8550_v19 = vld [vmem:[#allocation2 + $0xb0] sm:$0xff] }
 0x1f8   : > { %v8454_v1 = vpop.permute.xlu1 %6497 }
 0x1fa   : > { %v1507_v28 = vld [vmem:[#allocation2 + $0xc2] sm:$0xff]  ;;  %v1508_v29 = vld [vmem:[#allocation2 + $0xca] sm:$0xff] }
 0x1fb   : > { %v8410_v56 = vpack.i.bf16 %v1508_v29, %v1507_v28  ;;  %v2665_v61 = vpack.c.bf16 %v1508_v29, %v1507_v28  ;;  %2814 = vmatpush.bf16.msrb.mxu1 %v6442_v22  ;;  %v6441_v29 = vld [vmem:[%s10923_s4] sm:$0xff] }
 0x1fd   : > { %1064 = vrot.lane.b32.xlu1 %v8406_v32, %s7791_s28 }
 0x1fe   : > { %1066 = vrot.lane.b32.xlu2 %v8403_v63, %s7791_s28  ;;  %6677 = vrot.lane.b32.xlu0 %v6676_v16, %s7792_s29 }
 0x1ff   : > { %6287 = vmatmul.msk.bf16.gmra.mxu2 %vm799_vm0, %v2663_v33  ;;  %2815 = vmatpush.bf16.msrb.mxu1 %v6441_v29  ;;  %v1283_v33 = vld [vmem:[#allocation2 + $0x99] sm:$0xff] }
 0x200   : > { %v8420_v43 = vpop.permute.xlu2 %6512  ;;  %v6731_v48 = vpack.i.bf16 %v1283_v33, %v1282_v45 }
 0x203   : > { %2904 = vmatpush.bf16.msra.mxu1 %v8313_v8  ;;  %v6736_v8 = vpack.i.bf16 %v8384_v34, %v8382_v13  ;;  %v6741_v13 = vpack.i.bf16 %v8525_v62, %v8527_v5  ;;  %v6490_v34 = vunpack.i.h.bf16 %v8255_v0 }
 0x205   : > { %6652 = vrot.lane.b32.xlu1 %v6671_v39, %s7788_s27 }
 0x206   : > { %6657 = vrot.lane.b32.xlu2 %v6656_v46, %s7790_s23  ;;  %6687 = vrot.lane.b32.xlu0 %v6686_v38, %s7795_s19 }
 0x208   : > { %v8434_v49 = vpop.permute.xlu2 %6517 }
 0x20d   : > { %6682 = vrot.lane.b32.xlu1 %v6656_v46, %s7794_s0 }
 0x20e   : > { %6662 = vrot.lane.b32.xlu2 %v6686_v38, %s7793_s30  ;;  %1068 = vrot.lane.b32.xlu0 %v8440_v60, %s7791_s28 }
 0x20f   : > { %6288 = vmatmul.msk.bf16.gmra.mxu2 %vm799_vm0, %v2665_v61 }
 0x210   : > { %v8452_v3 = vpop.permute.xlu2 %6522 }
 0x215   : > { %6692 = vrot.lane.b32.xlu1 %v6671_v39, %s7791_s28 }
 0x216   : > { %6667 = vrot.lane.b32.xlu2 %v6666_v4, %s7793_s30  ;;  %6702 = vrot.lane.b32.xlu0 %v6701_v11, %s7790_s23  ;;  %v6489_v4 = vunpack.i.l.bf16 %v8255_v0  ;;  %v8548_v0 = vld [vmem:[#allocation2 + $0xa8] sm:$0xff] }
 0x217   : > { %v8467_v12 = vpop.permute.xlu0 %6532  ;;  %v8471_v14 = vpop.permute.xlu1 %6502  ;;  %v6776_v57 = vpack.i.bf16 %v8550_v19, %v8548_v0 }
 0x218   : > { %v8469_v47 = vpop.permute.xlu2 %6542  ;;  %v2423_v22 = vsel %vm799_vm0, %v1238_v9, %v6489_v4 }
 0x21d   : > { %6712 = vrot.lane.b32.xlu1 %v6711_v58, %s7792_s29 }
 0x21e   : > { %6697 = vrot.lane.b32.xlu2 %v6711_v58, %s7788_s27  ;;  %6707 = vrot.lane.b32.xlu0 %v6706_v10, %s7793_s30 }
 0x21f   : > { %v1057_v39 = vpop.permute.xlu0 %1056  ;;  %v8491_v28 = vpop.permute.xlu1 %6537 }
 0x220   : > { %v8488_v23 = vpop.permute.xlu2 %6547  ;;  %v1135_v24 = vmul.f32 %v1057_v39, %v8287_v41  ;;  %v6520_v39 = vunpack.i.h.bf16 %v8434_v49  ;;  %v6539_v45 = vunpack.i.l.bf16 %v8491_v28 }
 0x222   : > { %1223 = vst.msk [vmem:[#allocation2 + $0xe1] sm:$0xff] %vm799_vm0, %v1135_v24  ;;  %v6519_v24 = vunpack.i.l.bf16 %v8434_v49  ;;  %v6530_v49 = vunpack.i.h.bf16 %v8449_v51 }
 0x225   : > { %6727 = vrot.lane.b32.xlu1 %v6711_v58, %s7791_s28 }
 0x226   : > { %6717 = vrot.lane.b32.xlu2 %v6701_v11, %s7794_s0  ;;  %6722 = vrot.lane.b32.xlu0 %v6706_v10, %s7795_s19  ;;  %v1239_v11 = vld [vmem:[#allocation2 + $0x8] sm:$0xff] }
 0x227   : > { %v8500_v26 = vpop.permute.xlu0 %6552  ;;  %v1059_v41 = vpop.permute.xlu1 %1058  ;;  %v2424_v10 = vsel %vm799_vm0, %v1239_v11, %v6490_v34 }
 0x228   : > { %v8502_v16 = vpop.permute.xlu2 %6582  ;;  %v1136_v35 = vmul.f32 %v1059_v41, %v8301_v2  ;;  %v2456_v29 = vsel %vm868_vm1, %v2424_v10, %v6495_v27 }
 0x229   : > { %v8506_v25 = vld [vmem:[#allocation2 + $0xda] sm:$0xff]  ;;  %v8508_v46 = vld [vmem:[#allocation2 + $0xe2] sm:$0xff]  ;;  %v2489_v41 = vsel %vm2487_vm3, %v2456_v29, %v6520_v39  ;;  %v1379_v39 = vld [vmem:[#allocation2 + $0xb1] sm:$0xff] }
 0x22a   : > { %v2667_v38 = vpack.c.bf16 %v8508_v46, %v8506_v25  ;;  %1224 = vst.msk [vmem:[#allocation2 + $0xf1] sm:$0xff] %vm799_vm0, %v1136_v35  ;;  %v6540_v35 = vunpack.i.h.bf16 %v8491_v28  ;;  %v2522_v4 = vsel %vm2520_vm4, %v2489_v41, %v6530_v49 }
 0x22c   : > { %6289 = vmatmul.msk.bf16.gmra.mxu2 %vm799_vm0, %v2667_v38  ;;  %v6529_v38 = vunpack.i.l.bf16 %v8449_v51 }
 0x22d   : > { %6737 = vrot.lane.b32.xlu1 %v6736_v8, %s7790_s23 }
 0x22e   : > { %6747 = vrot.lane.b32.xlu2 %v6731_v48, %s7792_s29  ;;  %6732 = vrot.lane.b32.xlu0 %v6731_v48, %s7788_s27 }
 0x22f   : > { %v8523_v61 = vpop.permute.xlu1 %6572 }
 0x230   : > { %v8519_v2 = vpop.permute.xlu2 %6592  ;;  %v8521_v54 = vpop.permute.xlu0 %6557 }
 0x231   : > { %v6594_v10 = vunpack.i.l.bf16 %v8519_v2 }
 0x235   : > { %6742 = vrot.lane.b32.xlu1 %v6741_v13, %s7793_s30 }
 0x236   : > { %6772 = vrot.lane.b32.xlu2 %v8531_v6, %s7790_s23  ;;  %6752 = vrot.lane.b32.xlu0 %v6736_v8, %s7794_s0 }
 0x237   : > { %v8546_v58 = vpop.permute.xlu1 %6577 }
 0x238   : > { %v1061_v7 = vpop.permute.xlu2 %1060  ;;  %v8543_v15 = vpop.permute.xlu0 %6562 }
 0x239   : > { %v1137_v55 = vmul.f32 %v1061_v7, %v8356_v52  ;;  %v2455_v52 = vsel %vm868_vm1, %v2423_v22, %v6494_v42  ;;  %v2555_v7 = vsel %vm2553_vm5, %v2522_v4, %v6540_v35  ;;  %v1380_v4 = vld [vmem:[#allocation2 + $0xc1] sm:$0xff] }
 0x23a   : > { %v2488_v33 = vsel %vm2487_vm3, %v2455_v52, %v6519_v24 }
 0x23b   : > { %1225 = vst.msk [vmem:[#allocation2 + $0xf9] sm:$0xff] %vm799_vm0, %v1137_v55  ;;  %v2521_v34 = vsel %vm2520_vm4, %v2488_v33, %v6529_v38  ;;  %v6595_v55 = vunpack.i.h.bf16 %v8519_v2 }
 0x23d   : > { %6762 = vrot.lane.b32.xlu1 %v6731_v48, %s7791_s28  ;;  %v1378_v48 = vld [vmem:[#allocation2 + $0xa9] sm:$0xff] }
 0x23e   : > { %6777 = vrot.lane.b32.xlu2 %v6776_v57, %s7793_s30  ;;  %6757 = vrot.lane.b32.xlu0 %v6741_v13, %s7795_s19  ;;  %v2554_v13 = vsel %vm2553_vm5, %v2521_v34, %v6539_v45  ;;  %v6781_v29 = vpack.i.bf16 %v1379_v39, %v1378_v48  ;;  %v1381_v45 = vld [vmem:[#allocation2 + $0xc9] sm:$0xff]  ;;  %v6500_v39 = vunpack.i.h.bf16 %v8454_v1 }
 0x23f   : > { %v6588_v11 = vpop.permute.xlu1 %6587 }
 0x240   : > { %v8570_v8 = vpop.permute.xlu2 %6627  ;;  %v8574_v9 = vpop.permute.xlu0 %6567  ;;  %v6590_v51 = vunpack.i.h.bf16 %v6588_v11  ;;  %v6589_v27 = vunpack.i.l.bf16 %v6588_v11  ;;  %v8600_v11 = vpack.i.bf16 %v1381_v45, %v1380_v4  ;;  %v1383_v45 = vld [vmem:[#allocation2 + $0xe1] sm:$0xff] }
 0x242   : > { %v8577_v42 = vld [vmem:[#allocation2 + $0xf2] sm:$0xff]  ;;  %v8579_v28 = vld [vmem:[#allocation2 + $0xfa] sm:$0xff]  ;;  %v2587_v24 = vsel %vm2586_vm6, %v2554_v13, %v6589_v27  ;;  %v2588_v52 = vsel %vm2586_vm6, %v2555_v7, %v6590_v51 }
 0x243   : > { %v2669_v22 = vpack.c.bf16 %v8579_v28, %v8577_v42  ;;  %v2620_v41 = vsel %vm2619_vm7, %v2587_v24, %v6594_v10  ;;  %v2621_v33 = vsel %vm2619_vm7, %v2588_v52, %v6595_v55  ;;  %v8628_v55 = vld [vmem:[#allocation2 + $0xc8] sm:$0xff]  ;;  %v8630_v10 = vld [vmem:[#allocation2 + $0xe0] sm:$0xff]  ;;  %v6499_v24 = vunpack.i.l.bf16 %v8454_v1 }
 0x244   : > { %v2652_v35 = vpack.c.bf16 %v2621_v33, %v2620_v41  ;;  %v6565_v1 = vunpack.i.h.bf16 %v8543_v15  ;;  %v6564_v33 = vunpack.i.l.bf16 %v8543_v15  ;;  %v1291_v4 = vld [vmem:[#allocation2 + $0xf9] sm:$0xff] }
 0x245   : > { %6290 = vmatmul.msk.bf16.gmra.mxu2 %vm799_vm0, %v2669_v22  ;;  %6767 = vrot.lane.b32.xlu1 %v6781_v29, %s7788_s27  ;;  %v2425_v41 = vsel %vm799_vm0, %v8280_v20, %v6499_v24 }
 0x246   : > { %6792 = vrot.lane.b32.xlu2 %v6776_v57, %s7795_s19  ;;  %6782 = vrot.lane.b32.xlu0 %v6781_v29, %s7792_s29 }
 0x247   : > { %2816 = vmatmul.bf16.vlgmr.msrb.gmra.mxu1 %v2652_v35  ;;  %v8596_v38 = vpop.permute.xlu1 %6607 }
 0x248   : > { %v8594_v2 = vpop.permute.xlu2 %6632  ;;  %v1063_v49 = vpop.permute.xlu0 %1062 }
 0x249   : > { %v1138_v34 = vmul.f32 %v1063_v49, %v8347_v44  ;;  %v8616_v44 = vpack.i.bf16 %v8508_v46, %v8506_v25  ;;  %v8633_v25 = vld [vmem:[#allocation2 + $0xc0] sm:$0xff]  ;;  %v8635_v46 = vld [vmem:[#allocation2 + $0xd8] sm:$0xff] }
 0x24a   : > { %v6826_v22 = vpack.i.bf16 %v8628_v55, %v8633_v25 }
 0x24b   : > { %1226 = vst.msk [vmem:[#allocation2 + $0x109] sm:$0xff] %vm799_vm0, %v1138_v34  ;;  %v6510_v34 = vunpack.i.h.bf16 %v8398_v50 }
 0x24d   : > { %6817 = vrot.lane.b32.xlu1 %v8600_v11, %s7792_s29 }
 0x24e   : > { %6802 = vrot.lane.b32.xlu2 %v8600_v11, %s7788_s27  ;;  %6787 = vrot.lane.b32.xlu0 %v8531_v6, %s7794_s0 }
 0x24f   : > { %v8612_v51 = vpop.permute.xlu1 %6612 }
 0x250   : > { %v8608_v57 = vpop.permute.xlu2 %6647  ;;  %v8610_v7 = vpop.permute.xlu0 %6597  ;;  %10944 = vst [vmem:[#allocation4_spill] sm:$0xff] %v8612_v51  ;;  %v6575_v51 = vunpack.i.h.bf16 %v8523_v61 }
 0x255   : > { %6842 = vrot.lane.b32.xlu1 %v8616_v44, %s7790_s23 }
 0x256   : > { %6822 = vrot.lane.b32.xlu2 %v8410_v56, %s7794_s0  ;;  %6797 = vrot.lane.b32.xlu0 %v6781_v29, %s7791_s28  ;;  %v2426_v29 = vsel %vm799_vm0, %v8282_v36, %v6500_v39  ;;  %v1290_v39 = vld [vmem:[#allocation2 + $0xf1] sm:$0xff] }
 0x257   : > { %v8626_v13 = vpop.permute.xlu1 %6617  ;;  %v8665_v53 = vpack.i.bf16 %v1291_v4, %v1290_v39  ;;  %v6649_v4 = vunpack.i.l.bf16 %v8608_v57 }
 0x258   : > { %v1067_v6 = vpop.permute.xlu2 %1066  ;;  %v8623_v27 = vpop.permute.xlu0 %6602 }
 0x259   : > { %10945 = vst [vmem:[#allocation5_spill] sm:$0xff] %v8623_v27  ;;  %v1140_v48 = vmul.f32 %v1067_v6, %v8403_v63  ;;  %v6846_v63 = vpack.i.bf16 %v8630_v10, %v8635_v46  ;;  %v1382_v6 = vld [vmem:[#allocation2 + $0xd9] sm:$0xff]  ;;  %v6574_v27 = vunpack.i.l.bf16 %v8523_v61 }
 0x25a   : > { %v6851_v20 = vpack.i.bf16 %v1383_v45, %v1382_v6 }
 0x25b   : > { %1228 = vst.msk [vmem:[#allocation2 + $0x121] sm:$0xff] %vm799_vm0, %v1140_v48  ;;  %v2458_v48 = vsel %vm868_vm1, %v2426_v29, %v6510_v34 }
 0x25c   : > { %v2491_v15 = vsel %vm2487_vm3, %v2458_v48, %v6565_v1  ;;  %v6585_v1 = vunpack.i.h.bf16 %v8502_v16 }
 0x25d   : > { %6847 = vrot.lane.b32.xlu1 %v6846_v63, %s7793_s30 }
 0x25e   : > { %6827 = vrot.lane.b32.xlu2 %v6826_v22, %s7795_s19  ;;  %6807 = vrot.lane.b32.xlu0 %v8410_v56, %s7790_s23  ;;  %v6509_v56 = vunpack.i.l.bf16 %v8398_v50 }
 0x25f   : > { %v8657_v49 = vpop.permute.xlu1 %6622 }
 0x260   : > { %v8647_v52 = vpop.permute.xlu2 %6657  ;;  %v8655_v35 = vpop.permute.xlu0 %6637  ;;  %v2457_v36 = vsel %vm868_vm1, %v2425_v41, %v6509_v56  ;;  %v2524_v41 = vsel %vm2520_vm4, %v2491_v15, %v6575_v51 }
 0x261   : > { %v2490_v24 = vsel %vm2487_vm3, %v2457_v36, %v6564_v33  ;;  %v6584_v33 = vunpack.i.l.bf16 %v8502_v16  ;;  %v2557_v36 = vsel %vm2553_vm5, %v2524_v41, %v6585_v1  ;;  %v6896_v16 = vpack.i.bf16 %v8579_v28, %v8577_v42  ;;  %v8701_v28 = vld [vmem:[#allocation2 + $0xf8] sm:$0xff]  ;;  %v8704_v41 = vld [vmem:[#allocation2 + $0xf0] sm:$0xff] }
 0x262   : > { %v2523_v29 = vsel %vm2520_vm4, %v2490_v24, %v6574_v27 }
 0x263   : > { %v2556_v6 = vsel %vm2553_vm5, %v2523_v29, %v6584_v33 }
 0x265   : > { %6877 = vrot.lane.b32.xlu1 %v8665_v53, %s7788_s27 }
 0x266   : > { %6852 = vrot.lane.b32.xlu2 %v6851_v20, %s7792_s29  ;;  %6812 = vrot.lane.b32.xlu0 %v6826_v22, %s7793_s30  ;;  %v6650_v22 = vunpack.i.h.bf16 %v8608_v57 }
 0x267   : > { %v6643_v61 = vpop.permute.xlu1 %6642 }
 0x268   : > { %v8673_v50 = vpop.permute.xlu2 %6662  ;;  %v8679_v45 = vpop.permute.xlu0 %6672  ;;  %v6645_v34 = vunpack.i.h.bf16 %v6643_v61  ;;  %v6644_v56 = vunpack.i.l.bf16 %v6643_v61 }
 0x26a   : > { %v2589_v27 = vsel %vm2586_vm6, %v2556_v6, %v6644_v56  ;;  %v2590_v51 = vsel %vm2586_vm6, %v2557_v36, %v6645_v34  ;;  %v6545_v36 = vunpack.i.h.bf16 %v8469_v47 }
 0x26b   : > { %v2622_v48 = vsel %vm2619_vm7, %v2589_v27, %v6649_v4  ;;  %v2623_v39 = vsel %vm2619_vm7, %v2590_v51, %v6650_v22  ;;  %v6554_v27 = vunpack.i.l.bf16 %v8500_v26 }
 0x26c   : > { %v2654_v24 = vpack.c.bf16 %v2623_v39, %v2622_v48  ;;  %v6555_v39 = vunpack.i.h.bf16 %v8500_v26 }
 0x26d   : > { %6897 = vrot.lane.b32.xlu1 %v6896_v16, %s7794_s0 }
 0x26e   : > { %6857 = vrot.lane.b32.xlu2 %v8616_v44, %s7794_s0  ;;  %6832 = vrot.lane.b32.xlu0 %v8600_v11, %s7791_s28  ;;  %v6901_v44 = vpack.i.bf16 %v8701_v28, %v8704_v41 }
 0x26f   : > { %2821 = vmatmul.bf16.gmra.mxu1 %v2654_v24  ;;  %v1065_v29 = vpop.permute.xlu1 %1064  ;;  %v8732_v24 = vld [vmem:[#allocation2 + $0x13a] sm:$0xff] }
 0x270   : > { %v8696_v57 = vpop.permute.xlu2 %6667  ;;  %v8698_v15 = vpop.permute.xlu0 %6677  ;;  %v1139_v42 = vmul.f32 %v1065_v29, %v8406_v32  ;;  %v1386_v32 = vld [vmem:[#allocation2 + $0x109] sm:$0xff]  ;;  %v6620_v29 = vunpack.i.h.bf16 %v8626_v13 }
 0x271   : > { %10946 = vst [vmem:[#allocation6_spill] sm:$0xff] %v8696_v57 }
 0x272   : > { %10947 = vst [vmem:[#allocation7_spill] sm:$0xff] %v8698_v15  ;;  %v8766_v15 = vld [vmem:[#allocation2 + $0x108] sm:$0xff] }
 0x273   : > { %1227 = vst.msk [vmem:[#allocation2 + $0x111] sm:$0xff] %vm799_vm0, %v1139_v42 }
 0x275   : > { %6902 = vrot.lane.b32.xlu1 %v6901_v44, %s7795_s19 }
 0x276   : > { %6862 = vrot.lane.b32.xlu2 %v6846_v63, %s7795_s19  ;;  %6837 = vrot.lane.b32.xlu0 %v6851_v20, %s7788_s27  ;;  %v6544_v63 = vunpack.i.l.bf16 %v8469_v47  ;;  %v8738_v47 = vld [vmem:[#allocation2 + $0x142] sm:$0xff] }
 0x277   : > { %v8713_v33 = vpop.permute.xlu1 %6652 }
 0x278   : > { %v8711_v11 = vpop.permute.xlu2 %6697  ;;  %v6688_v1 = vpop.permute.xlu0 %6687  ;;  %v2427_v42 = vsel %vm799_vm0, %v8326_v21, %v6544_v63  ;;  %v6629_v21 = vunpack.i.l.bf16 %v8570_v8 }
 0x279   : > { %v2459_v26 = vsel %vm868_vm1, %v2427_v42, %v6554_v27 }
 0x27a   : > { %v1513_v61 = vld [vmem:[#allocation2 + $0x10a] sm:$0xff]  ;;  %v1514_v34 = vld [vmem:[#allocation2 + $0x112] sm:$0xff] }
 0x27b   : > { %v1387_v56 = vld [vmem:[#allocation2 + $0x111] sm:$0xff]  ;;  %v2671_v22 = vpack.c.bf16 %v1514_v34, %v1513_v61 }
 0x27c   : > { %v8715_v4 = vpack.i.bf16 %v1387_v56, %v1386_v32  ;;  %v2428_v32 = vsel %vm799_vm0, %v8323_v18, %v6545_v36  ;;  %v6871_v56 = vpack.i.bf16 %v8738_v47, %v8732_v24  ;;  %v6640_v18 = vunpack.i.h.bf16 %v8655_v35 }
 0x27d   : > { %6291 = vmatmul.msk.bf16.gmra.mxu2 %vm799_vm0, %v2671_v22  ;;  %v2460_v22 = vsel %vm868_vm1, %v2428_v32, %v6555_v39  ;;  %v6689_v36 = vunpack.i.l.bf16 %v6688_v1 }
 0x27e   : > { %6882 = vrot.lane.b32.xlu2 %v6896_v16, %s7790_s23  ;;  %6867 = vrot.lane.b32.xlu0 %v6851_v20, %s7791_s28  ;;  %v6619_v16 = vunpack.i.l.bf16 %v8626_v13  ;;  %v2493_v63 = vsel %vm2487_vm3, %v2460_v22, %v6620_v29  ;;  %v8760_v29 = vld [vmem:[#allocation2 + $0x110] sm:$0xff] }
 0x27f   : > { %6927 = vrot.lane.b32.xlu1 %v8715_v4, %s7792_s29  ;;  %v8727_v48 = vpop.permute.xlu1 %6682 }
 0x280   : > { %v8723_v6 = vpop.permute.xlu2 %6717  ;;  %v1069_v51 = vpop.permute.xlu0 %1068  ;;  %v2492_v13 = vsel %vm2487_vm3, %v2459_v26, %v6619_v16 }
 0x281   : > { %v1141_v20 = vmul.f32 %v1069_v51, %v8440_v60  ;;  %v6931_v60 = vpack.i.bf16 %v1514_v34, %v1513_v61  ;;  %v6639_v51 = vunpack.i.l.bf16 %v8655_v35  ;;  %v6630_v61 = vunpack.i.h.bf16 %v8570_v8 }
 0x282   : > { %v6690_v34 = vunpack.i.h.bf16 %v6688_v1 }
 0x283   : > { %1229 = vst.msk [vmem:[#allocation2 + $0x129] sm:$0xff] %vm799_vm0, %v1141_v20  ;;  %v2526_v35 = vsel %vm2520_vm4, %v2493_v63, %v6630_v61  ;;  %v6936_v63 = vpack.i.bf16 %v8760_v29, %v8766_v15  ;;  %v6600_v61 = vunpack.i.h.bf16 %v8610_v7 }
 0x284   : > { %v2559_v8 = vsel %vm2553_vm5, %v2526_v35, %v6640_v18 }
 0x285   : > { %v2592_v57 = vsel %vm2586_vm6, %v2559_v8, %v6690_v34 }
 0x286   : > { %6887 = vrot.lane.b32.xlu2 %v6901_v44, %s7793_s30  ;;  %6872 = vrot.lane.b32.xlu0 %v6871_v56, %s7794_s0  ;;  %v2525_v44 = vsel %vm2520_vm4, %v2492_v13, %v6629_v21  ;;  %v6599_v21 = vunpack.i.l.bf16 %v8610_v7 }
 0x287   : > { %6932 = vrot.lane.b32.xlu1 %v6931_v60, %s7794_s0  ;;  %v6693_v16 = vpop.permute.xlu1 %6692  ;;  %v2558_v32 = vsel %vm2553_vm5, %v2525_v44, %v6639_v51  ;;  %v2430_v44 = vsel %vm799_vm0, %v8371_v30, %v6600_v61 }
 0x288   : > { %v8755_v27 = vpop.permute.xlu2 %6747  ;;  %v8757_v39 = vpop.permute.xlu0 %6702  ;;  %v6695_v20 = vunpack.i.h.bf16 %v6693_v16  ;;  %v6694_v42 = vunpack.i.l.bf16 %v6693_v16  ;;  %v2591_v1 = vsel %vm2586_vm6, %v2558_v32, %v6689_v36  ;;  %v2429_v34 = vsel %vm799_vm0, %v8374_v31, %v6599_v21 }
 0x289   : > { %v6609_v16 = vunpack.i.l.bf16 %v8596_v38  ;;  %v6675_v32 = vunpack.i.h.bf16 %v8679_v45  ;;  %v6674_v31 = vunpack.i.l.bf16 %v8679_v45 }
 0x28a   : > { %v1515_v26 = vld [vmem:[#allocation2 + $0x122] sm:$0xff]  ;;  %v1516_v56 = vld [vmem:[#allocation2 + $0x12a] sm:$0xff]  ;;  %v2624_v13 = vsel %vm2619_vm7, %v2591_v1, %v6694_v42  ;;  %v2625_v51 = vsel %vm2619_vm7, %v2592_v57, %v6695_v20  ;;  %v6665_v20 = vunpack.i.h.bf16 %v8673_v50  ;;  %v6610_v42 = vunpack.i.h.bf16 %v8596_v38 }
 0x28b   : > { %v2673_v22 = vpack.c.bf16 %v1516_v56, %v1515_v26  ;;  %v2656_v18 = vpack.c.bf16 %v2625_v51, %v2624_v13  ;;  %v2461_v35 = vsel %vm868_vm1, %v2429_v34, %v6609_v16  ;;  %v8799_v1 = vpack.i.bf16 %v1516_v56, %v1515_v26  ;;  %v8814_v16 = vld [vmem:[#allocation2 + $0x128] sm:$0xff] }
 0x28c   : > { %v2462_v8 = vsel %vm868_vm1, %v2430_v44, %v6610_v42  ;;  %v6684_v38 = vunpack.i.l.bf16 %v8727_v48 }
 0x28d   : > { %6292 = vmatmul.msk.bf16.gmra.mxu2 %vm799_vm0, %v2673_v22  ;;  %2826 = vmatmul.bf16.gmra.mxu1 %v2656_v18  ;;  %v2495_v30 = vsel %vm2487_vm3, %v2462_v8, %v6665_v20  ;;  %v8820_v20 = vld [vmem:[#allocation2 + $0x120] sm:$0xff] }
 0x28e   : > { %6907 = vrot.lane.b32.xlu2 %v8665_v53, %s7791_s28  ;;  %6892 = vrot.lane.b32.xlu0 %v8665_v53, %s7792_s29  ;;  %v6664_v53 = vunpack.i.l.bf16 %v8673_v50  ;;  %v6685_v50 = vunpack.i.h.bf16 %v8727_v48  ;;  %v2528_v21 = vsel %vm2520_vm4, %v2495_v30, %v6675_v32  ;;  %v1295_v30 = vld [vmem:[#allocation2 + $0x129] sm:$0xff] }
 0x28f   : > { %6937 = vrot.lane.b32.xlu1 %v6936_v63, %s7795_s19  ;;  %v8787_v7 = vpop.permute.xlu1 %6712 }
 0x290   : > { %v8781_v36 = vpop.permute.xlu2 %6772  ;;  %v8785_v57 = vpop.permute.xlu0 %6707  ;;  %v2494_v22 = vsel %vm2487_vm3, %v2461_v35, %v6664_v53  ;;  %v2561_v44 = vsel %vm2553_vm5, %v2528_v21, %v6685_v50  ;;  %v6956_v35 = vpack.i.bf16 %v8814_v16, %v8820_v20  ;;  %v1294_v50 = vld [vmem:[#allocation2 + $0x121] sm:$0xff] }
 0x291   : > { %v2527_v13 = vsel %vm2520_vm4, %v2494_v22, %v6674_v31 }
 0x292   : > { %v2560_v48 = vsel %vm2553_vm5, %v2527_v13, %v6684_v38  ;;  %v6946_v38 = vpack.i.bf16 %v1295_v30, %v1294_v50  ;;  %v1520_v13 = vld [vmem:[#allocation2 + $0x15a] sm:$0xff]  ;;  %v6720_v50 = vunpack.i.h.bf16 %v8723_v6 }
 0x296   : > { %6912 = vrot.lane.b32.xlu2 %v8715_v4, %s7788_s27  ;;  %6917 = vrot.lane.b32.xlu0 %v6931_v60, %s7790_s23  ;;  %v2675_v60 = vpack.c.bf16 %v8738_v47, %v8732_v24 }
 0x297   : > { %6952 = vrot.lane.b32.xlu1 %v8799_v1, %s7790_s23  ;;  %v6728_v56 = vpop.permute.xlu1 %6727 }
 0x298   : > { %v8810_v45 = vpop.permute.xlu2 %6777  ;;  %v6723_v26 = vpop.permute.xlu0 %6722  ;;  %v6730_v18 = vunpack.i.h.bf16 %v6728_v56  ;;  %v6729_v34 = vunpack.i.l.bf16 %v6728_v56  ;;  %v6654_v56 = vunpack.i.l.bf16 %v8713_v33 }
 0x299   : > { %v6725_v51 = vunpack.i.h.bf16 %v6723_v26  ;;  %v6724_v61 = vunpack.i.l.bf16 %v6723_v26  ;;  %v6655_v26 = vunpack.i.h.bf16 %v8713_v33  ;;  %v6709_v33 = vunpack.i.l.bf16 %v8785_v57 }
 0x29b   : > { %v2593_v53 = vsel %vm2586_vm6, %v2560_v48, %v6724_v61  ;;  %v2594_v42 = vsel %vm2586_vm6, %v2561_v44, %v6725_v51  ;;  %v2432_v21 = vsel %vm799_vm0, %v8424_v40, %v6655_v26  ;;  %v2431_v51 = vsel %vm799_vm0, %v8422_v37, %v6654_v56 }
 0x29c   : > { %v2626_v32 = vsel %vm2619_vm7, %v2593_v53, %v6729_v34  ;;  %v2627_v31 = vsel %vm2619_vm7, %v2594_v42, %v6730_v18  ;;  %v6710_v61 = vunpack.i.h.bf16 %v8785_v57  ;;  %v6660_v48 = vunpack.i.h.bf16 %v8647_v52 }
 0x29d   : > { %6293 = vmatmul.msk.bf16.gmra.mxu2 %vm799_vm0, %v2675_v60  ;;  %v2658_v8 = vpack.c.bf16 %v2627_v31, %v2626_v32  ;;  %v6659_v44 = vunpack.i.l.bf16 %v8647_v52  ;;  %v1485_v60 = vld [vmem:[#allocation2 + $0x139] sm:$0xff]  ;;  %v6715_v37 = vunpack.i.h.bf16 %v8787_v7  ;;  %v1486_v32 = vld [vmem:[#allocation2 + $0x141] sm:$0xff]  ;;  %v6719_v26 = vunpack.i.l.bf16 %v8723_v6 }
 0x29e   : > { %6942 = vrot.lane.b32.xlu2 %v8715_v4, %s7791_s28  ;;  %6922 = vrot.lane.b32.xlu0 %v6936_v63, %s7793_s30  ;;  %v1519_v63 = vld [vmem:[#allocation2 + $0x152] sm:$0xff]  ;;  %v2464_v40 = vsel %vm868_vm1, %v2432_v21, %v6660_v48 }
 0x29f   : > { %6957 = vrot.lane.b32.xlu1 %v6956_v35, %s7793_s30  ;;  %2831 = vmatmul.bf16.gmra.mxu1 %v2658_v8  ;;  %v8837_v22 = vpop.permute.xlu1 %6737  ;;  %v2677_v53 = vpack.c.bf16 %v1520_v13, %v1519_v63  ;;  %v2463_v42 = vsel %vm868_vm1, %v2431_v51, %v6659_v44  ;;  %v2497_v31 = vsel %vm2487_vm3, %v2464_v40, %v6710_v61  ;;  %v1488_v48 = vld [vmem:[#allocation2 + $0x159] sm:$0xff] }
 0x2a0   : > { %v8833_v24 = vpop.permute.xlu2 %6792  ;;  %v8835_v47 = vpop.permute.xlu0 %6732  ;;  %v2496_v57 = vsel %vm2487_vm3, %v2463_v42, %v6709_v33  ;;  %v6986_v8 = vpack.i.bf16 %v1486_v32, %v1485_v60  ;;  %v2530_v30 = vsel %vm2520_vm4, %v2497_v31, %v6715_v37  ;;  %v1453_v44 = vld [vmem:[#allocation2 + $0x138] sm:$0xff]  ;;  %v1454_v60 = vld [vmem:[#allocation2 + $0x140] sm:$0xff]  ;;  %v6991_v40 = vpack.i.bf16 %v1520_v13, %v1519_v63 }
 0x2a1   : > { %v1487_v42 = vld [vmem:[#allocation2 + $0x151] sm:$0xff]  ;;  %v6981_v32 = vpack.i.bf16 %v1454_v60, %v1453_v44  ;;  %v6705_v44 = vunpack.i.h.bf16 %v8757_v39  ;;  %v6704_v60 = vunpack.i.l.bf16 %v8757_v39 }
 0x2a2   : > { %v7001_v6 = vpack.i.bf16 %v1488_v48, %v1487_v42 }
 0x2a6   : > { %6962 = vrot.lane.b32.xlu2 %v6946_v38, %s7792_s29  ;;  %6947 = vrot.lane.b32.xlu0 %v6946_v38, %s7788_s27 }
 0x2a7   : > { %6972 = vrot.lane.b32.xlu1 %v6956_v35, %s7795_s19  ;;  %v8854_v34 = vpop.permute.xlu1 %6742  ;;  %v6714_v35 = vunpack.i.l.bf16 %v8787_v7 }
 0x2a8   : > { %v8844_v4 = vpop.permute.xlu2 %6802  ;;  %v8852_v18 = vpop.permute.xlu0 %6752  ;;  %v6745_v42 = vunpack.i.h.bf16 %v8854_v34 }
 0x2a9   : > { %v2529_v52 = vsel %vm2520_vm4, %v2496_v57, %v6714_v35 }
 0x2ad   : > { %6294 = vmatmul.msk.bf16.gmra.mxu2 %vm799_vm0, %v2677_v53  ;;  %v2563_v53 = vsel %vm2553_vm5, %v2530_v30, %v6720_v50  ;;  %v1521_v30 = vld [vmem:[#allocation2 + $0x16a] sm:$0xff]  ;;  %v1522_v50 = vld [vmem:[#allocation2 + $0x172] sm:$0xff] }
 0x2ae   : > { %6977 = vrot.lane.b32.xlu2 %v6946_v38, %s7791_s28  ;;  %6967 = vrot.lane.b32.xlu0 %v8799_v1, %s7794_s0  ;;  %v2562_v1 = vsel %vm2553_vm5, %v2529_v52, %v6719_v26  ;;  %v1490_v26 = vld [vmem:[#allocation2 + $0x171] sm:$0xff]  ;;  %v7006_v48 = vpack.i.bf16 %v1522_v50, %v1521_v30 }
 0x2af   : > { %6987 = vrot.lane.b32.xlu1 %v6986_v8, %s7791_s28  ;;  %v6763_v21 = vpop.permute.xlu1 %6762 }
 0x2b0   : > { %v8871_v7 = vpop.permute.xlu2 %6822  ;;  %v6758_v56 = vpop.permute.xlu0 %6757  ;;  %v6765_v38 = vunpack.i.h.bf16 %v6763_v21  ;;  %v6764_v33 = vunpack.i.l.bf16 %v6763_v21  ;;  %v6700_v21 = vunpack.i.h.bf16 %v8711_v11 }
 0x2b1   : > { %v6760_v51 = vunpack.i.h.bf16 %v6758_v56  ;;  %v6759_v61 = vunpack.i.l.bf16 %v6758_v56  ;;  %v1456_v56 = vld [vmem:[#allocation2 + $0x158] sm:$0xff] }
 0x2b2   : > { %v2434_v39 = vsel %vm799_vm0, %v8473_v17, %v6700_v21  ;;  %v6750_v17 = vunpack.i.h.bf16 %v8755_v27  ;;  %v1457_v21 = vld [vmem:[#allocation2 + $0x168] sm:$0xff] }
 0x2b3   : > { %v2595_v37 = vsel %vm2586_vm6, %v2562_v1, %v6759_v61  ;;  %v2596_v35 = vsel %vm2586_vm6, %v2563_v53, %v6760_v51  ;;  %v6699_v51 = vunpack.i.l.bf16 %v8711_v11  ;;  %v2679_v61 = vpack.c.bf16 %v1522_v50, %v1521_v30  ;;  %v1458_v50 = vld [vmem:[#allocation2 + $0x170] sm:$0xff] }
 0x2b4   : > { %v2628_v57 = vsel %vm2619_vm7, %v2595_v37, %v6764_v33  ;;  %v2629_v31 = vsel %vm2619_vm7, %v2596_v35, %v6765_v38  ;;  %v1489_v38 = vld [vmem:[#allocation2 + $0x169] sm:$0xff]  ;;  %v2466_v35 = vsel %vm868_vm1, %v2434_v39, %v6705_v44  ;;  %v6755_v44 = vunpack.i.h.bf16 %v8852_v18 }
 0x2b5   : > { %v2660_v8 = vpack.c.bf16 %v2629_v31, %v2628_v57  ;;  %v1455_v33 = vld [vmem:[#allocation2 + $0x150] sm:$0xff]  ;;  %v7016_v1 = vpack.i.bf16 %v1490_v26, %v1489_v38  ;;  %v2433_v11 = vsel %vm799_vm0, %v8475_v59, %v6699_v51  ;;  %v1460_v57 = vld [vmem:[#allocation2 + $0x188] sm:$0xff]  ;;  %v2499_v31 = vsel %vm2487_vm3, %v2466_v35, %v6745_v42 }
 0x2b6   : > { %6992 = vrot.lane.b32.xlu2 %v6991_v40, %s7794_s0  ;;  %6982 = vrot.lane.b32.xlu0 %v6981_v32, %s7795_s19  ;;  %v6996_v53 = vpack.i.bf16 %v1456_v56, %v1455_v33  ;;  %v6744_v40 = vunpack.i.l.bf16 %v8854_v34  ;;  %v2465_v37 = vsel %vm868_vm1, %v2433_v11, %v6704_v60  ;;  %v1459_v32 = vld [vmem:[#allocation2 + $0x180] sm:$0xff]  ;;  %v6749_v26 = vunpack.i.l.bf16 %v8755_v27  ;;  %v1429_v56 = vld [vmem:[#allocation2 + $0x18a] sm:$0xff]  ;;  %v1461_v27 = vld [vmem:[#allocation2 + $0x198] sm:$0xff] }
 0x2b7   : > { %7002 = vrot.lane.b32.xlu1 %v7001_v6, %s7791_s28  ;;  %2836 = vmatmul.bf16.gmra.mxu1 %v2660_v8  ;;  %v8888_v13 = vpop.permute.xlu1 %6767  ;;  %v1428_v59 = vld [vmem:[#allocation2 + $0x182] sm:$0xff]  ;;  %v7021_v51 = vpack.i.bf16 %v1460_v57, %v1459_v32  ;;  %v7011_v38 = vpack.i.bf16 %v1458_v50, %v1457_v21  ;;  %v6754_v60 = vunpack.i.l.bf16 %v8852_v18  ;;  %v6794_v11 = vunpack.i.l.bf16 %v8833_v24 }
 0x2b8   : > { %v8884_v52 = vpop.permute.xlu2 %6827  ;;  %v8886_v63 = vpop.permute.xlu0 %6782  ;;  %v2498_v8 = vsel %vm2487_vm3, %v2465_v37, %v6744_v40  ;;  %v6795_v40 = vunpack.i.h.bf16 %v8833_v24  ;;  %v1491_v32 = vld [vmem:[#allocation2 + $0x181] sm:$0xff] }
 0x2b9   : > { %v2531_v33 = vsel %vm2520_vm4, %v2498_v8, %v6749_v26  ;;  %v1492_v26 = vld [vmem:[#allocation2 + $0x189] sm:$0xff] }
 0x2ba   : > { %v7026_v24 = vpack.i.bf16 %v1492_v26, %v1491_v32  ;;  %v6784_v32 = vunpack.i.l.bf16 %v8886_v63 }
 0x2bd   : > { %6295 = vmatmul.msk.bf16.gmra.mxu2 %vm799_vm0, %v2679_v61  ;;  %v7031_v61 = vpack.i.bf16 %v1429_v56, %v1428_v59 }
 0x2be   : > { %7007 = vrot.lane.b32.xlu2 %v7006_v48, %s7794_s0  ;;  %6997 = vrot.lane.b32.xlu0 %v6996_v53, %s7795_s19  ;;  %v2532_v48 = vsel %vm2520_vm4, %v2499_v31, %v6750_v17  ;;  %v2564_v53 = vsel %vm2553_vm5, %v2531_v33, %v6754_v60  ;;  %v2681_v17 = vpack.c.bf16 %v1429_v56, %v1428_v59  ;;  %v1494_v33 = vld [vmem:[#allocation2 + $0x1a1] sm:$0xff]  ;;  %v6735_v56 = vunpack.i.h.bf16 %v8835_v47 }
 0x2bf   : > { %7017 = vrot.lane.b32.xlu1 %v7016_v1, %s7791_s28  ;;  %v8908_v34 = vpop.permute.xlu1 %6817  ;;  %v1462_v1 = vld [vmem:[#allocation2 + $0x1a0] sm:$0xff]  ;;  %v2565_v42 = vsel %vm2553_vm5, %v2532_v48, %v6755_v44  ;;  %v2597_v31 = vsel %vm2586_vm6, %v2564_v53, %v6794_v11  ;;  %v6734_v60 = vunpack.i.l.bf16 %v8835_v47  ;;  %v6739_v53 = vunpack.i.l.bf16 %v8837_v22 }
 0x2c0   : > { %v8906_v6 = vpop.permute.xlu0 %6787  ;;  %v8912_v30 = vpop.permute.xlu2 %6852  ;;  %v7036_v57 = vpack.i.bf16 %v1462_v1, %v1461_v27  ;;  %v2598_v8 = vsel %vm2586_vm6, %v2565_v42, %v6795_v40  ;;  %v6740_v1 = vunpack.i.h.bf16 %v8837_v22  ;;  %v2436_v42 = vsel %vm799_vm0, %v8525_v62, %v6735_v56 }
 0x2c1   : > { %v2435_v40 = vsel %vm799_vm0, %v8527_v5, %v6734_v60  ;;  %v6780_v22 = vunpack.i.h.bf16 %v8810_v45  ;;  %v6790_v62 = vunpack.i.h.bf16 %v8906_v6 }
 0x2c2   : > { %v2467_v47 = vsel %vm868_vm1, %v2435_v40, %v6739_v53 }
 0x2c6   : > { %7022 = vrot.lane.b32.xlu2 %v7021_v51, %s7795_s19  ;;  %7012 = vrot.lane.b32.xlu0 %v7011_v38, %s7795_s19  ;;  %v1493_v38 = vld [vmem:[#allocation2 + $0x199] sm:$0xff] }
 0x2c7   : > { %7032 = vrot.lane.b32.xlu1 %v7031_v61, %s7794_s0  ;;  %v8927_v37 = vpop.permute.xlu1 %6842  ;;  %v7041_v59 = vpack.i.bf16 %v1494_v33, %v1493_v38  ;;  %v6770_v38 = vunpack.i.h.bf16 %v8888_v13  ;;  %v6769_v33 = vunpack.i.l.bf16 %v8888_v13  ;;  %v6775_v13 = vunpack.i.h.bf16 %v8781_v36 }
 0x2c8   : > { %v6798_v39 = vpop.permute.xlu0 %6797  ;;  %v8931_v50 = vpop.permute.xlu2 %6857 }
 0x2c9   : > { %v6800_v18 = vunpack.i.h.bf16 %v6798_v39  ;;  %v6799_v35 = vunpack.i.l.bf16 %v6798_v39 }
 0x2cb   : > { %v2630_v21 = vsel %vm2619_vm7, %v2597_v31, %v6799_v35  ;;  %v2631_v51 = vsel %vm2619_vm7, %v2598_v8, %v6800_v18  ;;  %v2468_v18 = vsel %vm868_vm1, %v2436_v42, %v6740_v1  ;;  %v6785_v35 = vunpack.i.h.bf16 %v8886_v63 }
 0x2cc   : > { %v2662_v61 = vpack.c.bf16 %v2631_v51, %v2630_v21  ;;  %v6789_v31 = vunpack.i.l.bf16 %v8906_v6  ;;  %v2501_v8 = vsel %vm2487_vm3, %v2468_v18, %v6780_v22  ;;  %v2437_v18 = vsel %vm799_vm0, %v8548_v0, %v6769_v33 }
 0x2cd   : > { %6296 = vmatmul.msk.bf16.gmra.mxu2 %vm799_vm0, %v2681_v17  ;;  %v2534_v26 = vsel %vm2520_vm4, %v2501_v8, %v6785_v35  ;;  %v6820_v0 = vunpack.i.h.bf16 %v8908_v34 }
 0x2ce   : > { %7037 = vrot.lane.b32.xlu2 %v7036_v57, %s7795_s19  ;;  %7027 = vrot.lane.b32.xlu0 %v7026_v24, %s7791_s28  ;;  %v6779_v57 = vunpack.i.l.bf16 %v8810_v45  ;;  %v2567_v51 = vsel %vm2553_vm5, %v2534_v26, %v6790_v62  ;;  %v6830_v45 = vunpack.i.h.bf16 %v8884_v52  ;;  %v6829_v24 = vunpack.i.l.bf16 %v8884_v52  ;;  %s7798_s19 = smov 40  }
 0x2cf   : > { %2841 = vmatmul.bf16.gmra.mxu1 %v2662_v61  ;;  %v8940_v44 = vpop.permute.xlu1 %6847  ;;  %v2438_v52 = vsel %vm799_vm0, %v8550_v19, %v6770_v38  ;;  %v6804_v26 = vunpack.i.l.bf16 %v8844_v4 }
 0x2d0   : > { %v8938_v48 = vpop.permute.xlu0 %6807  ;;  %v8944_v27 = vpop.permute.xlu2 %6862  ;;  %v2500_v5 = vsel %vm2487_vm3, %v2467_v47, %v6779_v57  ;;  %v2600_v1 = vsel %vm2586_vm6, %v2567_v51, %v6830_v45  ;;  %v2470_v57 = vsel %vm868_vm1, %v2438_v52, %v6775_v13  ;;  %v6824_v51 = vunpack.i.l.bf16 %v8871_v7 }
 0x2d1   : > { %v2533_v17 = vsel %vm2520_vm4, %v2500_v5, %v6784_v32  ;;  %v6774_v32 = vunpack.i.l.bf16 %v8781_v36  ;;  %v6805_v45 = vunpack.i.h.bf16 %v8844_v4  ;;  %v6810_v38 = vunpack.i.h.bf16 %v8938_v48 }
 0x2d2   : > { %v2566_v63 = vsel %vm2553_vm5, %v2533_v17, %v6789_v31  ;;  %v6865_v33 = vunpack.i.h.bf16 %v8944_v27 }
 0x2d3   : > { %v2599_v60 = vsel %vm2586_vm6, %v2566_v63, %v6829_v24  ;;  %v2469_v22 = vsel %vm868_vm1, %v2437_v18, %v6774_v32  ;;  %v6825_v63 = vunpack.i.h.bf16 %v8871_v7  ;;  %v6809_v24 = vunpack.i.l.bf16 %v8938_v48  ;;  %v9023_v32 = vpop.f32.mrf.mxu1 }
 0x2d4   : > { %v2439_v7 = vsel %vm799_vm0, %v8633_v25, %v6804_v26 }
 0x2d5   : > { %v2471_v52 = vsel %vm868_vm1, %v2439_v7, %v6809_v24  ;;  %v6844_v7 = vunpack.i.l.bf16 %v8927_v37 }
 0x2d6   : > { %7042 = vrot.lane.b32.xlu0 %v7041_v59, %s7791_s28  ;;  %s7797_s28 = smov 24  }
 0x2d7   : > { %v8953_v39 = vpop.permute.xlu1 %6877 }
 0x2d8   : > { %v6813_v11 = vpop.permute.xlu0 %6812  ;;  %v8967_v21 = vpop.permute.xlu2 %6882 }
 0x2d9   : > { %v6815_v47 = vunpack.i.h.bf16 %v6813_v11  ;;  %v6814_v35 = vunpack.i.l.bf16 %v6813_v11  ;;  %v6819_v11 = vunpack.i.l.bf16 %v8908_v34 }
 0x2db   : > { %v2502_v5 = vsel %vm2487_vm3, %v2469_v22, %v6814_v35  ;;  %v2503_v19 = vsel %vm2487_vm3, %v2470_v57, %v6815_v47  ;;  %v6854_v22 = vunpack.i.l.bf16 %v8912_v30 }
 0x2dc   : > { %v2535_v36 = vsel %vm2520_vm4, %v2502_v5, %v6819_v11  ;;  %v2536_v17 = vsel %vm2520_vm4, %v2503_v19, %v6820_v0  ;;  %v6855_v5 = vunpack.i.h.bf16 %v8912_v30  ;;  %v6859_v11 = vunpack.i.l.bf16 %v8931_v50 }
 0x2dd   : > { %v2569_v34 = vsel %vm2553_vm5, %v2536_v17, %v6825_v63  ;;  %v6860_v63 = vunpack.i.h.bf16 %v8931_v50 }
 0x2de   : > { %v2602_v48 = vsel %vm2586_vm6, %v2569_v34, %v6865_v33 }
 0x2df   : > { %v8973_v6 = vpop.permute.xlu1 %6897 }
 0x2e0   : > { %v6833_v61 = vpop.permute.xlu0 %6832  ;;  %v8995_v8 = vpop.permute.xlu2 %6887 }
 0x2e1   : > { %v6835_v59 = vunpack.i.h.bf16 %v6833_v61  ;;  %v6834_v56 = vunpack.i.l.bf16 %v6833_v61  ;;  %v2568_v61 = vsel %vm2553_vm5, %v2535_v36, %v6824_v51 }
 0x2e3   : > { %v2632_v53 = vsel %vm2619_vm7, %v2599_v60, %v6834_v56  ;;  %v2633_v42 = vsel %vm2619_vm7, %v2600_v1, %v6835_v59  ;;  %v6864_v59 = vunpack.i.l.bf16 %v8944_v27  ;;  %v6850_v27 = vunpack.i.h.bf16 %v8940_v44 }
 0x2e4   : > { %v2664_v40 = vpack.c.bf16 %v2633_v42, %v2632_v53  ;;  %v2440_v53 = vsel %vm799_vm0, %v8628_v55, %v6805_v45  ;;  %v6849_v42 = vunpack.i.l.bf16 %v8940_v44 }
 0x2e5   : > { %v2472_v25 = vsel %vm868_vm1, %v2440_v53, %v6810_v38 }
 0x2e6   : > { %2846 = vmatmul.bf16.gmra.mxu1 %v2664_v40  ;;  %v2601_v40 = vsel %vm2586_vm6, %v2568_v61, %v6864_v59  ;;  %v2504_v55 = vsel %vm2487_vm3, %v2471_v52, %v6849_v42  ;;  %v2505_v57 = vsel %vm2487_vm3, %v2472_v25, %v6850_v27  ;;  %v6845_v42 = vunpack.i.h.bf16 %v8927_v37 }
 0x2e7   : > { %v6903_v31 = vpop.permute.xlu1 %6902  ;;  %v2537_v0 = vsel %vm2520_vm4, %v2504_v55, %v6854_v22  ;;  %v2538_v36 = vsel %vm2520_vm4, %v2505_v57, %v6855_v5  ;;  %v6900_v57 = vunpack.i.h.bf16 %v8973_v6  ;;  %v6899_v5 = vunpack.i.l.bf16 %v8973_v6 }
 0x2e8   : > { %v8989_v62 = vpop.permute.xlu0 %6837  ;;  %v6908_v35 = vpop.permute.xlu2 %6907  ;;  %v6905_v17 = vunpack.i.h.bf16 %v6903_v31  ;;  %v6904_v26 = vunpack.i.l.bf16 %v6903_v31  ;;  %v2570_v45 = vsel %vm2553_vm5, %v2537_v0, %v6859_v11  ;;  %v2571_v34 = vsel %vm2553_vm5, %v2538_v36, %v6860_v63 }
 0x2e9   : > { %v6839_v51 = vunpack.i.l.bf16 %v8989_v62  ;;  %v6840_v30 = vunpack.i.h.bf16 %v8989_v62  ;;  %v6910_v24 = vunpack.i.h.bf16 %v6908_v35  ;;  %v6909_v61 = vunpack.i.l.bf16 %v6908_v35 }
 0x2ea   : > { %v2603_v33 = vsel %vm2586_vm6, %v2570_v45, %v6904_v26  ;;  %v2604_v59 = vsel %vm2586_vm6, %v2571_v34, %v6905_v17  ;;  %v6879_v45 = vunpack.i.l.bf16 %v8953_v39 }
 0x2eb   : > { %v2441_v50 = vsel %vm799_vm0, %v8635_v46, %v6839_v51  ;;  %v2442_v62 = vsel %vm799_vm0, %v8630_v10, %v6840_v30  ;;  %v2637_v53 = vsel %vm2619_vm7, %v2604_v59, %v6910_v24  ;;  %v6880_v51 = vunpack.i.h.bf16 %v8953_v39 }
 0x2ec   : > { %v2443_v39 = vsel %vm799_vm0, %v8704_v41, %v6879_v45 }
 0x2f0   : > { %v6868_v56 = vpop.permute.xlu0 %6867  ;;  %v9041_v38 = vpop.permute.xlu2 %6912 }
 0x2f1   : > { %v9009_v60 = vpop.permute.xlu1 %6927  ;;  %v6870_v1 = vunpack.i.h.bf16 %v6868_v56  ;;  %v6869_v4 = vunpack.i.l.bf16 %v6868_v56  ;;  %v9045_v56 = vpop.f32.mrf.mxu1  ;;  %v6914_v45 = vunpack.i.l.bf16 %v9041_v38 }
 0x2f3   : > { %v2634_v18 = vsel %vm2619_vm7, %v2601_v40, %v6869_v4  ;;  %v2635_v47 = vsel %vm2619_vm7, %v2602_v48, %v6870_v1  ;;  %v2636_v4 = vsel %vm2619_vm7, %v2603_v33, %v6909_v61  ;;  %v2473_v40 = vsel %vm868_vm1, %v2441_v50, %v6844_v7 }
 0x2f4   : > { %v2666_v13 = vpack.c.bf16 %v2635_v47, %v2634_v18  ;;  %v2474_v48 = vsel %vm868_vm1, %v2442_v62, %v6845_v42  ;;  %v2668_v46 = vpack.c.bf16 %v2637_v53, %v2636_v4  ;;  %v6890_v18 = vunpack.i.h.bf16 %v8995_v8 }
 0x2f5   : > { %v6889_v47 = vunpack.i.l.bf16 %v8995_v8  ;;  %v6885_v50 = vunpack.i.h.bf16 %v8967_v21  ;;  %v2444_v62 = vsel %vm799_vm0, %v8701_v28, %v6880_v51 }
 0x2f6   : > { %2851 = vmatmul.bf16.gmra.mxu1 %v2666_v13  ;;  %v2507_v35 = vsel %vm2487_vm3, %v2474_v48, %v6890_v18 }
 0x2f7   : > { %v2506_v25 = vsel %vm2487_vm3, %v2473_v40, %v6889_v47  ;;  %v2476_v40 = vsel %vm868_vm1, %v2444_v62, %v6885_v50 }
 0x2f8   : > { %v9029_v44 = vpop.permute.xlu0 %6872  ;;  %v6943_v13 = vpop.permute.xlu2 %6942 }
 0x2f9   : > { %v9031_v19 = vpop.permute.xlu1 %6932  ;;  %v9059_v10 = vpop.f32.mrf.mxu1  ;;  %v6945_v30 = vunpack.i.h.bf16 %v6943_v13  ;;  %v6944_v24 = vunpack.i.l.bf16 %v6943_v13 }
 0x2fa   : > { %v6935_v13 = vunpack.i.h.bf16 %v9031_v19 }
 0x300   : > { %v6893_v31 = vpop.permute.xlu0 %6892  ;;  %v6963_v7 = vpop.permute.xlu2 %6962 }
 0x301   : > { %v6938_v1 = vpop.permute.xlu1 %6937  ;;  %v6895_v52 = vunpack.i.h.bf16 %v6893_v31  ;;  %v6894_v27 = vunpack.i.l.bf16 %v6893_v31  ;;  %v9077_v6 = vpop.f32.mrf.mxu1  ;;  %v6884_v31 = vunpack.i.l.bf16 %v8967_v21  ;;  %v6930_v21 = vunpack.i.h.bf16 %v9009_v60 }
 0x302   : > { %v6940_v36 = vunpack.i.h.bf16 %v6938_v1  ;;  %v6939_v17 = vunpack.i.l.bf16 %v6938_v1 }
 0x303   : > { %v2539_v37 = vsel %vm2520_vm4, %v2506_v25, %v6894_v27  ;;  %v2540_v55 = vsel %vm2520_vm4, %v2507_v35, %v6895_v52  ;;  %v2475_v42 = vsel %vm868_vm1, %v2443_v39, %v6884_v31  ;;  %v6929_v27 = vunpack.i.l.bf16 %v9009_v60 }
 0x304   : > { %v2572_v8 = vsel %vm2553_vm5, %v2539_v37, %v6899_v5  ;;  %v2573_v11 = vsel %vm2553_vm5, %v2540_v55, %v6900_v57  ;;  %v6934_v37 = vunpack.i.l.bf16 %v9031_v19  ;;  %v6915_v19 = vunpack.i.h.bf16 %v9041_v38 }
 0x305   : > { %v2605_v26 = vsel %vm2586_vm6, %v2572_v8, %v6939_v17  ;;  %v2606_v63 = vsel %vm2586_vm6, %v2573_v11, %v6940_v36  ;;  %v9103_v11 = vpop.f32.mrf.mxu2  ;;  %v2445_v31 = vsel %vm799_vm0, %v8766_v15, %v6914_v45 }
 0x306   : > { %2856 = vmatmul.bf16.gmra.mxu1 %v2668_v46  ;;  %v2638_v33 = vsel %vm2619_vm7, %v2605_v26, %v6944_v24  ;;  %v2639_v59 = vsel %vm2619_vm7, %v2606_v63, %v6945_v30  ;;  %v2446_v62 = vsel %vm799_vm0, %v8760_v29, %v6915_v19  ;;  %v6524_v19 = vunpack.i.l.bf16 %v8452_v3 }
 0x307   : > { %v2670_v53 = vpack.c.bf16 %v2639_v59, %v2638_v33 }
 0x308   : > { %v9065_v22 = vpop.permute.xlu0 %6917  ;;  %v6978_v55 = vpop.permute.xlu2 %6977 }
 0x309   : > { %v9069_v0 = vpop.permute.xlu1 %6952  ;;  %v6980_v36 = vunpack.i.h.bf16 %v6978_v55  ;;  %v6979_v17 = vunpack.i.l.bf16 %v6978_v55  ;;  %v6920_v24 = vunpack.i.h.bf16 %v9065_v22 }
 0x30a   : > { %v9093_v46 = vpop.f32.mrf.mxu1 }
 0x30b   : > { %v2478_v38 = vsel %vm868_vm1, %v2446_v62, %v6920_v24 }
 0x310   : > { %v6923_v61 = vpop.permute.xlu0 %6922 }
 0x311   : > { %v6958_v34 = vpop.permute.xlu1 %6957  ;;  %v6925_v1 = vunpack.i.h.bf16 %v6923_v61  ;;  %v6924_v4 = vunpack.i.l.bf16 %v6923_v61  ;;  %v6919_v61 = vunpack.i.l.bf16 %v9065_v22 }
 0x312   : > { %v9109_v30 = vpop.f32.mrf.mxu1  ;;  %v6960_v59 = vunpack.i.h.bf16 %v6958_v34  ;;  %v6959_v50 = vunpack.i.l.bf16 %v6958_v34 }
 0x313   : > { %v2508_v48 = vsel %vm2487_vm3, %v2475_v42, %v6924_v4  ;;  %v2509_v52 = vsel %vm2487_vm3, %v2476_v40, %v6925_v1  ;;  %v2477_v39 = vsel %vm868_vm1, %v2445_v31, %v6919_v61  ;;  %v9119_v4 = vpop.f32.mrf.mxu2  ;;  %v6965_v40 = vunpack.i.h.bf16 %v6963_v7 }
 0x314   : > { %v2541_v18 = vsel %vm2520_vm4, %v2508_v48, %v6929_v27  ;;  %v2542_v47 = vsel %vm2520_vm4, %v2509_v52, %v6930_v21  ;;  %v2510_v22 = vsel %vm2487_vm3, %v2477_v39, %v6959_v50  ;;  %v6964_v48 = vunpack.i.l.bf16 %v6963_v7 }
 0x315   : > { %v2574_v57 = vsel %vm2553_vm5, %v2541_v18, %v6934_v37  ;;  %v2575_v5 = vsel %vm2553_vm5, %v2542_v47, %v6935_v13  ;;  %v6874_v39 = vunpack.i.l.bf16 %v9029_v44 }
 0x316   : > { %2861 = vmatmul.bf16.gmra.mxu1 %v2670_v53  ;;  %v2511_v53 = vsel %vm2487_vm3, %v2478_v38, %v6960_v59  ;;  %v2543_v21 = vsel %vm2520_vm4, %v2510_v22, %v6964_v48 }
 0x317   : > { %v2544_v29 = vsel %vm2520_vm4, %v2511_v53, %v6965_v40 }
 0x318   : > { %v6948_v28 = vpop.permute.xlu0 %6947 }
 0x319   : > { %v6973_v41 = vpop.permute.xlu1 %6972  ;;  %v6949_v18 = vunpack.i.l.bf16 %v6948_v28 }
 0x31a   : > { %v6975_v25 = vunpack.i.h.bf16 %v6973_v41  ;;  %v6974_v35 = vunpack.i.l.bf16 %v6973_v41  ;;  %v6950_v41 = vunpack.i.h.bf16 %v6948_v28 }
 0x31c   : > { %v2607_v60 = vsel %vm2586_vm6, %v2574_v57, %v6974_v35  ;;  %v2608_v8 = vsel %vm2586_vm6, %v2575_v5, %v6975_v25  ;;  %v9125_v47 = vpop.f32.mrf.mxu1  ;;  %v2448_v57 = vsel %vm799_vm0, %v8814_v16, %v6950_v41  ;;  %v2447_v5 = vsel %vm799_vm0, %v8820_v20, %v6949_v18  ;;  %v7775_v18 = vld [vmem:[#allocation2 + $0x138] sm:$0xff] }
 0x31d   : > { %v2640_v63 = vsel %vm2619_vm7, %v2607_v60, %v6979_v17  ;;  %v2641_v51 = vsel %vm2619_vm7, %v2608_v8, %v6980_v36  ;;  %v6955_v8 = vunpack.i.h.bf16 %v9069_v0  ;;  %v6954_v36 = vunpack.i.l.bf16 %v9069_v0  ;;  %v9139_v17 = vpop.f32.mrf.mxu2 }
 0x31e   : > { %v2672_v33 = vpack.c.bf16 %v2641_v51, %v2640_v63  ;;  %v6525_v16 = vunpack.i.h.bf16 %v8452_v3  ;;  %v6535_v0 = vunpack.i.h.bf16 %v8467_v12  ;;  %v6875_v3 = vunpack.i.h.bf16 %v9029_v44 }
 0x31f   : > { %v2480_v63 = vsel %vm868_vm1, %v2448_v57, %v6955_v8 }
 0x320   : > { %v6968_v26 = vpop.permute.xlu0 %6967  ;;  %v2513_v45 = vsel %vm2487_vm3, %v2480_v63, %v6525_v16  ;;  %v6580_v63 = vunpack.i.h.bf16 %v8546_v58 }
 0x321   : > { %v6970_v42 = vunpack.i.h.bf16 %v6968_v26  ;;  %v6969_v34 = vunpack.i.l.bf16 %v6968_v26  ;;  %v6988_v27 = vpop.permute.xlu1 %6987  ;;  %v2479_v26 = vsel %vm868_vm1, %v2447_v5, %v6954_v36  ;;  %v2546_v62 = vsel %vm2520_vm4, %v2513_v45, %v6535_v0 }
 0x322   : > { %v6990_v7 = vunpack.i.h.bf16 %v6988_v27  ;;  %v6989_v55 = vunpack.i.l.bf16 %v6988_v27  ;;  %v2512_v20 = vsel %vm2487_vm3, %v2479_v26, %v6524_v19  ;;  %v2579_v22 = vsel %vm2553_vm5, %v2546_v62, %v6875_v3  ;;  %v7774_v27 = vld [vmem:[#allocation2 + $0x140] sm:$0xff] }
 0x323   : > { %v2576_v25 = vsel %vm2553_vm5, %v2543_v21, %v6969_v34  ;;  %v2577_v35 = vsel %vm2553_vm5, %v2544_v29, %v6970_v42  ;;  %v1525_v3 = vld [vmem:[#allocation2 + $0x19a] sm:$0xff] }
 0x324   : > { %v9147_v24 = vpop.f32.mrf.mxu1 }
 0x326   : > { %2866 = vmatmul.bf16.gmra.mxu1 %v2672_v33  ;;  %v6534_v33 = vunpack.i.l.bf16 %v8467_v12 }
 0x328   : > { %v6983_v1 = vpop.permute.xlu0 %6982  ;;  %v2545_v31 = vsel %vm2520_vm4, %v2512_v20, %v6534_v33 }
 0x329   : > { %v6985_v52 = vunpack.i.h.bf16 %v6983_v1  ;;  %v6984_v15 = vunpack.i.l.bf16 %v6983_v1  ;;  %v7003_v38 = vpop.permute.xlu1 %7002  ;;  %v9155_v1 = vpop.f32.mrf.mxu2  ;;  %v2578_v53 = vsel %vm2553_vm5, %v2545_v31, %v6874_v39 }
 0x32a   : > { %v7005_v34 = vunpack.i.h.bf16 %v7003_v38  ;;  %v7004_v40 = vunpack.i.l.bf16 %v7003_v38 }
 0x32b   : > { %v2609_v13 = vsel %vm2586_vm6, %v2576_v25, %v6984_v15  ;;  %v2610_v37 = vsel %vm2586_vm6, %v2577_v35, %v6985_v52  ;;  %v6505_v52 = vunpack.i.h.bf16 %v8471_v14  ;;  %v6504_v15 = vunpack.i.l.bf16 %v8471_v14 }
 0x32c   : > { %v2642_v28 = vsel %vm2619_vm7, %v2609_v13, %v6989_v55  ;;  %v2643_v60 = vsel %vm2619_vm7, %v2610_v37, %v6990_v7  ;;  %v6570_v35 = vunpack.i.h.bf16 %v8574_v9  ;;  %v6569_v13 = vunpack.i.l.bf16 %v8574_v9  ;;  %v6993_v37 = vpop.permute.xlu2 %6992 }
 0x32d   : > { %v2674_v51 = vpack.c.bf16 %v2643_v60, %v2642_v28  ;;  %v2450_v41 = vsel %vm799_vm0, %v7774_v27, %v6505_v52  ;;  %v2449_v25 = vsel %vm799_vm0, %v7775_v18, %v6504_v15  ;;  %v6515_v7 = vunpack.i.h.bf16 %v8420_v43 }
 0x32e   : > { %v6514_v14 = vunpack.i.l.bf16 %v8420_v43  ;;  %v6995_v36 = vunpack.i.h.bf16 %v6993_v37  ;;  %v6994_v26 = vunpack.i.l.bf16 %v6993_v37  ;;  %v6579_v43 = vunpack.i.l.bf16 %v8546_v58  ;;  %v1526_v58 = vld [vmem:[#allocation2 + $0x1a2] sm:$0xff] }
 0x32f   : > { %v2482_v28 = vsel %vm868_vm1, %v2450_v41, %v6515_v7  ;;  %v6560_v52 = vunpack.i.h.bf16 %v8521_v54  ;;  %v6559_v15 = vunpack.i.l.bf16 %v8521_v54  ;;  %v7777_v41 = vld [vmem:[#allocation2 + $0x158] sm:$0xff] }
 0x330   : > { %v6998_v61 = vpop.permute.xlu0 %6997  ;;  %v2481_v5 = vsel %vm868_vm1, %v2449_v25, %v6514_v14  ;;  %v2515_v8 = vsel %vm2487_vm3, %v2482_v28, %v6570_v35  ;;  %v6634_v28 = vunpack.i.l.bf16 %v8594_v2 }
 0x331   : > { %v7000_v59 = vunpack.i.h.bf16 %v6998_v61  ;;  %v6999_v50 = vunpack.i.l.bf16 %v6998_v61  ;;  %v9173_v55 = vpop.f32.mrf.mxu2  ;;  %v2514_v60 = vsel %vm2487_vm3, %v2481_v5, %v6569_v13  ;;  %v2548_v20 = vsel %vm2520_vm4, %v2515_v8, %v6580_v63  ;;  %v7018_v45 = vpop.permute.xlu1 %7017 }
 0x332   : > { %v2547_v19 = vsel %vm2520_vm4, %v2514_v60, %v6579_v43  ;;  %v2581_v0 = vsel %vm2553_vm5, %v2548_v20, %v6995_v36  ;;  %v7020_v31 = vunpack.i.h.bf16 %v7018_v45  ;;  %v7019_v62 = vunpack.i.l.bf16 %v7018_v45  ;;  %v10948_v45 = vld [vmem:[#allocation5_spill] sm:$0xff] }
 0x333   : > { %v2611_v42 = vsel %vm2586_vm6, %v2578_v53, %v6999_v50  ;;  %v2612_v12 = vsel %vm2586_vm6, %v2579_v22, %v7000_v59  ;;  %v2580_v61 = vsel %vm2553_vm5, %v2547_v19, %v6994_v26  ;;  %v6635_v5 = vunpack.i.h.bf16 %v8594_v2 }
 0x334   : > { %v9161_v48 = vpop.f32.mrf.mxu1  ;;  %v2644_v44 = vsel %vm2619_vm7, %v2611_v42, %v7004_v40  ;;  %v2645_v21 = vsel %vm2619_vm7, %v2612_v12, %v7005_v34  ;;  %v7008_v50 = vpop.permute.xlu2 %7007  ;;  %v2683_v42 = vpack.c.bf16 %v1526_v58, %v1525_v3  ;;  %v6550_v34 = vunpack.i.h.bf16 %v8488_v23  ;;  %v7779_v3 = vld [vmem:[#allocation2 + $0x168] sm:$0xff] }
 0x335   : > { %v2676_v29 = vpack.c.bf16 %v2645_v21, %v2644_v44  ;;  %v6549_v40 = vunpack.i.l.bf16 %v8488_v23  ;;  %v6625_v44 = vunpack.i.h.bf16 %v8657_v49  ;;  %v6624_v21 = vunpack.i.l.bf16 %v8657_v49 }
 0x336   : > { %2871 = vmatmul.bf16.gmra.mxu1 %v2674_v51  ;;  %6297 = vmatmul.msk.bf16.gmra.mxu2 %vm799_vm0, %v2683_v42  ;;  %v2452_v18 = vsel %vm799_vm0, %v7777_v41, %v6550_v34  ;;  %v7010_v14 = vunpack.i.h.bf16 %v7008_v50  ;;  %v7009_v49 = vunpack.i.l.bf16 %v7008_v50  ;;  %v6604_v2 = vunpack.i.l.bf16 %v10948_v45  ;;  %v10950_v34 = vld [vmem:[#allocation4_spill] sm:$0xff] }
 0x337   : > { %v2484_v23 = vsel %vm868_vm1, %v2452_v18, %v6560_v52  ;;  %v6614_v52 = vunpack.i.l.bf16 %v10950_v34 }
 0x338   : > { %v7013_v57 = vpop.permute.xlu0 %7012  ;;  %v2517_v37 = vsel %vm2487_vm3, %v2484_v23, %v6625_v44  ;;  %v2453_v58 = vsel %vm799_vm0, %v7779_v3, %v6604_v2  ;;  %v10951_v44 = vld [vmem:[#allocation7_spill] sm:$0xff] }
 0x339   : > { %v7015_v51 = vunpack.i.h.bf16 %v7013_v57  ;;  %v7014_v16 = vunpack.i.l.bf16 %v7013_v57  ;;  %v9189_v39 = vpop.f32.mrf.mxu2  ;;  %v2550_v43 = vsel %vm2520_vm4, %v2517_v37, %v6635_v5 }
 0x33b   : > { %v2613_v33 = vsel %vm2586_vm6, %v2580_v61, %v7014_v16  ;;  %v2614_v59 = vsel %vm2586_vm6, %v2581_v0, %v7015_v51  ;;  %v2583_v16 = vsel %vm2553_vm5, %v2550_v43, %v7010_v14  ;;  %v6605_v61 = vunpack.i.h.bf16 %v10948_v45 }
 0x33c   : > { %v9179_v9 = vpop.f32.mrf.mxu1  ;;  %v2646_v53 = vsel %vm2619_vm7, %v2613_v33, %v7019_v62  ;;  %v2647_v22 = vsel %vm2619_vm7, %v2614_v59, %v7020_v31  ;;  %v7023_v25 = vpop.permute.xlu2 %7022  ;;  %v7778_v31 = vld [vmem:[#allocation2 + $0x170] sm:$0xff] }
 0x33d   : > { %v2678_v12 = vpack.c.bf16 %v2647_v22, %v2646_v53  ;;  %v7025_v60 = vunpack.i.h.bf16 %v7023_v25  ;;  %v7024_v8 = vunpack.i.l.bf16 %v7023_v25  ;;  %v2454_v62 = vsel %vm799_vm0, %v7778_v31, %v6605_v61  ;;  %v10949_v53 = vld [vmem:[#allocation6_spill] sm:$0xff] }
 0x33e   : > { %v6670_v22 = vunpack.i.h.bf16 %v10949_v53  ;;  %v6669_v42 = vunpack.i.l.bf16 %v10949_v53 }
 0x33f   : > { %v2616_v20 = vsel %vm2586_vm6, %v2583_v16, %v7025_v60 }
 0x340   : > { %v7028_v13 = vpop.permute.xlu0 %7027 }
 0x341   : > { %v9208_v7 = vpop.f32.mrf.mxu2  ;;  %v7030_v36 = vunpack.i.h.bf16 %v7028_v13  ;;  %v7029_v26 = vunpack.i.l.bf16 %v7028_v13 }
 0x343   : > { %v2649_v33 = vsel %vm2619_vm7, %v2616_v20, %v7030_v36 }
 0x344   : > { %v7038_v13 = vpop.permute.xlu2 %7037 }
 0x345   : > { %v7040_v5 = vunpack.i.h.bf16 %v7038_v13 }
 0x346   : > { %2876 = vmatmul.bf16.gmra.mxu1 %v2676_v29  ;;  %v7776_v29 = vld [vmem:[#allocation2 + $0x150] sm:$0xff] }
 0x347   : > { %v2451_v27 = vsel %vm799_vm0, %v7776_v29, %v6549_v40  ;;  %v6615_v40 = vunpack.i.h.bf16 %v10950_v34  ;;  %v6679_v29 = vunpack.i.l.bf16 %v10951_v44  ;;  %v9270_v34 = vld [vmem:[%s10924_s5] ss:$0 sm:$0xff] }
 0x348   : > { %v2483_v35 = vsel %vm868_vm1, %v2451_v27, %v6559_v15  ;;  %v7033_v15 = vpop.permute.xlu1 %7032  ;;  %v2485_v27 = vsel %vm868_vm1, %v2453_v58, %v6614_v52  ;;  %v7043_v37 = vpop.permute.xlu0 %7042 }
 0x349   : > { %v2516_v54 = vsel %vm2487_vm3, %v2483_v35, %v6624_v21  ;;  %v6680_v21 = vunpack.i.h.bf16 %v10951_v44  ;;  %v2486_v41 = vsel %vm868_vm1, %v2454_v62, %v6615_v40  ;;  %v2518_v18 = vsel %vm2487_vm3, %v2485_v27, %v6669_v42  ;;  %v1498_v42 = vld [vmem:[#allocation2 + $0x52] sm:$0xff]  ;;  %v1499_v27 = vld [vmem:[#allocation2 + $0x62] sm:$0xff] }
 0x34a   : > { %v2549_v63 = vsel %vm2520_vm4, %v2516_v54, %v6634_v28  ;;  %v2519_v25 = vsel %vm2487_vm3, %v2486_v41, %v6670_v22  ;;  %v7035_v35 = vunpack.i.h.bf16 %v7033_v15  ;;  %v7034_v23 = vunpack.i.l.bf16 %v7033_v15  ;;  %v1497_v22 = vld [vmem:[#allocation2 + $0x4a] sm:$0xff] }
 0x34b   : > { %v2582_v51 = vsel %vm2553_vm5, %v2549_v63, %v7009_v49  ;;  %v2551_v14 = vsel %vm2520_vm4, %v2518_v18, %v6679_v29  ;;  %v2552_v49 = vsel %vm2520_vm4, %v2519_v25, %v6680_v21  ;;  %v7039_v28 = vunpack.i.l.bf16 %v7038_v13  ;;  %v1500_v18 = vld [vmem:[#allocation2 + $0x6a] sm:$0xff] }
 0x34c   : > { %v9191_v38 = vpop.f32.mrf.mxu1  ;;  %v2615_v19 = vsel %vm2586_vm6, %v2582_v51, %v7024_v8  ;;  %v2584_v8 = vsel %vm2553_vm5, %v2551_v14, %v7034_v23  ;;  %v2585_v36 = vsel %vm2553_vm5, %v2552_v49, %v7035_v35  ;;  %v7044_v63 = vunpack.i.l.bf16 %v7043_v37 }
 0x34d   : > { %v2648_v0 = vsel %vm2619_vm7, %v2615_v19, %v7029_v26  ;;  %v7045_v26 = vunpack.i.h.bf16 %v7043_v37  ;;  %v2617_v43 = vsel %vm2586_vm6, %v2584_v8, %v7039_v28  ;;  %v2618_v51 = vsel %vm2586_vm6, %v2585_v36, %v7040_v5  ;;  %v577_v5 = vld [vmem:[%s7901_s26 + $0x8] sm:$0xff]  }
 0x34e   : > { %v2680_v50 = vpack.c.bf16 %v2649_v33, %v2648_v0  ;;  %v2650_v16 = vsel %vm2619_vm7, %v2617_v43, %v7044_v63  ;;  %v1495_v33 = vld [vmem:[#allocation2 + $0x32] sm:$0xff]  ;;  %v2655_v15 = vpack.c.bf16 %v1498_v42, %v1497_v22  ;;  %v2657_v35 = vpack.c.bf16 %v1500_v18, %v1499_v27  ;;  %v575_v63 = vld [vmem:[%s7901_s26] sm:$0xff]  }
 0x34f   : > { %v2651_v19 = vsel %vm2619_vm7, %v2618_v51, %v7045_v26  ;;  %v3052_v28 = vunpack.c.l.bf16 %v577_v5  ;;  %v3053_v8 = vunpack.c.h.bf16 %v577_v5  ;;  %v579_v43 = vld [vmem:[%s7901_s26 + $0x10] sm:$0xff]   ;;  %v583_v51 = vld [vmem:[%s7901_s26 + $0x20] sm:$0xff]   ;;  %v589_v27 = vld [vmem:[%s7901_s26 + $0x38] sm:$0xff]  }
 0x350   : > { %v2682_v45 = vpack.c.bf16 %v2651_v19, %v2650_v16  ;;  %v3050_v16 = vunpack.c.l.bf16 %v575_v63  ;;  %v3051_v19 = vunpack.c.h.bf16 %v575_v63  ;;  %v3065_v5 = vunpack.c.h.bf16 %v589_v27 }
 0x351   : > { %v7051_v36 = vpack.i.bf16 %v3053_v8, %v3052_v28 }
 0x353   : > { %7052 = vrot.lane.b32.xlu2 %v7051_v36, %s7788_s27 }
 0x354   : > { %v9210_v57 = vpop.f32.mrf.mxu1 }
 0x356   : > { %2881 = vmatmul.bf16.gmra.mxu1 %v2678_v12  ;;  %v9230_v12 = vpop.f32.mrf.mxu2 }
 0x35e   : > { %v9244_v60 = vpop.f32.mrf.mxu2 }
 0x363   : > { %v9224_v59 = vpop.f32.mrf.mxu1 }
 0x366   : > { %2886 = vmatmul.bf16.gmra.mxu1 %v2680_v50  ;;  %v9254_v61 = vpop.f32.mrf.mxu2  ;;  %v1496_v50 = vld [vmem:[#allocation2 + $0x3a] sm:$0xff] }
 0x367   : > { %v2653_v62 = vpack.c.bf16 %v1496_v50, %v1495_v33  ;;  %v3055_v33 = vunpack.c.h.bf16 %v579_v43  ;;  %v3058_v50 = vunpack.c.l.bf16 %v583_v51 }
 0x36b   : > { %v9240_v54 = vpop.f32.mrf.mxu1 }
 0x36e   : > { %v9258_v0 = vpop.f32.mrf.mxu2 }
 0x373   : > { %v9252_v20 = vpop.f32.mrf.mxu1 }
 0x376   : > { %2891 = vmatmul.bf16.gmra.mxu1 %v2682_v45  ;;  %v9263_v3 = vpop.f32.mrf.mxu2  ;;  %v3054_v45 = vunpack.c.l.bf16 %v579_v43  ;;  %v587_v43 = vld [vmem:[%s7901_s26 + $0x30] sm:$0xff]  }
 0x378   : > { %v7056_v22 = vpack.i.bf16 %v3055_v33, %v3054_v45  ;;  %v3063_v45 = vunpack.c.h.bf16 %v587_v43 }
 0x37a   : > { %7057 = vrot.lane.b32.xlu0 %v7056_v22, %s7788_s27 }
 0x37b   : > { %v9256_v2 = vpop.f32.mrf.mxu1 }
 0x37e   : > { %v2951_v53 = vpop.f32.mrf.mxu2 }
 0x383   : > { %v9260_v31 = vpop.f32.mrf.mxu1 }
 0x386   : > { %6282 = vmatmul.msk.bf16.vlgmr.msra.gmra.mxu1 %vm799_vm0, %v2653_v62  ;;  %v9276_v21 = vpop.f32.mrf.mxu2  ;;  %v3059_v62 = vunpack.c.h.bf16 %v583_v51  ;;  %v591_v51 = vld [vmem:[%s7901_s26 + $0x40] sm:$0xff]  }
 0x387   : > { %v3066_v33 = vunpack.c.l.bf16 %v591_v51 }
 0x388   : > { %v7066_v42 = vpack.i.bf16 %v3059_v62, %v3058_v50  ;;  %v3067_v50 = vunpack.c.h.bf16 %v591_v51 }
 0x38a   : > { %7067 = vrot.lane.b32.xlu2 %v7066_v42, %s7788_s27  ;;  %v7086_v42 = vpack.i.bf16 %v3067_v50, %v3066_v33 }
 0x38b   : > { %v9265_v58 = vpop.f32.mrf.mxu1 }
 0x38e   : > { %v2956_v23 = vpop.f32.mrf.mxu2 }
 0x393   : > { %v2862_v40 = vpop.f32.mrf.mxu1 }
 0x394   : > { %v2863_v52 = vadd.f32 %v9270_v34, %v2862_v40 }
 0x396   : > { %v9273_v44 = vadd.f32 %v2951_v53, %v2863_v52  ;;  %6283 = vmatmul.msk.bf16.gmra.mxu1 %vm799_vm0, %v2655_v15  ;;  %v7046_v53 = vpack.i.bf16 %v3051_v19, %v3050_v16  ;;  %v581_v52 = vld [vmem:[%s7901_s26 + $0x18] sm:$0xff]   ;;  %v585_v15 = vld [vmem:[%s7901_s26 + $0x28] sm:$0xff]   ;;  %v595_v16 = vld [vmem:[%s7901_s26 + $0x50] sm:$0xff]   ;;  %v3062_v19 = vunpack.c.l.bf16 %v587_v43 }
 0x397   : > { %v3057_v18 = vunpack.c.h.bf16 %v581_v52  ;;  %v3070_v62 = vunpack.c.l.bf16 %v595_v16 }
 0x398   : > { %7047 = vrot.lane.b32.xlu1 %v7046_v53, %s7788_s27  ;;  %v3071_v53 = vunpack.c.h.bf16 %v595_v16  ;;  %v7076_v22 = vpack.i.bf16 %v3063_v45, %v3062_v19  ;;  %v599_v19 = vld [vmem:[%s7901_s26 + $0x60] sm:$0xff]   ;;  %v603_v45 = vld [vmem:[%s7901_s26 + $0x70] sm:$0xff]  }
 0x399   : > { %v3074_v33 = vunpack.c.l.bf16 %v599_v19  ;;  %v3075_v50 = vunpack.c.h.bf16 %v599_v19 }
 0x39b   : > { %v9278_v29 = vpop.f32.mrf.mxu1 }
 0x3a3   : > { %v2867_v41 = vpop.f32.mrf.mxu1 }
 0x3a4   : > { %v2868_v25 = vadd.f32 %v9270_v34, %v2867_v41  ;;  %v3056_v41 = vunpack.c.l.bf16 %v581_v52  ;;  %v7096_v52 = vpack.i.bf16 %v3071_v53, %v3070_v62  ;;  %v3078_v62 = vunpack.c.l.bf16 %v603_v45 }
 0x3a5   : > { %v3079_v53 = vunpack.c.h.bf16 %v603_v45 }
 0x3a6   : > { %v9281_v13 = vadd.f32 %v2956_v23, %v2868_v25  ;;  %6284 = vmatmul.msk.bf16.gmra.mxu1 %vm799_vm0, %v2657_v35  ;;  %v3060_v25 = vunpack.c.l.bf16 %v585_v15  ;;  %v3061_v35 = vunpack.c.h.bf16 %v585_v15  ;;  %v3064_v23 = vunpack.c.l.bf16 %v589_v27  ;;  %v593_v27 = vld [vmem:[%s7901_s26 + $0x48] sm:$0xff]  }
 0x3a7   : > { %v7061_v28 = vpack.i.bf16 %v3057_v18, %v3056_v41  ;;  %v597_v41 = vld [vmem:[%s7901_s26 + $0x58] sm:$0xff]   ;;  %v601_v18 = vld [vmem:[%s7901_s26 + $0x68] sm:$0xff]  }
 0x3a8   : > { %v7071_v8 = vpack.i.bf16 %v3061_v35, %v3060_v25  ;;  %v7081_v36 = vpack.i.bf16 %v3065_v5, %v3064_v23  ;;  %v3068_v25 = vunpack.c.l.bf16 %v593_v27  ;;  %v3069_v35 = vunpack.c.h.bf16 %v593_v27  ;;  %v605_v27 = vld [vmem:[%s7901_s26 + $0x78] sm:$0xff]  }
 0x3a9   : > { %7062 = vrot.lane.b32.xlu1 %v7061_v28, %s7788_s27  ;;  %v3072_v23 = vunpack.c.l.bf16 %v597_v41  ;;  %v3073_v5 = vunpack.c.h.bf16 %v597_v41  ;;  %v3076_v28 = vunpack.c.l.bf16 %v601_v18  ;;  %v3080_v41 = vunpack.c.l.bf16 %v605_v27 }
 0x3aa   : > { %7072 = vrot.lane.b32.xlu0 %v7071_v8, %s7788_s27  ;;  %7082 = vrot.lane.b32.xlu2 %v7081_v36, %s7788_s27  ;;  %v3077_v8 = vunpack.c.h.bf16 %v601_v18  ;;  %v7091_v36 = vpack.i.bf16 %v3069_v35, %v3068_v25  ;;  %v3081_v18 = vunpack.c.h.bf16 %v605_v27 }
 0x3ab   : > { %v9284_v37 = vpop.f32.mrf.mxu1  ;;  %v7101_v43 = vpack.i.bf16 %v3073_v5, %v3072_v23  ;;  %v2818_v5 = vadd.f32 %v9270_v34, %v9023_v32  ;;  %v2823_v32 = vadd.f32 %v9270_v34, %v9059_v10  ;;  %v2828_v10 = vadd.f32 %v9270_v34, %v9093_v46 }
 0x3ac   : > { %v7111_v51 = vpack.i.bf16 %v3077_v8, %v3076_v28  ;;  %v7121_v25 = vpack.i.bf16 %v3081_v18, %v3080_v41  ;;  %v2833_v18 = vadd.f32 %v9270_v34, %v9125_v47 }
 0x3b1   : > { %7077 = vrot.lane.b32.xlu1 %v7076_v22, %s7788_s27  ;;  %v7106_v22 = vpack.i.bf16 %v3075_v50, %v3074_v33 }
 0x3b2   : > { %7087 = vrot.lane.b32.xlu0 %v7086_v42, %s7788_s27  ;;  %7097 = vrot.lane.b32.xlu2 %v7096_v52, %s7788_s27  ;;  %v7116_v42 = vpack.i.bf16 %v3079_v53, %v3078_v62 }
 0x3b3   : > { %v9286_v14 = vpop.f32.mrf.mxu1 }
 0x3b9   : > { %7092 = vrot.lane.b32.xlu1 %v7091_v36, %s7788_s27  ;;  %v9340_v36 = vpop.f32.mrf.mxu2 }
 0x3ba   : > { %7102 = vrot.lane.b32.xlu0 %v7101_v43, %s7788_s27  ;;  %7112 = vrot.lane.b32.xlu2 %v7111_v51, %s7788_s27  ;;  %v2820_v51 = vadd.f32 %v9270_v34, %v9045_v56  ;;  %v2825_v56 = vadd.f32 %v9270_v34, %v9077_v6  ;;  %v2835_v6 = vadd.f32 %v9270_v34, %v9147_v24 }
 0x3bb   : > { %v9288_v49 = vpop.f32.mrf.mxu1 }
 0x3bc   : > { %v2924_v46 = vadd.f32 %v9119_v4, %v2835_v6  ;;  %v2838_v4 = vadd.f32 %v9270_v34, %v9161_v48  ;;  %v2855_v48 = vadd.f32 %v9270_v34, %v9256_v2  ;;  %v3004_v6 = vmax.f32 %v9273_v44, 0.0 }
 0x3c1   : > { %7107 = vrot.lane.b32.xlu1 %v7106_v22, %s7788_s27  ;;  %v9345_v50 = vpop.f32.mrf.mxu2 }
 0x3c2   : > { %7117 = vrot.lane.b32.xlu0 %v7116_v42, %s7788_s27 }
 0x3c3   : > { %v9291_v26 = vpop.f32.mrf.mxu1 }
 0x3c9   : > { %7122 = vrot.lane.b32.xlu1 %v7121_v25, %s7788_s27  ;;  %v9351_v42 = vpop.f32.mrf.mxu2 }
 0x3cb   : > { %v9297_v40 = vpop.f32.mrf.mxu1 }
 0x3d3   : > { %v9305_v63 = vpop.f32.mrf.mxu1 }
 0x3db   : > { %v9313_v15 = vpop.f32.mrf.mxu1 }
 0x3e3   : > { %v9321_v16 = vpop.f32.mrf.mxu1 }
 0x3eb   : > { %v9328_v52 = vpop.f32.mrf.mxu1 }
 0x3f3   : > { %v9333_v35 = vpop.f32.mrf.mxu1 }
 0x3fb   : > { %v9336_v23 = vpop.f32.mrf.mxu1 }
 0x403   : > { %v2906_v28 = vpop.f32.mrf.mxu1 }
 0x404   : > { %v2907_v8 = vadd.f32 %v2906_v28, %v2818_v5  ;;  %v2922_v5 = vadd.f32 %v9103_v11, %v2833_v18  ;;  %v9361_v28 = vpop.f32.mrf.mxu2  ;;  %v2830_v11 = vadd.f32 %v9270_v34, %v9109_v30 }
 0x406   : > { %v2986_v43 = vmax.f32 %v2907_v8, 0.0 }
 0x408   : > { %3242 = vrot.lane.b32.xlu2 %v2986_v43, %s7790_s23 }
 0x40b   : > { %v2908_v19 = vpop.f32.mrf.mxu1 }
 0x40c   : > { %v2909_v45 = vadd.f32 %v2908_v19, %v2820_v51  ;;  %v2992_v51 = vmax.f32 %v2922_v5, 0.0  ;;  %v2840_v19 = vadd.f32 %v9270_v34, %v9179_v9  ;;  %v9373_v24 = vpop.f32.mrf.mxu2  ;;  %v2843_v9 = vadd.f32 %v9270_v34, %v9191_v38 }
 0x40d   : > { %v2858_v5 = vadd.f32 %v9270_v34, %v9260_v31  ;;  %v2865_v31 = vadd.f32 %v9270_v34, %v9278_v29 }
 0x40e   : > { %v2987_v33 = vmax.f32 %v2909_v45, 0.0  ;;  %v2929_v45 = vadd.f32 %v9155_v1, %v2840_v19  ;;  %v2932_v30 = vadd.f32 %v9173_v55, %v2843_v9  ;;  %v2944_v55 = vadd.f32 %v9254_v61, %v2855_v48 }
 0x40f   : > { %v2860_v19 = vadd.f32 %v9270_v34, %v9265_v58  ;;  %v2873_v58 = vadd.f32 %v9270_v34, %v9286_v14  ;;  %v2885_v9 = vadd.f32 %v9270_v34, %v9313_v15 }
 0x410   : > { %3244 = vrot.lane.b32.xlu0 %v2987_v33, %s7790_s23  ;;  %v2996_v38 = vmax.f32 %v2932_v30, 0.0  ;;  %v3001_v2 = vmax.f32 %v2944_v55, 0.0 }
 0x411   : > { %v2949_v29 = vadd.f32 %v9263_v3, %v2860_v19  ;;  %v2962_v3 = vadd.f32 %v9345_v50, %v2873_v58 }
 0x413   : > { %v2911_v62 = vpop.f32.mrf.mxu1 }
 0x414   : > { %v2912_v53 = vadd.f32 %v2911_v62, %v2823_v32  ;;  %v2993_v62 = vmax.f32 %v2924_v46, 0.0 }
 0x416   : > { %v2988_v22 = vmax.f32 %v2912_v53, 0.0  ;;  %v2995_v53 = vmax.f32 %v2929_v45, 0.0  ;;  %v9429_v45 = vpop.permute.xlu1 %7047 }
 0x418   : > { %3246 = vrot.lane.b32.xlu1 %v2988_v22, %s7790_s23  ;;  %v2848_v22 = vadd.f32 %v9270_v34, %v9224_v59  ;;  %v2850_v59 = vadd.f32 %v9270_v34, %v9240_v54 }
 0x41a   : > { %v2937_v1 = vadd.f32 %v9208_v7, %v2848_v22  ;;  %v3006_v22 = vmax.f32 %v9281_v13, 0.0  ;;  %v6455_v13 = vld [vmem:[%s10929_s10 + $0x10] sm:$0xff] }
 0x41b   : > { %v2913_v27 = vpop.f32.mrf.mxu1  ;;  %3816 = vmatpush.bf16.msrb.mxu2 %v6455_v13 }
 0x41c   : > { %v2914_v41 = vadd.f32 %v2913_v27, %v2825_v56  ;;  %v2927_v27 = vadd.f32 %v9139_v17, %v2838_v4  ;;  %v2939_v17 = vadd.f32 %v9230_v12, %v2850_v59  ;;  %v2947_v12 = vadd.f32 %v9258_v0, %v2858_v5  ;;  %v6454_v59 = vld [vmem:[%s10929_s10 + $0x8] sm:$0xff] }
 0x41d   : > { %v6451_v5 = vld [vmem:[%s10927_s8 + $0x8] sm:$0xff] }
 0x41e   : > { %v2989_v25 = vmax.f32 %v2914_v41, 0.0  ;;  %v2998_v41 = vmax.f32 %v2937_v1, 0.0  ;;  %v2994_v18 = vmax.f32 %v2927_v27, 0.0  ;;  %v2999_v54 = vmax.f32 %v2939_v17, 0.0  ;;  %v9449_v50 = vpop.permute.xlu1 %7062  ;;  %v6453_v17 = vld [vmem:[%s10929_s10] sm:$0xff] }
 0x41f   : > { %v3002_v61 = vmax.f32 %v2947_v12, 0.0  ;;  %3817 = vmatpush.bf16.msrb.mxu2 %v6454_v59 }
 0x420   : > { %3248 = vrot.lane.b32.xlu2 %v2989_v25, %s7790_s23  ;;  %v9391_v25 = vpop.f32.mrf.mxu2 }
 0x423   : > { %v2916_v8 = vpop.f32.mrf.mxu1  ;;  %3818 = vmatpush.bf16.msrb.mxu2 %v6453_v17 }
 0x424   : > { %v2917_v43 = vadd.f32 %v2916_v8, %v2828_v10  ;;  %v2845_v10 = vadd.f32 %v9270_v34, %v9210_v57  ;;  %v2853_v57 = vadd.f32 %v9270_v34, %v9252_v20  ;;  %v2870_v20 = vadd.f32 %v9270_v34, %v9284_v37 }
 0x426   : > { %v2990_v47 = vmax.f32 %v2917_v43, 0.0  ;;  %v2934_v7 = vadd.f32 %v9189_v39, %v2845_v10  ;;  %v2942_v39 = vadd.f32 %v9244_v60, %v2853_v57  ;;  %v2954_v60 = vadd.f32 %v9276_v21, %v2865_v31  ;;  %v9433_v21 = vpop.permute.xlu0 %7057  ;;  %v543_v31 = vld [vmem:[%s7946_s20] sm:$0xff]  }
 0x427   : > { %v2959_v0 = vadd.f32 %v9340_v36, %v2870_v20  ;;  %v7049_v20 = vunpack.i.l.bf16 %v9429_v45  ;;  %v3019_v58 = vunpack.c.h.bf16 %v543_v31 }
 0x428   : > { %3250 = vrot.lane.b32.xlu0 %v2990_v47, %s7790_s23  ;;  %3254 = vrot.lane.b32.xlu2 %v2992_v51, %s7790_s23  ;;  %v2997_v8 = vmax.f32 %v2934_v7, 0.0  ;;  %v2973_v43 = vpop.f32.mrf.mxu2  ;;  %v3000_v51 = vmax.f32 %v2942_v39, 0.0  ;;  %v9417_v47 = vpop.permute.xlu2 %7052  ;;  %v3005_v37 = vmax.f32 %v2954_v60, 0.0 }
 0x429   : > { %v3007_v46 = vmax.f32 %v2959_v0, 0.0  ;;  %v2974_v4 = vadd.f32 %v2973_v43, %v2885_v9  ;;  %v6450_v43 = vld [vmem:[%s10927_s8] sm:$0xff] }
 0x42b   : > { %v2918_v33 = vpop.f32.mrf.mxu1  ;;  %v3013_v27 = vmax.f32 %v2974_v4, 0.0 }
 0x42c   : > { %v2919_v32 = vadd.f32 %v2918_v33, %v2830_v11  ;;  %v2878_v11 = vadd.f32 %v9270_v34, %v9291_v26  ;;  %v3003_v33 = vmax.f32 %v2949_v29, 0.0  ;;  %v9517_v29 = vld [vmem:[%s10925_s6] ss:$0 sm:$0xff] }
 0x42e   : > { %v2991_v56 = vmax.f32 %v2919_v32, 0.0  ;;  %v2967_v36 = vadd.f32 %v9361_v28, %v2878_v11  ;;  %v9524_v11 = vld [vmem:[%s10926_s7] ss:$0 sm:$0xff] }
 0x430   : > { %3256 = vrot.lane.b32.xlu0 %v2993_v62, %s7790_s23  ;;  %3260 = vrot.lane.b32.xlu2 %v2995_v53, %s7790_s23  ;;  %v2976_v44 = vpop.f32.mrf.mxu2  ;;  %v9438_v32 = vpop.permute.xlu2 %7067  ;;  %v3008_v62 = vmax.f32 %v2962_v3, 0.0  ;;  %v3010_v26 = vmax.f32 %v2967_v36, 0.0  ;;  %v2880_v53 = vadd.f32 %v9270_v34, %v9297_v40 }
 0x431   : > { %3252 = vrot.lane.b32.xlu1 %v2991_v56, %s7790_s23  ;;  %v2875_v56 = vadd.f32 %v9270_v34, %v9288_v49  ;;  %v9453_v40 = vpop.permute.xlu0 %7072 }
 0x432   : > { %v2969_v28 = vadd.f32 %v9373_v24, %v2880_v53  ;;  %v2893_v24 = vadd.f32 %v9270_v34, %v9333_v35 }
 0x433   : > { %v2964_v15 = vadd.f32 %v9351_v42, %v2875_v56  ;;  %v2883_v42 = vadd.f32 %v9270_v34, %v9305_v63  ;;  %v7054_v56 = vunpack.i.l.bf16 %v9417_v47 }
 0x434   : > { %v3011_v1 = vmax.f32 %v2969_v28, 0.0 }
 0x435   : > { %v2972_v63 = vadd.f32 %v9391_v25, %v2883_v42 }
 0x437   : > { %v3012_v25 = vmax.f32 %v2972_v63, 0.0 }
 0x438   : > { %3262 = vrot.lane.b32.xlu0 %v2996_v38, %s7790_s23  ;;  %3266 = vrot.lane.b32.xlu2 %v2998_v41, %s7790_s23  ;;  %v2978_v14 = vpop.f32.mrf.mxu2  ;;  %v9456_v30 = vpop.permute.xlu2 %7082  ;;  %v2888_v38 = vadd.f32 %v9270_v34, %v9321_v16  ;;  %v3009_v41 = vmax.f32 %v2964_v15, 0.0  ;;  %v6452_v16 = vld [vmem:[%s10927_s8 + $0x10] sm:$0xff]  ;;  %v7055_v15 = vunpack.i.h.bf16 %v9417_v47 }
 0x439   : > { %3258 = vrot.lane.b32.xlu1 %v2994_v18, %s7790_s23  ;;  %v9476_v18 = vpop.permute.xlu1 %7077  ;;  %3603 = vmatpush.bf16.msrb.mxu1 %v6452_v16  ;;  %v9479_v10 = vpop.permute.xlu0 %7087 }
 0x43a   : > { %v2977_v35 = vadd.f32 %v2976_v44, %v2888_v38  ;;  %6463 = vmatpush.bf16.msra.mxu3 %v6452_v16 }
 0x43c   : > { %v3014_v55 = vmax.f32 %v2977_v35, 0.0 }
 0x43d   : > { %3604 = vmatpush.bf16.msrb.mxu1 %v6451_v5 }
 0x43e   : > { %6464 = vmatpush.bf16.msra.mxu3 %v6451_v5 }
 0x440   : > { %3268 = vrot.lane.b32.xlu0 %v2999_v54, %s7790_s23  ;;  %3272 = vrot.lane.b32.xlu2 %v3001_v2, %s7790_s23  ;;  %v2981_v49 = vpop.f32.mrf.mxu2  ;;  %v2895_v54 = vadd.f32 %v9270_v34, %v9336_v23  ;;  %v9486_v2 = vpop.permute.xlu2 %7097 }
 0x441   : > { %3264 = vrot.lane.b32.xlu1 %v2997_v8, %s7790_s23  ;;  %v2982_v48 = vadd.f32 %v2981_v49, %v2893_v24  ;;  %v2890_v8 = vadd.f32 %v9270_v34, %v9328_v52  ;;  %v9499_v39 = vpop.permute.xlu1 %7092  ;;  %3605 = vmatpush.bf16.msrb.mxu1 %v6450_v43  ;;  %v9501_v52 = vpop.permute.xlu0 %7102 }
 0x442   : > { %6465 = vmatpush.bf16.msra.mxu3 %v6450_v43 }
 0x443   : > { %v3016_v7 = vmax.f32 %v2982_v48, 0.0  ;;  %v2979_v12 = vadd.f32 %v2978_v14, %v2890_v8 }
 0x448   : > { %3274 = vrot.lane.b32.xlu0 %v3002_v61, %s7790_s23  ;;  %3278 = vrot.lane.b32.xlu2 %v3004_v6, %s7790_s23  ;;  %v2983_v57 = vpop.f32.mrf.mxu2  ;;  %v3015_v61 = vmax.f32 %v2979_v12, 0.0  ;;  %v9503_v6 = vpop.permute.xlu2 %7112  ;;  %v552_v12 = vld [vmem:[%s7946_s20 + $0x24] sm:$0xff]  }
 0x449   : > { %3270 = vrot.lane.b32.xlu1 %v3000_v51, %s7790_s23  ;;  %v2984_v23 = vadd.f32 %v2983_v57, %v2895_v54  ;;  %v3018_v51 = vunpack.c.l.bf16 %v543_v31  ;;  %v9509_v19 = vpop.permute.xlu1 %7107  ;;  %v9511_v60 = vpop.permute.xlu0 %7117  ;;  %v7059_v54 = vunpack.i.l.bf16 %v9433_v21 }
 0x44b   : > { %v3017_v34 = vmax.f32 %v2984_v23, 0.0  ;;  %v3338_v44 = vsel %vm799_vm0, %v3018_v51, %v7049_v20  ;;  %v548_v23 = vld [vmem:[%s7946_s20 + $0x14] sm:$0xf]  ;;  %v7070_v20 = vunpack.i.h.bf16 %v9438_v32  ;;  %v3027_v51 = vunpack.c.l.bf16 %v552_v12 }
 0x44c   : > { %v3023_v31 = vunpack.c.l.bf16 %v548_v23 }
 0x450   : > { %3280 = vrot.lane.b32.xlu0 %v3005_v37, %s7790_s23  ;;  %3284 = vrot.lane.b32.xlu2 %v3007_v46, %s7790_s23  ;;  %v7050_v46 = vunpack.i.h.bf16 %v9429_v45 }
 0x451   : > { %3276 = vrot.lane.b32.xlu1 %v3003_v33, %s7790_s23  ;;  %v9527_v3 = vpop.permute.xlu1 %7122 }
 0x452   : > { %v3339_v36 = vsel %vm799_vm0, %v3019_v58, %v7050_v46  ;;  %v549_v58 = vld [vmem:[%s7946_s20 + $0x18] sm:$0xff]  }
 0x458   : > { %3286 = vrot.lane.b32.xlu0 %v3008_v62, %s7790_s23  ;;  %3290 = vrot.lane.b32.xlu2 %v3010_v26, %s7790_s23  ;;  %v545_v26 = vld [vmem:[%s7946_s20 + $0x8] sm:$0xf] }
 0x459   : > { %3282 = vrot.lane.b32.xlu1 %v3006_v22, %s7790_s23  ;;  %v546_v22 = vld [vmem:[%s7946_s20 + $0xc] sm:$0xff]   ;;  %v3020_v4 = vunpack.c.l.bf16 %v545_v26 }
 0x45a   : > { %v3021_v49 = vunpack.c.l.bf16 %v546_v22 }
 0x45b   : > { %v3340_v24 = vsel %vm799_vm0, %v3020_v4, %v7054_v56  ;;  %v7064_v4 = vunpack.i.l.bf16 %v9449_v50 }
 0x45c   : > { %v3341_v59 = vsel %vm799_vm0, %v3021_v49, %v7055_v15  ;;  %v3024_v15 = vunpack.c.l.bf16 %v549_v58 }
 0x460   : > { %3292 = vrot.lane.b32.xlu0 %v3011_v1, %s7790_s23  ;;  %3296 = vrot.lane.b32.xlu2 %v3013_v27, %s7790_s23 }
 0x461   : > { %3288 = vrot.lane.b32.xlu1 %v3009_v41, %s7790_s23 }
 0x462   : > { %v3243_v0 = vpop.permute.xlu2 %3242 }
 0x463   : > { %v3370_v37 = vsel %vm868_vm1, %v3338_v44, %v3243_v0 }
 0x464   : > { %v3406_v33 = vmul.f32 %v9517_v29, %v3370_v37 }
 0x466   : > { %v3442_v53 = vadd.f32 %v9524_v11, %v3406_v33 }
 0x468   : > { %3298 = vrot.lane.b32.xlu0 %v3014_v55, %s7790_s23  ;;  %3302 = vrot.lane.b32.xlu2 %v3016_v7, %s7790_s23  ;;  %v3474_v13 = vmax.f32 %v3442_v53, 0.0  ;;  %v7069_v53 = vunpack.i.l.bf16 %v9438_v32 }
 0x469   : > { %3294 = vrot.lane.b32.xlu1 %v3012_v25, %s7790_s23  ;;  %v3022_v25 = vunpack.c.h.bf16 %v546_v22  ;;  %v3025_v22 = vunpack.c.h.bf16 %v549_v58 }
 0x46b   : > { %v3342_v43 = vsel %vm799_vm0, %v3022_v25, %v7059_v54  ;;  %v7074_v54 = vunpack.i.l.bf16 %v9453_v40 }
 0x470   : > { %3304 = vrot.lane.b32.xlu0 %v3017_v34, %s7790_s23 }
 0x471   : > { %3300 = vrot.lane.b32.xlu1 %v3015_v61, %s7790_s23  ;;  %v7060_v61 = vunpack.i.h.bf16 %v9433_v21 }
 0x47a   : > { %v3249_v27 = vpop.permute.xlu2 %3248 }
 0x47b   : > { %v3373_v16 = vsel %vm868_vm1, %v3341_v59, %v3249_v27 }
 0x47c   : > { %v3409_v47 = vmul.f32 %v9517_v29, %v3373_v16 }
 0x47e   : > { %v3445_v63 = vadd.f32 %v9524_v11, %v3409_v47 }
 0x480   : > { %v3477_v7 = vmax.f32 %v3445_v63, 0.0  ;;  %v7075_v63 = vunpack.i.h.bf16 %v9453_v40 }
 0x482   : > { %v3245_v14 = vpop.permute.xlu0 %3244  ;;  %v3255_v5 = vpop.permute.xlu2 %3254 }
 0x483   : > { %v3371_v62 = vsel %vm868_vm1, %v3339_v36, %v3245_v14  ;;  %v551_v36 = vld [vmem:[%s7946_s20 + $0x20] sm:$0xf]  ;;  %v3347_v14 = vsel %vm799_vm0, %v3027_v51, %v7070_v20 }
 0x484   : > { %v3407_v45 = vmul.f32 %v9517_v29, %v3371_v62  ;;  %v3719_v9 = vpack.c.bf16 %v3371_v62, %v3370_v37  ;;  %v3343_v37 = vsel %vm799_vm0, %v3023_v31, %v7060_v61 }
 0x486   : > { %v3443_v28 = vadd.f32 %v9524_v11, %v3407_v45  ;;  %6338 = vmatmul.msk.bf16.vlgmr.msrb.gmra.mxu2 %vm2487_vm3, %v3719_v9  ;;  %v7065_v9 = vunpack.i.h.bf16 %v9449_v50  ;;  %v3344_v50 = vsel %vm799_vm0, %v3024_v15, %v7064_v4 }
 0x488   : > { %v3475_v1 = vmax.f32 %v3443_v28, 0.0  ;;  %v3026_v28 = vunpack.c.l.bf16 %v551_v36  ;;  %v3345_v27 = vsel %vm799_vm0, %v3025_v22, %v7065_v9  ;;  %v7079_v9 = vunpack.i.l.bf16 %v9476_v18 }
 0x48a   : > { %v3506_v38 = vpack.c.bf16 %v3475_v1, %v3474_v13  ;;  %v3247_v41 = vpop.permute.xlu1 %3246  ;;  %v3261_v44 = vpop.permute.xlu2 %3260 }
 0x48b   : > { %v3372_v42 = vsel %vm868_vm1, %v3340_v24, %v3247_v41  ;;  %v9567_v45 = vsel %vm868_vm1, %v3347_v14, %v3261_v44  ;;  %v3346_v24 = vsel %vm799_vm0, %v3026_v28, %v7069_v53  ;;  %v555_v14 = vld [vmem:[%s7946_s20 + $0x30] sm:$0xff]  }
 0x48c   : > { %6310 = vmatmul.msk.bf16.vlgmr.msrb.gmra.mxu1 %vm2487_vm3, %v3506_v38  ;;  %v3408_v35 = vmul.f32 %v9517_v29, %v3372_v42  ;;  %v3720_v17 = vpack.c.bf16 %v3373_v16, %v3372_v42  ;;  %v3415_v13 = vmul.f32 %v9517_v29, %v9567_v45  ;;  %v554_v16 = vld [vmem:[%s7946_s20 + $0x2c] sm:$0xf]  ;;  %v3030_v22 = vunpack.c.l.bf16 %v555_v14 }
 0x48e   : > { %v3444_v48 = vadd.f32 %v9524_v11, %v3408_v35  ;;  %v3451_v35 = vadd.f32 %v9524_v11, %v3415_v13 }
 0x490   : > { %v3476_v55 = vmax.f32 %v3444_v48, 0.0  ;;  %v3376_v48 = vsel %vm868_vm1, %v3344_v50, %v3255_v5  ;;  %v7084_v50 = vunpack.i.l.bf16 %v9456_v30 }
 0x491   : > { %v3412_v25 = vmul.f32 %v9517_v29, %v3376_v48 }
 0x492   : > { %v3507_v8 = vpack.c.bf16 %v3477_v7, %v3476_v55  ;;  %v3029_v7 = vunpack.c.l.bf16 %v554_v16  ;;  %v3267_v4 = vpop.permute.xlu2 %3266  ;;  %v558_v16 = vld [vmem:[%s7946_s20 + $0x3c] sm:$0xff]  }
 0x493   : > { %v3448_v51 = vadd.f32 %v9524_v11, %v3412_v25 }
 0x494   : > { %v3349_v61 = vsel %vm799_vm0, %v3029_v7, %v7075_v63 }
 0x496   : > { %6339 = vmatmul.msk.bf16.gmra.mxu2 %vm2487_vm3, %v3720_v17 }
 0x49a   : > { %v3251_v57 = vpop.permute.xlu0 %3250 }
 0x49b   : > { %v3374_v34 = vsel %vm868_vm1, %v3342_v43, %v3251_v57  ;;  %v3028_v57 = vunpack.c.h.bf16 %v552_v12 }
 0x49c   : > { %6311 = vmatmul.msk.bf16.gmra.mxu1 %vm2487_vm3, %v3507_v8  ;;  %v3410_v0 = vmul.f32 %v9517_v29, %v3374_v34  ;;  %v3483_v8 = vmax.f32 %v3451_v35, 0.0 }
 0x49d   : > { %v3348_v40 = vsel %vm799_vm0, %v3028_v57, %v7074_v54 }
 0x49e   : > { %v3446_v62 = vadd.f32 %v9524_v11, %v3410_v0 }
 0x4a0   : > { %v3478_v49 = vmax.f32 %v3446_v62, 0.0 }
 0x4a2   : > { %v3257_v32 = vpop.permute.xlu0 %3256 }
 0x4a3   : > { %v3253_v46 = vpop.permute.xlu1 %3252  ;;  %v3377_v42 = vsel %vm868_vm1, %v3345_v27, %v3257_v32  ;;  %v3350_v32 = vsel %vm799_vm0, %v3030_v22, %v7079_v9  ;;  %v10952_v9 = vmov 0.0   ;;  %v7095_v22 = vunpack.i.h.bf16 %v9499_v39 }
 0x4a4   : > { %v3375_v33 = vsel %vm868_vm1, %v3343_v37, %v3253_v46  ;;  %v3413_v17 = vmul.f32 %v9517_v29, %v3377_v42  ;;  %v3722_v0 = vpack.c.bf16 %v3377_v42, %v3376_v48  ;;  %v3480_v46 = vmax.f32 %v3448_v51, 0.0  ;;  %3905 = vst.msk [vmem:[#allocation3 + $0x18] sm:$0xff] %vm3900_vm8, %v10952_v9 }
 0x4a5   : > { %v3411_v21 = vmul.f32 %v9517_v29, %v3375_v33  ;;  %v3721_v26 = vpack.c.bf16 %v3375_v33, %v3374_v34  ;;  %v3382_v27 = vsel %vm868_vm1, %v3350_v32, %v3267_v4  ;;  %v3033_v48 = vunpack.c.l.bf16 %v558_v16  ;;  %3906 = vst.msk [vmem:[#allocation3 + $0x20] sm:$0xff] %vm3900_vm8, %v10952_v9 }
 0x4a6   : > { %v3449_v43 = vadd.f32 %v9524_v11, %v3413_v17  ;;  %v3273_v17 = vpop.permute.xlu2 %3272  ;;  %3901 = vst.msk [vmem:[#allocation3] sm:$0xff] %vm3900_vm8, %v10952_v9  ;;  %v7094_v4 = vunpack.i.l.bf16 %v9499_v39 }
 0x4a7   : > { %v3447_v56 = vadd.f32 %v9524_v11, %v3411_v21  ;;  %6340 = vmatmul.msk.bf16.gmra.mxu2 %vm2487_vm3, %v3721_v26  ;;  %v7080_v21 = vunpack.i.h.bf16 %v9476_v18  ;;  %v3031_v26 = vunpack.c.h.bf16 %v555_v14  ;;  %3902 = vst.msk [vmem:[#allocation3 + $0x8] sm:$0xff] %vm3900_vm8, %v10952_v9 }
 0x4a8   : > { %v3481_v44 = vmax.f32 %v3449_v43, 0.0  ;;  %3908 = vst.msk [vmem:[#allocation3 + $0x30] sm:$0xff] %vm3900_vm8, %v10952_v9 }
 0x4a9   : > { %v3479_v1 = vmax.f32 %v3447_v56, 0.0  ;;  %v3351_v15 = vsel %vm799_vm0, %v3031_v26, %v7080_v21  ;;  %v561_v26 = vld [vmem:[%s7946_s20 + $0x48] sm:$0xff]   ;;  %3909 = vst.msk [vmem:[#allocation3 + $0x38] sm:$0xff] %vm3900_vm8, %v10952_v9 }
 0x4aa   : > { %v3263_v34 = vpop.permute.xlu0 %3262  ;;  %v3509_v33 = vpack.c.bf16 %v3481_v44, %v3480_v46  ;;  %3911 = vst.msk [vmem:[#allocation3 + $0x48] sm:$0xff] %vm3900_vm8, %v10952_v9 }
 0x4ab   : > { %v3508_v38 = vpack.c.bf16 %v3479_v1, %v3478_v49  ;;  %v3259_v41 = vpop.permute.xlu1 %3258  ;;  %v3380_v12 = vsel %vm868_vm1, %v3348_v40, %v3263_v34  ;;  %v560_v34 = vld [vmem:[%s7946_s20 + $0x44] sm:$0xf]  ;;  %v3034_v40 = vunpack.c.h.bf16 %v558_v16  ;;  %3912 = vst.msk [vmem:[#allocation3 + $0x50] sm:$0xff] %vm3900_vm8, %v10952_v9 }
 0x4ac   : > { %v3378_v59 = vsel %vm868_vm1, %v3346_v24, %v3259_v41  ;;  %v3416_v58 = vmul.f32 %v9517_v29, %v3380_v12  ;;  %v557_v41 = vld [vmem:[%s7946_s20 + $0x38] sm:$0xf]  ;;  %v3035_v51 = vunpack.c.l.bf16 %v560_v34  ;;  %3914 = vst.msk [vmem:[#allocation3 + $0x60] sm:$0xff] %vm3900_vm8, %v10952_v9 }
 0x4ad   : > { %v3414_v47 = vmul.f32 %v9517_v29, %v3378_v59  ;;  %6312 = vmatmul.msk.bf16.gmra.mxu1 %vm2487_vm3, %v3508_v38  ;;  %v3723_v1 = vpack.c.bf16 %v9567_v45, %v3378_v59  ;;  %v3418_v38 = vmul.f32 %v9517_v29, %v3382_v27  ;;  %v3032_v45 = vunpack.c.l.bf16 %v557_v41  ;;  %3915 = vst.msk [vmem:[#allocation3 + $0x68] sm:$0xff] %vm3900_vm8, %v10952_v9 }
 0x4ae   : > { %v3452_v62 = vadd.f32 %v9524_v11, %v3416_v58  ;;  %v7085_v59 = vunpack.i.h.bf16 %v9456_v30  ;;  %v3279_v32 = vpop.permute.xlu2 %3278  ;;  %3917 = vst.msk [vmem:[#allocation3 + $0x78] sm:$0xff] %vm3900_vm8, %v10952_v9 }
 0x4af   : > { %v3450_v55 = vadd.f32 %v9524_v11, %v3414_v47  ;;  %v3454_v42 = vadd.f32 %v9524_v11, %v3418_v38  ;;  %3918 = vst.msk [vmem:[#allocation3 + $0x80] sm:$0xff] %vm3900_vm8, %v10952_v9 }
 0x4b0   : > { %v3484_v56 = vmax.f32 %v3452_v62, 0.0  ;;  %v3353_v25 = vsel %vm799_vm0, %v3033_v48, %v7085_v59  ;;  %3920 = vst.msk [vmem:[#allocation3 + $0x90] sm:$0xff] %vm3900_vm8, %v10952_v9  ;;  %v7099_v59 = vunpack.i.l.bf16 %v9486_v2 }
 0x4b1   : > { %v3482_v23 = vmax.f32 %v3450_v55, 0.0  ;;  %v3486_v47 = vmax.f32 %v3454_v42, 0.0  ;;  %v3352_v55 = vsel %vm799_vm0, %v3032_v45, %v7084_v50  ;;  %v3385_v57 = vsel %vm868_vm1, %v3353_v25, %v3273_v17  ;;  %3921 = vst.msk [vmem:[#allocation3 + $0x98] sm:$0xff] %vm3900_vm8, %v10952_v9  ;;  %v563_v50 = vld [vmem:[%s7946_s20 + $0x50] sm:$0xf]  ;;  %v9705_v45 = vld [vmem:[%s7946_s20 + $0x54] sm:$0xff]  }
 0x4b2   : > { %v3269_v28 = vpop.permute.xlu0 %3268  ;;  %v3421_v30 = vmul.f32 %v9517_v29, %v3385_v57  ;;  %3923 = vst.msk [vmem:[#allocation3 + $0xa8] sm:$0xff] %vm3900_vm8, %v10952_v9  ;;  %v3038_v48 = vunpack.c.l.bf16 %v563_v50 }
 0x4b3   : > { %v3265_v5 = vpop.permute.xlu1 %3264  ;;  %v3510_v31 = vpack.c.bf16 %v3483_v8, %v3482_v23  ;;  %v3383_v49 = vsel %vm868_vm1, %v3351_v15, %v3269_v28  ;;  %v3036_v15 = vunpack.c.l.bf16 %v561_v26  ;;  %3924 = vst.msk [vmem:[#allocation3 + $0xb0] sm:$0xff] %vm3900_vm8, %v10952_v9 }
 0x4b4   : > { %v3381_v20 = vsel %vm868_vm1, %v3349_v61, %v3265_v5  ;;  %v3419_v18 = vmul.f32 %v9517_v29, %v3383_v49  ;;  %v3457_v61 = vadd.f32 %v9524_v11, %v3421_v30  ;;  %v7090_v5 = vunpack.i.h.bf16 %v9479_v10  ;;  %3926 = vst.msk [vmem:[#allocation3 + $0xc0] sm:$0xff] %vm3900_vm8, %v10952_v9 }
 0x4b5   : > { %6314 = vmatmul.msk.bf16.vlgmr.msra.gmra.mxu3 %vm2487_vm3, %v3510_v31  ;;  %v3417_v37 = vmul.f32 %v9517_v29, %v3381_v20  ;;  %v3724_v8 = vpack.c.bf16 %v3381_v20, %v3380_v12  ;;  %v7089_v20 = vunpack.i.l.bf16 %v9479_v10  ;;  %v3356_v39 = vsel %vm799_vm0, %v3036_v15, %v7094_v4  ;;  %3927 = vst.msk [vmem:[#allocation3 + $0xc8] sm:$0xff] %vm3900_vm8, %v10952_v9 }
 0x4b6   : > { %v3455_v24 = vadd.f32 %v9524_v11, %v3419_v18  ;;  %3929 = vst.msk [vmem:[#allocation3 + $0xd8] sm:$0xff] %vm3900_vm8, %v10952_v9  ;;  %v3358_v25 = vsel %vm799_vm0, %v3038_v48, %v7099_v59 }
 0x4b7   : > { %6341 = vmatmul.msk.bf16.gmra.mxu2 %vm2487_vm3, %v3722_v0  ;;  %v3453_v36 = vadd.f32 %v9524_v11, %v3417_v37  ;;  %v3489_v0 = vmax.f32 %v3457_v61, 0.0  ;;  %v3355_v37 = vsel %vm799_vm0, %v3035_v51, %v7090_v5  ;;  %3930 = vst.msk [vmem:[#allocation3 + $0xe0] sm:$0xff] %vm3900_vm8, %v10952_v9 }
 0x4b8   : > { %v3487_v35 = vmax.f32 %v3455_v24, 0.0  ;;  %v9678_v24 = vsel %vm868_vm1, %v3356_v39, %v3279_v32  ;;  %3932 = vst.msk [vmem:[#allocation3 + $0xf0] sm:$0xff] %vm3900_vm8, %v10952_v9  ;;  %v567_v32 = vld [vmem:[%s7946_s20 + $0x60] sm:$0xff]  }
 0x4b9   : > { %v3485_v53 = vmax.f32 %v3453_v36, 0.0  ;;  %v3354_v36 = vsel %vm799_vm0, %v3034_v40, %v7089_v20  ;;  %v3424_v42 = vmul.f32 %v9517_v29, %v9678_v24  ;;  %3933 = vst.msk [vmem:[#allocation3 + $0xf8] sm:$0xff] %vm3900_vm8, %v10952_v9  ;;  %v566_v20 = vld [vmem:[%s7946_s20 + $0x5c] sm:$0xf]  ;;  %v3043_v39 = vunpack.c.h.bf16 %v567_v32 }
 0x4ba   : > { %v3512_v7 = vpack.c.bf16 %v3487_v35, %v3486_v47  ;;  %v3275_v44 = vpop.permute.xlu0 %3274  ;;  %3935 = vst.msk [vmem:[#allocation3 + $0x108] sm:$0xff] %vm3900_vm8, %v10952_v9 }
 0x4bb   : > { %v3511_v13 = vpack.c.bf16 %v3485_v53, %v3484_v56  ;;  %v3271_v63 = vpop.permute.xlu1 %3270  ;;  %v9641_v14 = vsel %vm868_vm1, %v3354_v36, %v3275_v44  ;;  %v3037_v56 = vunpack.c.h.bf16 %v561_v26  ;;  %v3460_v35 = vadd.f32 %v9524_v11, %v3424_v42  ;;  %3936 = vst.msk [vmem:[#allocation3 + $0x110] sm:$0xff] %vm3900_vm8, %v10952_v9 }
 0x4bc   : > { %v3384_v54 = vsel %vm868_vm1, %v3352_v55, %v3271_v63  ;;  %v3422_v62 = vmul.f32 %v9517_v29, %v9641_v14  ;;  %v7100_v63 = vunpack.i.h.bf16 %v9486_v2  ;;  %v3039_v55 = vunpack.c.l.bf16 %v9705_v45  ;;  %3938 = vst.msk [vmem:[#allocation3 + $0x120] sm:$0xff] %vm3900_vm8, %v10952_v9 }
 0x4bd   : > { %6313 = vmatmul.msk.bf16.gmra.mxu1 %vm2487_vm3, %v3509_v33  ;;  %v3420_v23 = vmul.f32 %v9517_v29, %v3384_v54  ;;  %v3725_v33 = vpack.c.bf16 %v3383_v49, %v3382_v27  ;;  %v3726_v38 = vpack.c.bf16 %v3385_v57, %v3384_v54  ;;  %v3492_v17 = vmax.f32 %v3460_v35, 0.0  ;;  %v3285_v54 = vpop.permute.xlu2 %3284  ;;  %3939 = vst.msk [vmem:[#allocation3 + $0x128] sm:$0xff] %vm3900_vm8, %v10952_v9 }
 0x4be   : > { %v3458_v53 = vadd.f32 %v9524_v11, %v3422_v62  ;;  %v3359_v2 = vsel %vm799_vm0, %v3039_v55, %v7100_v63  ;;  %3941 = vst.msk [vmem:[#allocation3 + $0x138] sm:$0xff] %vm3900_vm8, %v10952_v9 }
 0x4bf   : > { %v3456_v43 = vadd.f32 %v9524_v11, %v3420_v23  ;;  %v9735_v30 = vsel %vm868_vm1, %v3359_v2, %v3285_v54  ;;  %3942 = vst.msk [vmem:[#allocation3 + $0x140] sm:$0xff] %vm3900_vm8, %v10952_v9  ;;  %v4021_v54 = vld [vmem:[#allocation3 + $0x1] sm:$0xff] }
 0x4c0   : > { %v3427_v61 = vmul.f32 %v9517_v29, %v9735_v30  ;;  %3944 = vst.msk [vmem:[#allocation3 + $0x150] sm:$0xff] %vm3900_vm8, %v10952_v9 }
 0x4c1   : > { %v3488_v31 = vmax.f32 %v3456_v43, 0.0  ;;  %v9740_v43 = vld [vmem:[%s10928_s9] ss:$0 sm:$0xff]  ;;  %3945 = vst.msk [vmem:[#allocation3 + $0x158] sm:$0xff] %vm3900_vm8, %v10952_v9 }
 0x4c2   : > { %v3281_v49 = vpop.permute.xlu0 %3280  ;;  %3947 = vst.msk [vmem:[#allocation3 + $0x168] sm:$0xff] %vm3900_vm8, %v10952_v9  ;;  %v3463_v40 = vadd.f32 %v9524_v11, %v3427_v61 }
 0x4c3   : > { %v3277_v12 = vpop.permute.xlu1 %3276  ;;  %v3513_v46 = vpack.c.bf16 %v3489_v0, %v3488_v31  ;;  %3948 = vst.msk [vmem:[#allocation3 + $0x170] sm:$0xff] %vm3900_vm8, %v10952_v9 }
 0x4c4   : > { %v9636_v58 = vsel %vm868_vm1, %v3355_v37, %v3277_v12  ;;  %3950 = vst.msk [vmem:[#allocation3 + $0x180] sm:$0xff] %vm3900_vm8, %v10952_v9  ;;  %v7105_v12 = vunpack.i.h.bf16 %v9501_v52  ;;  %v3041_v37 = vunpack.c.l.bf16 %v566_v20 }
 0x4c5   : > { %6315 = vmatmul.msk.bf16.gmra.mxu3 %vm2487_vm3, %v3511_v13  ;;  %v3423_v10 = vmul.f32 %v9517_v29, %v9636_v58  ;;  %v3490_v13 = vmax.f32 %v3458_v53, 0.0  ;;  %v3727_v23 = vpack.c.bf16 %v9636_v58, %v9641_v14  ;;  %3951 = vst.msk [vmem:[#allocation3 + $0x188] sm:$0xff] %vm3900_vm8, %v10952_v9  ;;  %v3495_v58 = vmax.f32 %v3463_v40, 0.0  ;;  %v3291_v59 = vpop.permute.xlu2 %3290 }
 0x4c6   : > { %3953 = vst.msk [vmem:[#allocation3 + $0x198] sm:$0xff] %vm3900_vm8, %v10952_v9  ;;  %v7115_v40 = vunpack.i.h.bf16 %v9503_v6 }
 0x4c7   : > { %6342 = vmatmul.msk.bf16.gmra.mxu2 %vm2487_vm3, %v3723_v1  ;;  %v3459_v21 = vadd.f32 %v9524_v11, %v3423_v10  ;;  %v3357_v1 = vsel %vm799_vm0, %v3037_v56, %v7095_v22  ;;  %3954 = vst.msk [vmem:[#allocation3 + $0x1a0] sm:$0xff] %vm3900_vm8, %v10952_v9 }
 0x4c8   : > { %v9669_v18 = vsel %vm868_vm1, %v3357_v1, %v3281_v49  ;;  %3907 = vst.msk [vmem:[#allocation3 + $0x28] sm:$0x3] %vm3903_vm9, %v10952_v9 }
 0x4c9   : > { %v3491_v28 = vmax.f32 %v3459_v21, 0.0  ;;  %v3425_v41 = vmul.f32 %v9517_v29, %v9669_v18  ;;  %v3361_v21 = vsel %vm799_vm0, %v3041_v37, %v7105_v12  ;;  %3904 = vst.msk [vmem:[#allocation3 + $0x10] sm:$0x3] %vm3903_vm9, %v10952_v9  ;;  %v3728_v22 = vpack.c.bf16 %v9669_v18, %v9678_v24 }
 0x4ca   : > { %v3287_v62 = vpop.permute.xlu0 %3286  ;;  %3910 = vst.msk [vmem:[#allocation3 + $0x40] sm:$0x3] %vm3903_vm9, %v10952_v9  ;;  %v7110_v18 = vunpack.i.h.bf16 %v9509_v19  ;;  %v7109_v24 = vunpack.i.l.bf16 %v9509_v19 }
 0x4cb   : > { %v3514_v27 = vpack.c.bf16 %v3491_v28, %v3490_v13  ;;  %v3461_v16 = vadd.f32 %v9524_v11, %v3425_v41  ;;  %3913 = vst.msk [vmem:[#allocation3 + $0x58] sm:$0x3] %vm3903_vm9, %v10952_v9  ;;  %v3042_v41 = vunpack.c.l.bf16 %v567_v32 }
 0x4cc   : > { %3916 = vst.msk [vmem:[#allocation3 + $0x70] sm:$0x3] %vm3903_vm9, %v10952_v9 }
 0x4cd   : > { %v3493_v47 = vmax.f32 %v3461_v16, 0.0  ;;  %3919 = vst.msk [vmem:[#allocation3 + $0x88] sm:$0x3] %vm3903_vm9, %v10952_v9 }
 0x4ce   : > { %3922 = vst.msk [vmem:[#allocation3 + $0xa0] sm:$0x3] %vm3903_vm9, %v10952_v9 }
 0x4cf   : > { %3925 = vst.msk [vmem:[#allocation3 + $0xb8] sm:$0x3] %vm3903_vm9, %v10952_v9 }
 0x4d0   : > { %3928 = vst.msk [vmem:[#allocation3 + $0xd0] sm:$0x3] %vm3903_vm9, %v10952_v9 }
 0x4d1   : > { %3931 = vst.msk [vmem:[#allocation3 + $0xe8] sm:$0x3] %vm3903_vm9, %v10952_v9 }
 0x4d2   : > { %3934 = vst.msk [vmem:[#allocation3 + $0x100] sm:$0x3] %vm3903_vm9, %v10952_v9  ;;  %v3293_v16 = vpop.permute.xlu0 %3292 }
 0x4d3   : > { %3937 = vst.msk [vmem:[#allocation3 + $0x118] sm:$0x3] %vm3903_vm9, %v10952_v9 }
 0x4d4   : > { %3940 = vst.msk [vmem:[#allocation3 + $0x130] sm:$0x3] %vm3903_vm9, %v10952_v9 }
 0x4d5   : > { %6316 = vmatmul.msk.bf16.gmra.mxu3 %vm2487_vm3, %v3512_v7  ;;  %v3283_v7 = vpop.permute.xlu1 %3282  ;;  %3943 = vst.msk [vmem:[#allocation3 + $0x148] sm:$0x3] %vm3903_vm9, %v10952_v9 }
 0x4d6   : > { %v9724_v57 = vsel %vm868_vm1, %v3358_v25, %v3283_v7  ;;  %3946 = vst.msk [vmem:[#allocation3 + $0x160] sm:$0x3] %vm3903_vm9, %v10952_v9  ;;  %v4022_v25 = vld [vmem:[#allocation3 + $0x9] sm:$0xff] }
 0x4d7   : > { %6343 = vmatmul.msk.bf16.gmra.mxu2 %vm2487_vm3, %v3724_v8  ;;  %v3515_v8 = vpack.c.bf16 %v3493_v47, %v3492_v17  ;;  %v3426_v34 = vmul.f32 %v9517_v29, %v9724_v57  ;;  %3949 = vst.msk [vmem:[#allocation3 + $0x178] sm:$0x3] %vm3903_vm9, %v10952_v9  ;;  %v3363_v47 = vsel %vm799_vm0, %v3043_v39, %v7110_v18  ;;  %v572_v39 = vld [vmem:[%s7946_s20 + $0x74] sm:$0xf] }
 0x4d8   : > { %3952 = vst.msk [vmem:[#allocation3 + $0x190] sm:$0x3] %vm3903_vm9, %v10952_v9  ;;  %v9838_v48 = vsel %vm868_vm1, %v3363_v47, %v3293_v16  ;;  %v3362_v17 = vsel %vm799_vm0, %v3042_v41, %v7109_v24  ;;  %v3729_v55 = vpack.c.bf16 %v9735_v30, %v9724_v57  ;;  %v7120_v41 = vunpack.i.h.bf16 %v9511_v60 }
 0x4d9   : > { %v3462_v51 = vadd.f32 %v9524_v11, %v3426_v34  ;;  %3955 = vst.msk [vmem:[#allocation3 + $0x1a8] sm:$0x3] %vm3903_vm9, %v10952_v9  ;;  %v9848_v7 = vsel %vm868_vm1, %v3362_v17, %v3291_v59  ;;  %v3431_v9 = vmul.f32 %v9517_v29, %v9838_v48  ;;  %v569_v34 = vld [vmem:[%s7946_s20 + $0x68] sm:$0xf]  ;;  %v3047_v16 = vunpack.c.l.bf16 %v572_v39 }
 0x4da   : > { %v3430_v57 = vmul.f32 %v9517_v29, %v9848_v7  ;;  %v3299_v17 = vpop.permute.xlu0 %3298 }
 0x4db   : > { %v3494_v44 = vmax.f32 %v3462_v51, 0.0  ;;  %v7114_v51 = vunpack.i.l.bf16 %v9503_v6 }
 0x4dc   : > { %v3466_v61 = vadd.f32 %v9524_v11, %v3430_v57 }
 0x4dd   : > { %v3289_v36 = vpop.permute.xlu1 %3288 }
 0x4de   : > { %v9784_v26 = vsel %vm868_vm1, %v3361_v21, %v3289_v36  ;;  %v3498_v12 = vmax.f32 %v3466_v61, 0.0 }
 0x4df   : > { %v3429_v4 = vmul.f32 %v9517_v29, %v9784_v26 }
 0x4e1   : > { %v3465_v49 = vadd.f32 %v9524_v11, %v3429_v4 }
 0x4e5   : > { %6317 = vmatmul.msk.bf16.gmra.mxu3 %vm2487_vm3, %v3513_v46  ;;  %v7104_v46 = vunpack.i.l.bf16 %v9501_v52  ;;  %v3516_v52 = vpack.c.bf16 %v3495_v58, %v3494_v44  ;;  %v3295_v37 = vpop.permute.xlu1 %3294 }
 0x4e7   : > { %6344 = vmatmul.msk.bf16.gmra.mxu2 %vm2487_vm3, %v3725_v33  ;;  %v3040_v33 = vunpack.c.h.bf16 %v9705_v45 }
 0x4e9   : > { %v3360_v56 = vsel %vm799_vm0, %v3040_v33, %v7104_v46  ;;  %v3297_v33 = vpop.permute.xlu2 %3296 }
 0x4ea   : > { %v9795_v28 = vsel %vm868_vm1, %v3360_v56, %v3287_v62 }
 0x4eb   : > { %v3428_v15 = vmul.f32 %v9517_v29, %v9795_v28  ;;  %v3730_v6 = vpack.c.bf16 %v9784_v26, %v9795_v28 }
 0x4ed   : > { %v3464_v1 = vadd.f32 %v9524_v11, %v3428_v15  ;;  %v3301_v47 = vpop.permute.xlu1 %3300 }
 0x4ef   : > { %v3496_v42 = vmax.f32 %v3464_v1, 0.0 }
 0x4f5   : > { %6318 = vmatmul.msk.bf16.gmra.mxu3 %vm2487_vm3, %v3514_v27 }
 0x4f7   : > { %6345 = vmatmul.msk.bf16.gmra.mxu2 %vm2487_vm3, %v3726_v38  ;;  %v3497_v38 = vmax.f32 %v3465_v49, 0.0 }
 0x4f9   : > { %v3517_v19 = vpack.c.bf16 %v3497_v38, %v3496_v42 }
 0x505   : > { %6319 = vmatmul.msk.bf16.gmra.mxu3 %vm2487_vm3, %v3515_v8  ;;  %v7126_v8 = vpack.i.bf16 %v4022_v25, %v4021_v54 }
 0x507   : > { %6346 = vmatmul.msk.bf16.gmra.mxu2 %vm2487_vm3, %v3727_v23  ;;  %7127 = vrot.lane.b32.xlu1 %v7126_v8, %s7796_s24  ;;  %v3467_v23 = vadd.f32 %v9524_v11, %v3431_v9 }
 0x509   : > { %v3607_v5 = vpop.f32.mrf.mxu1  ;;  %v3499_v20 = vmax.f32 %v3467_v23, 0.0  ;;  %v9865_v46 = vpop.f32.mrf.mxu2 }
 0x50a   : > { %v3608_v31 = vadd.f32 %v9740_v43, %v3607_v5  ;;  %10953 = vst [vmem:[#allocation5_spill] sm:$0xff] %v9865_v46 }
 0x50c   : > { %v3687_v0 = vmax.f32 %v3608_v31, 0.0  ;;  %v570_v31 = vld [vmem:[%s7946_s20 + $0x6c] sm:$0xff]  }
 0x50d   : > { %v3045_v44 = vunpack.c.l.bf16 %v570_v31  ;;  %v3046_v59 = vunpack.c.h.bf16 %v570_v31 }
 0x50e   : > { %3957 = vst.msk [vmem:[#allocation3 + $0x19] sm:$0xff] %vm3900_vm8, %v3687_v0  ;;  %v3044_v0 = vunpack.c.l.bf16 %v569_v34 }
 0x50f   : > { %v3365_v21 = vsel %vm799_vm0, %v3045_v44, %v7115_v40 }
 0x510   : > { %v3364_v36 = vsel %vm799_vm0, %v3044_v0, %v7114_v51  ;;  %v9877_v56 = vsel %vm868_vm1, %v3365_v21, %v3297_v33  ;;  %v7125_v33 = vunpack.i.h.bf16 %v9527_v3 }
 0x511   : > { %v3609_v14 = vpop.f32.mrf.mxu1  ;;  %v9870_v62 = vsel %vm868_vm1, %v3364_v36, %v3295_v37  ;;  %v3433_v26 = vmul.f32 %v9517_v29, %v9877_v56  ;;  %v9888_v1 = vpop.f32.mrf.mxu2 }
 0x512   : > { %v3610_v10 = vadd.f32 %v9740_v43, %v3609_v14  ;;  %v3432_v15 = vmul.f32 %v9517_v29, %v9870_v62  ;;  %10954 = vst [vmem:[#allocation6_spill] sm:$0xff] %v9888_v1 }
 0x513   : > { %v3469_v38 = vadd.f32 %v9524_v11, %v3433_v26 }
 0x514   : > { %v3688_v53 = vmax.f32 %v3610_v10, 0.0  ;;  %v3518_v10 = vpack.c.bf16 %v3499_v20, %v3498_v12  ;;  %v3468_v32 = vadd.f32 %v9524_v11, %v3432_v15  ;;  %v3303_v15 = vpop.permute.xlu2 %3302 }
 0x515   : > { %6320 = vmatmul.msk.bf16.gmra.mxu3 %vm2487_vm3, %v3516_v52 }
 0x516   : > { %3958 = vst.msk [vmem:[#allocation3 + $0x21] sm:$0xff] %vm3900_vm8, %v3688_v53  ;;  %v4053_v53 = vld [vmem:[#allocation3 + $0x2] sm:$0xff]  ;;  %v3500_v42 = vmax.f32 %v3468_v32, 0.0 }
 0x517   : > { %6347 = vmatmul.msk.bf16.gmra.mxu2 %vm2487_vm3, %v3728_v22  ;;  %v4054_v22 = vld [vmem:[#allocation3 + $0xa] sm:$0xff] }
 0x518   : > { %v7131_v4 = vpack.i.bf16 %v4054_v22, %v4053_v53  ;;  %v3305_v22 = vpop.permute.xlu0 %3304 }
 0x519   : > { %v3612_v13 = vpop.f32.mrf.mxu1 }
 0x51a   : > { %v3613_v27 = vadd.f32 %v9740_v43, %v3612_v13  ;;  %7132 = vrot.lane.b32.xlu2 %v7131_v4, %s7788_s27 }
 0x51c   : > { %v3689_v50 = vmax.f32 %v3613_v27, 0.0 }
 0x51e   : > { %3959 = vst.msk [vmem:[#allocation3 + $0x31] sm:$0xff] %vm3900_vm8, %v3689_v50 }
 0x521   : > { %v3614_v35 = vpop.f32.mrf.mxu1 }
 0x522   : > { %v3615_v45 = vadd.f32 %v9740_v43, %v3614_v35  ;;  %v7119_v35 = vunpack.i.l.bf16 %v9511_v60  ;;  %v3731_v60 = vpack.c.bf16 %v9838_v48, %v9848_v7 }
 0x524   : > { %v3690_v63 = vmax.f32 %v3615_v45, 0.0  ;;  %v3501_v45 = vmax.f32 %v3469_v38, 0.0  ;;  %v3366_v57 = vsel %vm799_vm0, %v3046_v59, %v7119_v35 }
 0x525   : > { %6321 = vmatmul.msk.bf16.gmra.mxu3 %vm2487_vm3, %v3517_v19 }
 0x526   : > { %3960 = vst.msk [vmem:[#allocation3 + $0x39] sm:$0xff] %vm3900_vm8, %v3690_v63  ;;  %v3519_v25 = vpack.c.bf16 %v3501_v45, %v3500_v42 }
 0x527   : > { %6348 = vmatmul.msk.bf16.gmra.mxu2 %vm2487_vm3, %v3729_v55  ;;  %v3367_v55 = vsel %vm799_vm0, %v3047_v16, %v7120_v41 }
 0x528   : > { %v9901_v8 = vsel %vm868_vm1, %v3367_v55, %v3301_v47 }
 0x529   : > { %v3435_v34 = vmul.f32 %v9517_v29, %v9901_v8 }
 0x52a   : > { %v3617_v2 = vpop.f32.mrf.mxu1 }
 0x52b   : > { %v3618_v30 = vadd.f32 %v9740_v43, %v3617_v2  ;;  %v9906_v2 = vpop.f32.mrf.mxu2  ;;  %v3471_v31 = vadd.f32 %v9524_v11, %v3435_v34 }
 0x52c   : > { %10955 = vst [vmem:[#allocation4_spill] sm:$0xff] %v9906_v2 }
 0x52d   : > { %v3691_v5 = vmax.f32 %v3618_v30, 0.0  ;;  %v9911_v30 = vsel %vm868_vm1, %v3366_v57, %v3299_v17 }
 0x52e   : > { %v3434_v7 = vmul.f32 %v9517_v29, %v9911_v30 }
 0x52f   : > { %3961 = vst.msk [vmem:[#allocation3 + $0x49] sm:$0xff] %vm3900_vm8, %v3691_v5  ;;  %v573_v5 = vld [vmem:[%s7946_s20 + $0x78] sm:$0xff]   ;;  %s7799_s20 = smov 56  }
 0x530   : > { %v3470_v44 = vadd.f32 %v9524_v11, %v3434_v7  ;;  %v3049_v36 = vunpack.c.h.bf16 %v573_v5 }
 0x532   : > { %v3619_v58 = vpop.f32.mrf.mxu1  ;;  %v3502_v53 = vmax.f32 %v3470_v44, 0.0 }
 0x533   : > { %v3620_v14 = vadd.f32 %v9740_v43, %v3619_v58 }
 0x535   : > { %v3692_v52 = vmax.f32 %v3620_v14, 0.0  ;;  %6322 = vmatmul.msk.bf16.gmra.mxu3 %vm2487_vm3, %v3518_v10  ;;  %v3503_v14 = vmax.f32 %v3471_v31, 0.0  ;;  %v9929_v10 = vpop.f32.mrf.mxu2 }
 0x536   : > { %10956 = vst [vmem:[#allocation7_spill] sm:$0xff] %v9929_v10 }
 0x537   : > { %3962 = vst.msk [vmem:[#allocation3 + $0x51] sm:$0xff] %vm3900_vm8, %v3692_v52  ;;  %6349 = vmatmul.msk.bf16.gmra.mxu2 %vm2487_vm3, %v3730_v6  ;;  %v7124_v6 = vunpack.i.l.bf16 %v9527_v3  ;;  %v3048_v52 = vunpack.c.l.bf16 %v573_v5 }
 0x538   : > { %v3627_v13 = vpop.f32.mrf.mxu3 }
 0x539   : > { %v3628_v28 = vadd.f32 %v9740_v43, %v3627_v13  ;;  %v3369_v13 = vsel %vm799_vm0, %v3049_v36, %v7125_v33  ;;  %v3368_v32 = vsel %vm799_vm0, %v3048_v52, %v7124_v6 }
 0x53a   : > { %v3622_v49 = vpop.f32.mrf.mxu1  ;;  %v3400_v3 = vsel %vm868_vm1, %v3368_v32, %v3303_v15 }
 0x53b   : > { %v3695_v27 = vmax.f32 %v3628_v28, 0.0  ;;  %v3623_v18 = vadd.f32 %v9740_v43, %v3622_v49  ;;  %v3520_v28 = vpack.c.bf16 %v3503_v14, %v3502_v53  ;;  %v3401_v49 = vsel %vm868_vm1, %v3369_v13, %v3305_v22 }
 0x53c   : > { %v3436_v38 = vmul.f32 %v9517_v29, %v3400_v3 }
 0x53d   : > { %3965 = vst.msk [vmem:[#allocation3 + $0x79] sm:$0xff] %vm3900_vm8, %v3695_v27  ;;  %v3693_v24 = vmax.f32 %v3623_v18, 0.0  ;;  %v3732_v27 = vpack.c.bf16 %v9877_v56, %v9870_v62  ;;  %v3437_v18 = vmul.f32 %v9517_v29, %v3401_v49 }
 0x53e   : > { %v3472_v45 = vadd.f32 %v9524_v11, %v3436_v38 }
 0x53f   : > { %3963 = vst.msk [vmem:[#allocation3 + $0x61] sm:$0xff] %vm3900_vm8, %v3693_v24  ;;  %v9948_v24 = vpop.f32.mrf.mxu2  ;;  %v3473_v42 = vadd.f32 %v9524_v11, %v3437_v18  ;;  %v3733_v11 = vpack.c.bf16 %v9901_v8, %v9911_v30 }
 0x540   : > { %v3629_v50 = vpop.f32.mrf.mxu3  ;;  %10957 = vst [vmem:[#allocation8_spill] sm:$0xff] %v9948_v24 }
 0x541   : > { %v3630_v19 = vadd.f32 %v9740_v43, %v3629_v50 }
 0x542   : > { %v3624_v63 = vpop.f32.mrf.mxu1 }
 0x543   : > { %v3696_v9 = vmax.f32 %v3630_v19, 0.0  ;;  %v3625_v54 = vadd.f32 %v9740_v43, %v3624_v63  ;;  %v3505_v19 = vmax.f32 %v3473_v42, 0.0  ;;  %v3504_v63 = vmax.f32 %v3472_v45, 0.0 }
 0x544   : > { %v4031_v20 = vld [vmem:[#allocation3 + $0x79] sm:$0xff] }
 0x545   : > { %3966 = vst.msk [vmem:[#allocation3 + $0x81] sm:$0xff] %vm3900_vm8, %v3696_v9  ;;  %v3694_v23 = vmax.f32 %v3625_v54, 0.0  ;;  %6323 = vmatmul.msk.bf16.gmra.mxu3 %vm2487_vm3, %v3519_v25  ;;  %v3521_v54 = vpack.c.bf16 %v3505_v19, %v3504_v63 }
 0x547   : > { %3964 = vst.msk [vmem:[#allocation3 + $0x69] sm:$0xff] %vm3900_vm8, %v3694_v23  ;;  %6350 = vmatmul.msk.bf16.gmra.mxu2 %vm2487_vm3, %v3731_v60  ;;  %v9960_v55 = vpop.f32.mrf.mxu2 }
 0x548   : > { %v3632_v48 = vpop.f32.mrf.mxu3  ;;  %10958 = vst [vmem:[#allocation9_spill] sm:$0xff] %v9960_v55 }
 0x549   : > { %v3633_v61 = vadd.f32 %v9740_v43, %v3632_v48 }
 0x54b   : > { %v3697_v51 = vmax.f32 %v3633_v61, 0.0 }
 0x54c   : > { %v4063_v0 = vld [vmem:[#allocation3 + $0x7a] sm:$0xff]  ;;  %v4064_v40 = vld [vmem:[#allocation3 + $0x82] sm:$0xff] }
 0x54d   : > { %v4032_v12 = vld [vmem:[#allocation3 + $0x81] sm:$0xff]  ;;  %3967 = vst.msk [vmem:[#allocation3 + $0x91] sm:$0xff] %vm3900_vm8, %v3697_v51  ;;  %v9924_v37 = vpack.i.bf16 %v4064_v40, %v4063_v0 }
 0x54e   : > { %v9926_v58 = vpack.i.bf16 %v4032_v12, %v4031_v20  ;;  %v3734_v20 = vpack.c.bf16 %v3401_v49, %v3400_v3 }
 0x54f   : > { %7142 = vrot.lane.b32.xlu1 %v9924_v37, %s7788_s27  ;;  %v9968_v61 = vpop.f32.mrf.mxu2 }
 0x550   : > { %7137 = vrot.lane.b32.xlu0 %v9926_v58, %s7796_s24  ;;  %v3634_v21 = vpop.f32.mrf.mxu3  ;;  %10959 = vst [vmem:[#allocation10_spill] sm:$0xff] %v9968_v61 }
 0x551   : > { %v3635_v4 = vadd.f32 %v9740_v43, %v3634_v21 }
 0x553   : > { %v3698_v26 = vmax.f32 %v3635_v4, 0.0 }
 0x554   : > { %v4033_v56 = vld [vmem:[#allocation3 + $0x91] sm:$0xff] }
 0x555   : > { %3968 = vst.msk [vmem:[#allocation3 + $0x99] sm:$0xff] %vm3900_vm8, %v3698_v26  ;;  %6324 = vmatmul.msk.bf16.gmra.mxu3 %vm2487_vm3, %v3520_v28 }
 0x557   : > { %6351 = vmatmul.msk.bf16.gmra.mxu2 %vm2487_vm3, %v3732_v27  ;;  %v9978_v0 = vpop.f32.mrf.mxu2 }
 0x558   : > { %v3637_v39 = vpop.f32.mrf.mxu3  ;;  %10960 = vst [vmem:[#allocation11_spill] sm:$0xff] %v9978_v0 }
 0x559   : > { %v3638_v41 = vadd.f32 %v9740_v43, %v3637_v39 }
 0x55b   : > { %v3699_v62 = vmax.f32 %v3638_v41, 0.0 }
 0x55c   : > { %v4065_v16 = vld [vmem:[#allocation3 + $0x92] sm:$0xff]  ;;  %v4066_v50 = vld [vmem:[#allocation3 + $0x9a] sm:$0xff] }
 0x55d   : > { %v4034_v35 = vld [vmem:[#allocation3 + $0x99] sm:$0xff]  ;;  %3969 = vst.msk [vmem:[#allocation3 + $0xa9] sm:$0xff] %vm3900_vm8, %v3699_v62  ;;  %v7151_v59 = vpack.i.bf16 %v4066_v50, %v4065_v16 }
 0x55e   : > { %v9954_v47 = vpack.i.bf16 %v4034_v35, %v4033_v56 }
 0x55f   : > { %7152 = vrot.lane.b32.xlu2 %v7151_v59, %s7788_s27 }
 0x560   : > { %7147 = vrot.lane.b32.xlu1 %v9954_v47, %s7796_s24  ;;  %v3639_v29 = vpop.f32.mrf.mxu3 }
 0x561   : > { %v3640_v17 = vadd.f32 %v9740_v43, %v3639_v29 }
 0x563   : > { %v3700_v9 = vmax.f32 %v3640_v17, 0.0 }
 0x564   : > { %v4035_v23 = vld [vmem:[#allocation3 + $0xa9] sm:$0xff] }
 0x565   : > { %3970 = vst.msk [vmem:[#allocation3 + $0xb1] sm:$0xff] %vm3900_vm8, %v3700_v9  ;;  %6325 = vmatmul.msk.bf16.gmra.mxu3 %vm2487_vm3, %v3521_v54 }
 0x567   : > { %6352 = vmatmul.msk.bf16.gmra.mxu2 %vm2487_vm3, %v3733_v11 }
 0x568   : > { %v3642_v25 = vpop.f32.mrf.mxu3 }
 0x569   : > { %v3643_v60 = vadd.f32 %v9740_v43, %v3642_v25 }
 0x56b   : > { %v3701_v57 = vmax.f32 %v3643_v60, 0.0 }
 0x56c   : > { %v4067_v34 = vld [vmem:[#allocation3 + $0xaa] sm:$0xff]  ;;  %v4068_v48 = vld [vmem:[#allocation3 + $0xb2] sm:$0xff] }
 0x56d   : > { %v4036_v7 = vld [vmem:[#allocation3 + $0xb1] sm:$0xff]  ;;  %3971 = vst.msk [vmem:[#allocation3 + $0xc1] sm:$0xff] %vm3900_vm8, %v3701_v57  ;;  %v7161_v5 = vpack.i.bf16 %v4068_v48, %v4067_v34 }
 0x56e   : > { %v9971_v8 = vpack.i.bf16 %v4036_v7, %v4035_v23  ;;  %v5585_v7 = vld [vmem:[%s10931_s12 + $0x20] sm:$0xf] }
 0x56f   : > { %7162 = vrot.lane.b32.xlu0 %v7161_v5, %s7788_s27  ;;  %v5607_v5 = vunpack.c.l.b16 %v5585_v7 }
 0x570   : > { %7157 = vrot.lane.b32.xlu2 %v9971_v8, %s7796_s24  ;;  %v3644_v30 = vpop.f32.mrf.mxu3 }
 0x571   : > { %v3645_v31 = vadd.f32 %v9740_v43, %v3644_v30 }
 0x573   : > { %v3702_v51 = vmax.f32 %v3645_v31, 0.0  ;;  %v5612_v31 = vpack.c.b16 %v5607_v5, %v5607_v5  ;;  %v10041_v5 = vld [vmem:[#allocation3 + $0x90] sm:$0xff] }
 0x574   : > { %v4037_v33 = vld [vmem:[#allocation3 + $0xc1] sm:$0xff] }
 0x575   : > { %3972 = vst.msk [vmem:[#allocation3 + $0xc9] sm:$0xff] %vm3900_vm8, %v3702_v51 }
 0x577   : > { %6353 = vmatmul.msk.bf16.gmra.mxu2 %vm2487_vm3, %v3734_v20  ;;  %v5668_v20 = vsel %vm5666_vm10, %v5612_v31, 0 }
 0x578   : > { %v3647_v40 = vpop.f32.mrf.mxu3  ;;  %5673 = vmatpush.bf16.msrb.mxu0 %v5668_v20 }
 0x579   : > { %v3648_v12 = vadd.f32 %v9740_v43, %v3647_v40 }
 0x57b   : > { %v3703_v44 = vmax.f32 %v3648_v12, 0.0  ;;  %v10009_v12 = vpop.permute.xlu1 %7127 }
 0x57c   : > { %v4069_v36 = vld [vmem:[#allocation3 + $0xc2] sm:$0xff]  ;;  %v4070_v14 = vld [vmem:[#allocation3 + $0xca] sm:$0xff] }
 0x57d   : > { %v4038_v21 = vld [vmem:[#allocation3 + $0xc9] sm:$0xff]  ;;  %3973 = vst.msk [vmem:[#allocation3 + $0xd9] sm:$0xff] %vm3900_vm8, %v3703_v44  ;;  %v7171_v6 = vpack.i.bf16 %v4070_v14, %v4069_v36 }
 0x57e   : > { %v7166_v52 = vpack.i.bf16 %v4038_v21, %v4037_v33 }
 0x57f   : > { %7172 = vrot.lane.b32.xlu1 %v7171_v6, %s7788_s27 }
 0x580   : > { %7167 = vrot.lane.b32.xlu0 %v7166_v52, %s7796_s24  ;;  %v3649_v53 = vpop.f32.mrf.mxu3 }
 0x581   : > { %v3650_v22 = vadd.f32 %v9740_v43, %v3649_v53 }
 0x583   : > { %v3704_v4 = vmax.f32 %v3650_v22, 0.0 }
 0x584   : > { %v4039_v28 = vld [vmem:[#allocation3 + $0xd9] sm:$0xff] }
 0x585   : > { %3974 = vst.msk [vmem:[#allocation3 + $0xe1] sm:$0xff] %vm3900_vm8, %v3704_v4 }
 0x588   : > { %v3652_v15 = vpop.f32.mrf.mxu3 }
 0x589   : > { %v3653_v13 = vadd.f32 %v9740_v43, %v3652_v15 }
 0x58b   : > { %v3705_v26 = vmax.f32 %v3653_v13, 0.0 }
 0x58c   : > { %v4071_v49 = vld [vmem:[#allocation3 + $0xda] sm:$0xff]  ;;  %v4072_v32 = vld [vmem:[#allocation3 + $0xe2] sm:$0xff] }
 0x58d   : > { %v4040_v27 = vld [vmem:[#allocation3 + $0xe1] sm:$0xff]  ;;  %3975 = vst.msk [vmem:[#allocation3 + $0xf1] sm:$0xff] %vm3900_vm8, %v3705_v26  ;;  %v7181_v3 = vpack.i.bf16 %v4072_v32, %v4071_v49 }
 0x58e   : > { %v7176_v18 = vpack.i.bf16 %v4040_v27, %v4039_v28 }
 0x58f   : > { %7182 = vrot.lane.b32.xlu2 %v7181_v3, %s7788_s27 }
 0x590   : > { %7177 = vrot.lane.b32.xlu1 %v7176_v18, %s7796_s24  ;;  %v3654_v39 = vpop.f32.mrf.mxu3  ;;  %v10016_v18 = vld [vmem:[#allocation3 + $0x78] sm:$0xff] }
 0x591   : > { %v3655_v38 = vadd.f32 %v9740_v43, %v3654_v39  ;;  %v10018_v39 = vld [vmem:[#allocation3 + $0x80] sm:$0xff] }
 0x593   : > { %v3706_v41 = vmax.f32 %v3655_v38, 0.0 }
 0x594   : > { %v4041_v16 = vld [vmem:[#allocation3 + $0xf1] sm:$0xff] }
 0x595   : > { %3976 = vst.msk [vmem:[#allocation3 + $0xf9] sm:$0xff] %vm3900_vm8, %v3706_v41 }
 0x598   : > { %v3657_v42 = vpop.f32.mrf.mxu3 }
 0x599   : > { %v3658_v62 = vadd.f32 %v9740_v43, %v3657_v42 }
 0x59b   : > { %v3707_v56 = vmax.f32 %v3658_v62, 0.0 }
 0x59c   : > { %v4073_v50 = vld [vmem:[#allocation3 + $0xf2] sm:$0xff]  ;;  %v4074_v35 = vld [vmem:[#allocation3 + $0xfa] sm:$0xff] }
 0x59d   : > { %v4042_v45 = vld [vmem:[#allocation3 + $0xf9] sm:$0xff]  ;;  %3977 = vst.msk [vmem:[#allocation3 + $0x109] sm:$0xff] %vm3900_vm8, %v3707_v56  ;;  %v7191_v59 = vpack.i.bf16 %v4074_v35, %v4073_v50  ;;  %v10031_v56 = vpop.permute.xlu2 %7132 }
 0x59e   : > { %v7186_v19 = vpack.i.bf16 %v4042_v45, %v4041_v16 }
 0x59f   : > { %7192 = vrot.lane.b32.xlu0 %v7191_v59, %s7788_s27 }
 0x5a0   : > { %7187 = vrot.lane.b32.xlu2 %v7186_v19, %s7796_s24  ;;  %v3659_v29 = vpop.f32.mrf.mxu3 }
 0x5a1   : > { %v3660_v63 = vadd.f32 %v9740_v43, %v3659_v29 }
 0x5a3   : > { %v3708_v17 = vmax.f32 %v3660_v63, 0.0 }
 0x5a4   : > { %v4043_v25 = vld [vmem:[#allocation3 + $0x109] sm:$0xff] }
 0x5a5   : > { %3978 = vst.msk [vmem:[#allocation3 + $0x111] sm:$0xff] %vm3900_vm8, %v3708_v17 }
 0x5a8   : > { %v3662_v9 = vpop.f32.mrf.mxu3 }
 0x5a9   : > { %v3663_v54 = vadd.f32 %v9740_v43, %v3662_v9  ;;  %v6459_v9 = vld [vmem:[%s10931_s12 + $0x18] sm:$0xff] }
 0x5aa   : > { %5674 = vmatpush.bf16.msrb.mxu0 %v6459_v9 }
 0x5ab   : > { %v3709_v11 = vmax.f32 %v3663_v54, 0.0 }
 0x5ac   : > { %v4075_v60 = vld [vmem:[#allocation3 + $0x10a] sm:$0xff]  ;;  %v4076_v57 = vld [vmem:[#allocation3 + $0x112] sm:$0xff] }
 0x5ad   : > { %v4044_v23 = vld [vmem:[#allocation3 + $0x111] sm:$0xff]  ;;  %3979 = vst.msk [vmem:[#allocation3 + $0x121] sm:$0xff] %vm3900_vm8, %v3709_v11  ;;  %v7201_v34 = vpack.i.bf16 %v4076_v57, %v4075_v60 }
 0x5ae   : > { %v7196_v48 = vpack.i.bf16 %v4044_v23, %v4043_v25 }
 0x5af   : > { %7202 = vrot.lane.b32.xlu1 %v7201_v34, %s7788_s27 }
 0x5b0   : > { %7197 = vrot.lane.b32.xlu0 %v7196_v48, %s7796_s24  ;;  %v3664_v30 = vpop.f32.mrf.mxu3 }
 0x5b1   : > { %v3665_v51 = vadd.f32 %v9740_v43, %v3664_v30  ;;  %v10043_v30 = vld [vmem:[#allocation3 + $0x98] sm:$0xff] }
 0x5b3   : > { %v3710_v40 = vmax.f32 %v3665_v51, 0.0 }
 0x5b4   : > { %v4045_v14 = vld [vmem:[#allocation3 + $0x121] sm:$0xff] }
 0x5b5   : > { %3980 = vst.msk [vmem:[#allocation3 + $0x129] sm:$0xff] %vm3900_vm8, %v3710_v40 }
 0x5b8   : > { %v3667_v44 = vpop.f32.mrf.mxu3 }
 0x5b9   : > { %v3668_v33 = vadd.f32 %v9740_v43, %v3667_v44  ;;  %v7153_v54 = vpop.permute.xlu2 %7152 }
 0x5ba   : > { %v7155_v34 = vunpack.i.h.bf16 %v7153_v54  ;;  %v7154_v48 = vunpack.i.l.bf16 %v7153_v54 }
 0x5bb   : > { %v3711_v36 = vmax.f32 %v3668_v33, 0.0 }
 0x5bc   : > { %v4077_v21 = vld [vmem:[#allocation3 + $0x122] sm:$0xff]  ;;  %v4078_v6 = vld [vmem:[#allocation3 + $0x12a] sm:$0xff] }
 0x5bd   : > { %v4046_v52 = vld [vmem:[#allocation3 + $0x129] sm:$0xff]  ;;  %3981 = vst.msk [vmem:[#allocation3 + $0x139] sm:$0xff] %vm3900_vm8, %v3711_v36  ;;  %v7211_v53 = vpack.i.bf16 %v4078_v6, %v4077_v21 }
 0x5be   : > { %v7206_v22 = vpack.i.bf16 %v4046_v52, %v4045_v14 }
 0x5bf   : > { %7212 = vrot.lane.b32.xlu2 %v7211_v53, %s7788_s27 }
 0x5c0   : > { %7207 = vrot.lane.b32.xlu1 %v7206_v22, %s7796_s24  ;;  %v3669_v4 = vpop.f32.mrf.mxu3 }
 0x5c1   : > { %v3670_v15 = vadd.f32 %v9740_v43, %v3669_v4  ;;  %v7143_v26 = vpop.permute.xlu1 %7142 }
 0x5c2   : > { %v7138_v13 = vpop.permute.xlu0 %7137  ;;  %v7145_v32 = vunpack.i.h.bf16 %v7143_v26  ;;  %v7144_v27 = vunpack.i.l.bf16 %v7143_v26 }
 0x5c3   : > { %v7140_v28 = vunpack.i.h.bf16 %v7138_v13  ;;  %v7139_v49 = vunpack.i.l.bf16 %v7138_v13  ;;  %v3712_v3 = vmax.f32 %v3670_v15, 0.0 }
 0x5c4   : > { %v4047_v45 = vld [vmem:[#allocation3 + $0x139] sm:$0xff] }
 0x5c5   : > { %v5312_v38 = vsel %vm3900_vm8, %v10016_v18, %v7139_v49  ;;  %v5313_v41 = vsel %vm3900_vm8, %v10018_v39, %v7140_v28  ;;  %3982 = vst.msk [vmem:[#allocation3 + $0x141] sm:$0xff] %vm3900_vm8, %v3712_v3  ;;  %v10063_v3 = vld [vmem:[#allocation3 + $0xb0] sm:$0xff] }
 0x5c6   : > { %v10026_v42 = vsel %vm799_vm0, %v5313_v41, %v7145_v32  ;;  %v10029_v62 = vsel %vm799_vm0, %v5312_v38, %v7144_v27  ;;  %v4055_v32 = vld [vmem:[#allocation3 + $0x1a] sm:$0xff]  ;;  %v10061_v27 = vld [vmem:[#allocation3 + $0xa8] sm:$0xff] }
 0x5c7   : > { %v7451_v24 = vpack.i.bf16 %v10063_v3, %v10061_v27 }
 0x5c8   : > { %v3672_v16 = vpop.f32.mrf.mxu3 }
 0x5c9   : > { %v3673_v50 = vadd.f32 %v9740_v43, %v3672_v16  ;;  %v4056_v16 = vld [vmem:[#allocation3 + $0x22] sm:$0xff] }
 0x5ca   : > { %v7158_v21 = vpop.permute.xlu2 %7157 }
 0x5cb   : > { %v3713_v35 = vmax.f32 %v3673_v50, 0.0  ;;  %v7160_v15 = vunpack.i.h.bf16 %v7158_v21  ;;  %v7159_v13 = vunpack.i.l.bf16 %v7158_v21 }
 0x5cc   : > { %v4079_v59 = vld [vmem:[#allocation3 + $0x13a] sm:$0xff]  ;;  %v4080_v19 = vld [vmem:[#allocation3 + $0x142] sm:$0xff] }
 0x5cd   : > { %v4048_v29 = vld [vmem:[#allocation3 + $0x141] sm:$0xff]  ;;  %3983 = vst.msk [vmem:[#allocation3 + $0x151] sm:$0xff] %vm3900_vm8, %v3713_v35  ;;  %v7221_v63 = vpack.i.bf16 %v4080_v19, %v4079_v59  ;;  %v5317_v50 = vsel %vm3900_vm8, %v10063_v3, %v7160_v15  ;;  %v5316_v35 = vsel %vm3900_vm8, %v10061_v27, %v7159_v13  ;;  %v4026_v15 = vld [vmem:[#allocation3 + $0x39] sm:$0xff] }
 0x5ce   : > { %v7216_v17 = vpack.i.bf16 %v4048_v29, %v4047_v45  ;;  %v7251_v29 = vpack.i.bf16 %v4056_v16, %v4055_v32 }
 0x5cf   : > { %7222 = vrot.lane.b32.xlu0 %v7221_v63, %s7788_s27 }
 0x5d0   : > { %7217 = vrot.lane.b32.xlu2 %v7216_v17, %s7796_s24  ;;  %v3674_v11 = vpop.f32.mrf.mxu3 }
 0x5d1   : > { %v3675_v25 = vadd.f32 %v9740_v43, %v3674_v11  ;;  %v10078_v11 = vld [vmem:[#allocation3 + $0x20] sm:$0xff] }
 0x5d2   : > { %v7148_v60 = vpop.permute.xlu1 %7147 }
 0x5d3   : > { %v7150_v57 = vunpack.i.h.bf16 %v7148_v60  ;;  %v7149_v23 = vunpack.i.l.bf16 %v7148_v60  ;;  %v3714_v7 = vmax.f32 %v3675_v25, 0.0 }
 0x5d4   : > { %v4049_v14 = vld [vmem:[#allocation3 + $0x151] sm:$0xff] }
 0x5d5   : > { %v5315_v31 = vsel %vm3900_vm8, %v10043_v30, %v7150_v57  ;;  %v5314_v51 = vsel %vm3900_vm8, %v10041_v5, %v7149_v23  ;;  %3984 = vst.msk [vmem:[#allocation3 + $0x159] sm:$0xff] %vm3900_vm8, %v3714_v7  ;;  %v10263_v55 = vld [vmem:[#allocation3 + $0x150] sm:$0xff] }
 0x5d6   : > { %v10051_v20 = vsel %vm799_vm0, %v5314_v51, %v7154_v48  ;;  %v10054_v40 = vsel %vm799_vm0, %v5315_v31, %v7155_v34  ;;  %v10081_v48 = vld [vmem:[#allocation3 + $0x18] sm:$0xff] }
 0x5d7   : > { %v7256_v7 = vpack.i.bf16 %v10078_v11, %v10081_v48 }
 0x5d8   : > { %v3677_v44 = vpop.f32.mrf.mxu3 }
 0x5d9   : > { %v3678_v33 = vadd.f32 %v9740_v43, %v3677_v44 }
 0x5db   : > { %v3715_v36 = vmax.f32 %v3678_v33, 0.0 }
 0x5dc   : > { %v4081_v6 = vld [vmem:[#allocation3 + $0x152] sm:$0xff]  ;;  %v4082_v52 = vld [vmem:[#allocation3 + $0x15a] sm:$0xff] }
 0x5dd   : > { %v4050_v53 = vld [vmem:[#allocation3 + $0x159] sm:$0xff]  ;;  %3985 = vst.msk [vmem:[#allocation3 + $0x169] sm:$0xff] %vm3900_vm8, %v3715_v36  ;;  %v7231_v22 = vpack.i.bf16 %v4082_v52, %v4081_v6  ;;  %v4118_v52 = vld [vmem:[#allocation3 + $0x21] sm:$0xff] }
 0x5de   : > { %v7226_v4 = vpack.i.bf16 %v4050_v53, %v4049_v14 }
 0x5df   : > { %7232 = vrot.lane.b32.xlu1 %v7231_v22, %s7788_s27  ;;  %v10089_v22 = vld [vmem:[#allocation3 + $0xc0] sm:$0xff] }
 0x5e0   : > { %7227 = vrot.lane.b32.xlu0 %v7226_v4, %s7796_s24  ;;  %v3679_v26 = vpop.f32.mrf.mxu3  ;;  %v10091_v4 = vld [vmem:[#allocation3 + $0xc8] sm:$0xff] }
 0x5e1   : > { %v3680_v28 = vadd.f32 %v9740_v43, %v3679_v26  ;;  %v7163_v49 = vpop.permute.xlu0 %7162 }
 0x5e2   : > { %v7165_v38 = vunpack.i.h.bf16 %v7163_v49  ;;  %v7164_v41 = vunpack.i.l.bf16 %v7163_v49 }
 0x5e3   : > { %v3716_v45 = vmax.f32 %v3680_v28, 0.0  ;;  %v6458_v28 = vld [vmem:[%s10931_s12 + $0x10] sm:$0xff] }
 0x5e4   : > { %v10070_v59 = vsel %vm799_vm0, %v5316_v35, %v7164_v41  ;;  %v10073_v19 = vsel %vm799_vm0, %v5317_v50, %v7165_v38  ;;  %v4051_v54 = vld [vmem:[#allocation3 + $0x169] sm:$0xff]  ;;  %v4025_v41 = vld [vmem:[#allocation3 + $0x31] sm:$0xff]  ;;  %5675 = vmatpush.bf16.msrb.mxu0 %v6458_v28  ;;  %v4058_v35 = vld [vmem:[#allocation3 + $0x3a] sm:$0xff] }
 0x5e5   : > { %3986 = vst.msk [vmem:[#allocation3 + $0x171] sm:$0xff] %vm3900_vm8, %v3716_v45  ;;  %v7271_v16 = vpack.i.bf16 %v4026_v15, %v4025_v41  ;;  %v4057_v50 = vld [vmem:[#allocation3 + $0x32] sm:$0xff]  ;;  %v10150_v28 = vld [vmem:[#allocation3 + $0x48] sm:$0xff] }
 0x5e6   : > { %v10110_v45 = vld [vmem:[#allocation3 + $0x38] sm:$0xff]  ;;  %v10293_v2 = vld [vmem:[#allocation3 + $0x168] sm:$0xff] }
 0x5e8   : > { %7252 = vrot.lane.b32.xlu0 %v7251_v29, %s7788_s27  ;;  %v3682_v63 = vpop.f32.mrf.mxu3 }
 0x5e9   : > { %v3683_v17 = vadd.f32 %v9740_v43, %v3682_v63  ;;  %v7276_v63 = vpack.i.bf16 %v4058_v35, %v4057_v50 }
 0x5eb   : > { %v3717_v9 = vmax.f32 %v3683_v17, 0.0  ;;  %v10112_v17 = vld [vmem:[#allocation3 + $0x30] sm:$0xff] }
 0x5ec   : > { %v4083_v25 = vld [vmem:[#allocation3 + $0x16a] sm:$0xff]  ;;  %v4084_v60 = vld [vmem:[#allocation3 + $0x172] sm:$0xff] }
 0x5ed   : > { %v4052_v57 = vld [vmem:[#allocation3 + $0x171] sm:$0xff]  ;;  %3987 = vst.msk [vmem:[#allocation3 + $0x181] sm:$0xff] %vm3900_vm8, %v3717_v9  ;;  %v7241_v23 = vpack.i.bf16 %v4084_v60, %v4083_v25  ;;  %v7281_v9 = vpack.i.bf16 %v10110_v45, %v10112_v17 }
 0x5ee   : > { %v7236_v34 = vpack.i.bf16 %v4052_v57, %v4051_v54  ;;  %v7183_v54 = vpop.permute.xlu2 %7182  ;;  %v10295_v1 = vld [vmem:[#allocation3 + $0x170] sm:$0xff] }
 0x5ef   : > { %7242 = vrot.lane.b32.xlu2 %v7241_v23, %s7788_s27  ;;  %v7185_v23 = vunpack.i.h.bf16 %v7183_v54 }
 0x5f0   : > { %7237 = vrot.lane.b32.xlu1 %v7236_v34, %s7796_s24  ;;  %7257 = vrot.lane.b32.xlu0 %v7256_v7, %s7797_s28  ;;  %v3684_v31 = vpop.f32.mrf.mxu3  ;;  %v7184_v34 = vunpack.i.l.bf16 %v7183_v54  ;;  %v10119_v7 = vld [vmem:[#allocation3 + $0xd8] sm:$0xff]  ;;  %v4059_v54 = vld [vmem:[#allocation3 + $0x4a] sm:$0xff] }
 0x5f1   : > { %v3685_v51 = vadd.f32 %v9740_v43, %v3684_v31  ;;  %v7173_v33 = vpop.permute.xlu1 %7172  ;;  %v4117_v43 = vld [vmem:[#allocation3 + $0x19] sm:$0xff] }
 0x5f2   : > { %v7168_v44 = vpop.permute.xlu0 %7167  ;;  %v7175_v21 = vunpack.i.h.bf16 %v7173_v33  ;;  %v7174_v6 = vunpack.i.l.bf16 %v7173_v33  ;;  %v7261_v38 = vpack.i.bf16 %v4118_v52, %v4117_v43  ;;  %v10121_v31 = vld [vmem:[#allocation3 + $0xe0] sm:$0xff]  ;;  %v7135_v52 = vunpack.i.h.bf16 %v10031_v56 }
 0x5f3   : > { %v7170_v36 = vunpack.i.h.bf16 %v7168_v44  ;;  %v7169_v14 = vunpack.i.l.bf16 %v7168_v44  ;;  %v3718_v53 = vmax.f32 %v3685_v51, 0.0  ;;  %v7130_v51 = vunpack.i.h.bf16 %v10009_v12 }
 0x5f4   : > { %v7129_v44 = vunpack.i.l.bf16 %v10009_v12 }
 0x5f5   : > { %v5318_v13 = vsel %vm3900_vm8, %v10089_v22, %v7169_v14  ;;  %v5319_v26 = vsel %vm3900_vm8, %v10091_v4, %v7170_v36  ;;  %3988 = vst.msk [vmem:[#allocation3 + $0x189] sm:$0xff] %vm3900_vm8, %v3718_v53  ;;  %v3989_v36 = vld [vmem:[#allocation3] sm:$0xff]  ;;  %v3990_v14 = vld [vmem:[#allocation3 + $0x8] sm:$0xff]  ;;  %v7134_v53 = vunpack.i.l.bf16 %v10031_v56 }
 0x5f6   : > { %v10102_v49 = vsel %vm799_vm0, %v5319_v26, %v7175_v21  ;;  %v10105_v32 = vsel %vm799_vm0, %v5318_v13, %v7174_v6  ;;  %v5303_v12 = vsel %vm3900_vm8, %v3990_v14, %v7130_v51  ;;  %v5302_v15 = vsel %vm3900_vm8, %v3989_v36, %v7129_v44  ;;  %v10142_v13 = vld [vmem:[#allocation3 + $0x50] sm:$0xff]  ;;  %v6457_v14 = vld [vmem:[%s10931_s12 + $0x8] sm:$0xff] }
 0x5f7   : > { %7247 = vrot.lane.b32.xlu2 %v7261_v38, %s7796_s24  ;;  %v10145_v26 = vsel %vm799_vm0, %v5302_v15, %v7134_v53  ;;  %v10148_v43 = vsel %vm799_vm0, %v5303_v12, %v7135_v52  ;;  %5676 = vmatpush.bf16.msrb.mxu0 %v6457_v14  ;;  %v4061_v52 = vld [vmem:[#allocation3 + $0x62] sm:$0xff]  ;;  %v4062_v53 = vld [vmem:[#allocation3 + $0x6a] sm:$0xff] }
 0x5f8   : > { %7262 = vrot.lane.b32.xlu1 %v7261_v38, %s7790_s23  ;;  %7272 = vrot.lane.b32.xlu0 %v7271_v16, %s7796_s24  ;;  %v7321_v38 = vpack.i.bf16 %v10142_v13, %v10150_v28  ;;  %v7356_v12 = vpack.i.bf16 %v4062_v53, %v4061_v52  ;;  %v4219_v52 = vld [vmem:[#allocation3 + $0x69] sm:$0xff]  ;;  %v4218_v53 = vld [vmem:[#allocation3 + $0x61] sm:$0xff] }
 0x5fa   : > { %v7188_v56 = vpop.permute.xlu2 %7187 }
 0x5fb   : > { %v7190_v41 = vunpack.i.h.bf16 %v7188_v56  ;;  %v7189_v50 = vunpack.i.l.bf16 %v7188_v56 }
 0x5ff   : > { %7267 = vrot.lane.b32.xlu2 %v7251_v29, %s7798_s19 }
 0x600   : > { %7277 = vrot.lane.b32.xlu1 %v7276_v63, %s7788_s27  ;;  %7282 = vrot.lane.b32.xlu0 %v7281_v9, %s7793_s30 }
 0x602   : > { %v7178_v25 = vpop.permute.xlu1 %7177 }
 0x603   : > { %v7180_v60 = vunpack.i.h.bf16 %v7178_v25  ;;  %v7179_v57 = vunpack.i.l.bf16 %v7178_v25  ;;  %v10157_v25 = vld [vmem:[#allocation3 + $0xf0] sm:$0xff] }
 0x605   : > { %v5321_v33 = vsel %vm3900_vm8, %v10121_v31, %v7180_v60  ;;  %v5320_v29 = vsel %vm3900_vm8, %v10119_v7, %v7179_v57  ;;  %v10159_v60 = vld [vmem:[#allocation3 + $0xf8] sm:$0xff] }
 0x606   : > { %v10130_v21 = vsel %vm799_vm0, %v5320_v29, %v7184_v34  ;;  %v10133_v6 = vsel %vm799_vm0, %v5321_v33, %v7185_v23  ;;  %v4060_v34 = vld [vmem:[#allocation3 + $0x52] sm:$0xff]  ;;  %v5323_v51 = vsel %vm3900_vm8, %v10159_v60, %v7190_v41  ;;  %v4027_v33 = vld [vmem:[#allocation3 + $0x49] sm:$0xff] }
 0x607   : > { %7292 = vrot.lane.b32.xlu2 %v7276_v63, %s7792_s29  ;;  %v7316_v36 = vpack.i.bf16 %v4060_v34, %v4059_v54  ;;  %v10182_v54 = vld [vmem:[#allocation3 + $0x110] sm:$0xff] }
 0x608   : > { %7287 = vrot.lane.b32.xlu1 %v7271_v16, %s7799_s20  ;;  %7297 = vrot.lane.b32.xlu0 %v7281_v9, %s7797_s28  ;;  %v4028_v9 = vld [vmem:[#allocation3 + $0x51] sm:$0xff] }
 0x609   : > { %v7311_v29 = vpack.i.bf16 %v4028_v9, %v4027_v33  ;;  %v10180_v9 = vld [vmem:[#allocation3 + $0x108] sm:$0xff]  ;;  %v10196_v33 = vld [vmem:[#allocation3 + $0x60] sm:$0xff] }
 0x60f   : > { %7307 = vrot.lane.b32.xlu2 %v7276_v63, %s7798_s19 }
 0x610   : > { %7302 = vrot.lane.b32.xlu1 %v7271_v16, %s7790_s23  ;;  %7322 = vrot.lane.b32.xlu0 %v7321_v38, %s7793_s30  ;;  %v5322_v16 = vsel %vm3900_vm8, %v10157_v25, %v7189_v50 }
 0x611   : > { %v7193_v35 = vpop.permute.xlu0 %7192 }
 0x612   : > { %v7195_v57 = vunpack.i.h.bf16 %v7193_v35  ;;  %v7194_v23 = vunpack.i.l.bf16 %v7193_v35 }
 0x614   : > { %v10166_v63 = vsel %vm799_vm0, %v5322_v16, %v7194_v23  ;;  %v10169_v44 = vsel %vm799_vm0, %v5323_v51, %v7195_v57  ;;  %v10184_v57 = vld [vmem:[#allocation3 + $0x68] sm:$0xff] }
 0x615   : > { %v7361_v14 = vpack.i.bf16 %v10184_v57, %v10196_v33 }
 0x617   : > { %7317 = vrot.lane.b32.xlu2 %v7316_v36, %s7788_s27 }
 0x618   : > { %7312 = vrot.lane.b32.xlu1 %v7311_v29, %s7796_s24  ;;  %7337 = vrot.lane.b32.xlu0 %v7321_v38, %s7797_s28 }
 0x61f   : > { %7332 = vrot.lane.b32.xlu2 %v7316_v36, %s7792_s29 }
 0x620   : > { %7327 = vrot.lane.b32.xlu1 %v7311_v29, %s7799_s20  ;;  %7357 = vrot.lane.b32.xlu0 %v7356_v12, %s7788_s27 }
 0x621   : > { %v7203_v56 = vpop.permute.xlu1 %7202 }
 0x622   : > { %v7198_v15 = vpop.permute.xlu0 %7197  ;;  %v7205_v35 = vunpack.i.h.bf16 %v7203_v56  ;;  %v7204_v38 = vunpack.i.l.bf16 %v7203_v56  ;;  %v7213_v56 = vpop.permute.xlu2 %7212 }
 0x623   : > { %v7200_v41 = vunpack.i.h.bf16 %v7198_v15  ;;  %v7199_v50 = vunpack.i.l.bf16 %v7198_v15  ;;  %v7366_v15 = vpack.i.bf16 %v4219_v52, %v4218_v53  ;;  %v5807_v53 = vld [vmem:[%s10933_s14] sm:$0xf] }
 0x624   : > { %v5861_v0 = vsel %vm5666_vm10, %v5807_v53, 0  ;;  %v6456_v53 = vld [vmem:[%s10931_s12] sm:$0xff] }
 0x625   : > { %v5324_v23 = vsel %vm3900_vm8, %v10180_v9, %v7199_v50  ;;  %v5325_v34 = vsel %vm3900_vm8, %v10182_v54, %v7200_v41  ;;  %5870 = vmatpush.bf16.msrb.mxu3 %v5861_v0  ;;  %5677 = vmatpush.bf16.msrb.mxu0 %v6456_v53  ;;  %v4255_v53 = vld [vmem:[#allocation3 + $0x9a] sm:$0xff] }
 0x626   : > { %v10191_v51 = vsel %vm799_vm0, %v5325_v34, %v7205_v35  ;;  %v10194_v16 = vsel %vm799_vm0, %v5324_v23, %v7204_v38  ;;  %v7215_v38 = vunpack.i.h.bf16 %v7213_v56  ;;  %v7214_v23 = vunpack.i.l.bf16 %v7213_v56 }
 0x627   : > { %7347 = vrot.lane.b32.xlu2 %v7316_v36, %s7798_s19  ;;  %v10208_v36 = vld [vmem:[#allocation3 + $0x128] sm:$0xff]  ;;  %v7381_v56 = vpack.i.bf16 %v10018_v39, %v10016_v18  ;;  %v10233_v39 = vld [vmem:[#allocation3 + $0x138] sm:$0xff] }
 0x628   : > { %7342 = vrot.lane.b32.xlu1 %v7311_v29, %s7790_s23  ;;  %7362 = vrot.lane.b32.xlu0 %v7361_v14, %s7793_s30  ;;  %v10206_v29 = vld [vmem:[#allocation3 + $0x120] sm:$0xff] }
 0x62f   : > { %7352 = vrot.lane.b32.xlu2 %v7366_v15, %s7796_s24 }
 0x630   : > { %7367 = vrot.lane.b32.xlu1 %v7366_v15, %s7799_s20  ;;  %7377 = vrot.lane.b32.xlu0 %v7361_v14, %s7797_s28 }
 0x632   : > { %v7208_v41 = vpop.permute.xlu1 %7207 }
 0x633   : > { %v7210_v50 = vunpack.i.h.bf16 %v7208_v41  ;;  %v7209_v35 = vunpack.i.l.bf16 %v7208_v41 }
 0x635   : > { %v5327_v34 = vsel %vm3900_vm8, %v10208_v36, %v7210_v50  ;;  %v5326_v52 = vsel %vm3900_vm8, %v10206_v29, %v7209_v35  ;;  %v7218_v50 = vpop.permute.xlu2 %7217 }
 0x636   : > { %v10218_v14 = vsel %vm799_vm0, %v5326_v52, %v7214_v23  ;;  %v10221_v41 = vsel %vm799_vm0, %v5327_v34, %v7215_v38  ;;  %v7220_v35 = vunpack.i.h.bf16 %v7218_v50  ;;  %v7219_v61 = vunpack.i.l.bf16 %v7218_v50  ;;  %v10235_v38 = vld [vmem:[#allocation3 + $0x140] sm:$0xff] }
 0x637   : > { %10961 = vst [vmem:[#allocation12_spill] sm:$0xff] %v10218_v14  ;;  %7372 = vrot.lane.b32.xlu2 %v7356_v12, %s7792_s29  ;;  %v4157_v50 = vld [vmem:[#allocation3 + $0x7a] sm:$0xff] }
 0x638   : > { %7387 = vrot.lane.b32.xlu1 %v7366_v15, %s7790_s23  ;;  %7382 = vrot.lane.b32.xlu0 %v7381_v56, %s7793_s30  ;;  %v5329_v0 = vsel %vm3900_vm8, %v10235_v38, %v7220_v35  ;;  %v5328_v34 = vsel %vm3900_vm8, %v10233_v39, %v7219_v61  ;;  %v4158_v35 = vld [vmem:[#allocation3 + $0x82] sm:$0xff] }
 0x63f   : > { %7397 = vrot.lane.b32.xlu2 %v7356_v12, %s7798_s19 }
 0x640   : > { %7392 = vrot.lane.b32.xlu1 %v9926_v58, %s7799_s20  ;;  %7407 = vrot.lane.b32.xlu0 %v7381_v56, %s7797_s28  ;;  %v7421_v56 = vpack.i.bf16 %v10043_v30, %v10041_v5 }
 0x641   : > { %v7223_v18 = vpop.permute.xlu0 %7222 }
 0x642   : > { %v7225_v15 = vunpack.i.h.bf16 %v7223_v18  ;;  %v7224_v23 = vunpack.i.l.bf16 %v7223_v18  ;;  %v7416_v18 = vpack.i.bf16 %v4158_v35, %v4157_v50  ;;  %v10265_v50 = vld [vmem:[#allocation3 + $0x158] sm:$0xff] }
 0x644   : > { %v10242_v52 = vsel %vm799_vm0, %v5328_v34, %v7224_v23  ;;  %v10245_v12 = vsel %vm799_vm0, %v5329_v0, %v7225_v15  ;;  %v4254_v34 = vld [vmem:[#allocation3 + $0x92] sm:$0xff] }
 0x645   : > { %10962 = vst [vmem:[#allocation13_spill] sm:$0xff] %v10242_v52 }
 0x646   : > { %10963 = vst [vmem:[#allocation14_spill] sm:$0xff] %v10245_v12 }
 0x647   : > { %7402 = vrot.lane.b32.xlu2 %v9924_v37, %s7792_s29 }
 0x648   : > { %7412 = vrot.lane.b32.xlu1 %v9926_v58, %s7790_s23  ;;  %7422 = vrot.lane.b32.xlu0 %v7421_v56, %s7793_s30 }
 0x649   : > { %v7243_v61 = vpop.permute.xlu2 %7242 }
 0x64a   : > { %v7244_v10 = vunpack.i.l.bf16 %v7243_v61 }
 0x64f   : > { %7417 = vrot.lane.b32.xlu2 %v7416_v18, %s7798_s19 }
 0x650   : > { %7427 = vrot.lane.b32.xlu1 %v9954_v47, %s7799_s20  ;;  %7437 = vrot.lane.b32.xlu0 %v7421_v56, %s7797_s28 }
 0x651   : > { %v7233_v30 = vpop.permute.xlu1 %7232  ;;  %v10261_v0 = vpop.permute.xlu2 %7247 }
 0x652   : > { %v7228_v5 = vpop.permute.xlu0 %7227  ;;  %v7235_v23 = vunpack.i.h.bf16 %v7233_v30  ;;  %v7234_v37 = vunpack.i.l.bf16 %v7233_v30  ;;  %v7431_v30 = vpack.i.bf16 %v4255_v53, %v4254_v34  ;;  %v4130_v34 = vld [vmem:[#allocation3 + $0xb1] sm:$0xff] }
 0x653   : > { %v7230_v58 = vunpack.i.h.bf16 %v7228_v5  ;;  %v7229_v15 = vunpack.i.l.bf16 %v7228_v5  ;;  %v4256_v53 = vld [vmem:[#allocation3 + $0xaa] sm:$0xff] }
 0x655   : > { %v5330_v35 = vsel %vm3900_vm8, %v10263_v55, %v7229_v15  ;;  %v5331_v56 = vsel %vm3900_vm8, %v10265_v50, %v7230_v58 }
 0x656   : > { %v10272_v18 = vsel %vm799_vm0, %v5331_v56, %v7235_v23  ;;  %v10275_v5 = vsel %vm799_vm0, %v5330_v35, %v7234_v37  ;;  %v4257_v35 = vld [vmem:[#allocation3 + $0xb2] sm:$0xff]  ;;  %v7245_v56 = vunpack.i.h.bf16 %v7243_v61  ;;  %v7481_v61 = vpack.i.bf16 %v10091_v4, %v10089_v22 }
 0x657   : > { %10964 = vst [vmem:[#allocation15_spill] sm:$0xff] %v10272_v18  ;;  %7432 = vrot.lane.b32.xlu2 %v7431_v30, %s7792_s29  ;;  %v7461_v46 = vpack.i.bf16 %v4257_v35, %v4256_v53  ;;  %v4227_v53 = vld [vmem:[#allocation3 + $0xc9] sm:$0xff] }
 0x658   : > { %10965 = vst [vmem:[#allocation16_spill] sm:$0xff] %v10275_v5  ;;  %7442 = vrot.lane.b32.xlu1 %v9954_v47, %s7790_s23  ;;  %7452 = vrot.lane.b32.xlu0 %v7451_v24, %s7793_s30 }
 0x659   : > { %v10285_v58 = vpop.permute.xlu2 %7267 }
 0x65a   : > { %v10283_v15 = vpop.permute.xlu0 %7252 }
 0x65f   : > { %7447 = vrot.lane.b32.xlu2 %v7431_v30, %s7798_s19  ;;  %v4129_v30 = vld [vmem:[#allocation3 + $0xa9] sm:$0xff] }
 0x660   : > { %7457 = vrot.lane.b32.xlu1 %v9971_v8, %s7799_s20  ;;  %7467 = vrot.lane.b32.xlu0 %v7451_v24, %s7797_s28 }
 0x661   : > { %v10291_v47 = vpop.permute.xlu2 %7292 }
 0x662   : > { %v7238_v23 = vpop.permute.xlu1 %7237  ;;  %v7258_v37 = vpop.permute.xlu0 %7257 }
 0x663   : > { %v7240_v27 = vunpack.i.h.bf16 %v7238_v23  ;;  %v7239_v3 = vunpack.i.l.bf16 %v7238_v23  ;;  %v7471_v23 = vpack.i.bf16 %v4130_v34, %v4129_v30  ;;  %v7260_v4 = vunpack.i.h.bf16 %v7258_v37  ;;  %v4258_v30 = vld [vmem:[#allocation3 + $0xc2] sm:$0xff] }
 0x665   : > { %v5333_v8 = vsel %vm3900_vm8, %v10295_v1, %v7240_v27  ;;  %v5332_v24 = vsel %vm3900_vm8, %v10293_v2, %v7239_v3 }
 0x666   : > { %v10302_v5 = vsel %vm799_vm0, %v5332_v24, %v7244_v10  ;;  %v10305_v18 = vsel %vm799_vm0, %v5333_v8, %v7245_v56  ;;  %v4226_v10 = vld [vmem:[#allocation3 + $0xc1] sm:$0xff]  ;;  %v7259_v56 = vunpack.i.l.bf16 %v7258_v37 }
 0x667   : > { %10966 = vst [vmem:[#allocation17_spill] sm:$0xff] %v10302_v5  ;;  %7462 = vrot.lane.b32.xlu2 %v7461_v46, %s7792_s29  ;;  %v7486_v35 = vpack.i.bf16 %v4227_v53, %v4226_v10  ;;  %v5368_v53 = vsel %vm5366_vm11, %v10148_v43, %v7260_v4  ;;  %v7269_v43 = vunpack.i.l.bf16 %v10285_v58 }
 0x668   : > { %10967 = vst [vmem:[#allocation18_spill] sm:$0xff] %v10305_v18  ;;  %7472 = vrot.lane.b32.xlu1 %v7471_v23, %s7790_s23  ;;  %7482 = vrot.lane.b32.xlu0 %v7481_v61, %s7793_s30  ;;  %v4259_v23 = vld [vmem:[#allocation3 + $0xca] sm:$0xff] }
 0x669   : > { %v10314_v34 = vpop.permute.xlu2 %7307  ;;  %v7491_v52 = vpack.i.bf16 %v4259_v23, %v4258_v30  ;;  %v7294_v30 = vunpack.i.l.bf16 %v10291_v47 }
 0x66a   : > { %v7263_v27 = vpop.permute.xlu1 %7262  ;;  %v10312_v3 = vpop.permute.xlu0 %7272 }
 0x66b   : > { %v7265_v5 = vunpack.i.h.bf16 %v7263_v27  ;;  %v7264_v18 = vunpack.i.l.bf16 %v7263_v27  ;;  %v7270_v27 = vunpack.i.h.bf16 %v10285_v58 }
 0x66d   : > { %v5400_v10 = vsel %vm868_vm1, %v5368_v53, %v7265_v5 }
 0x66f   : > { %7477 = vrot.lane.b32.xlu2 %v7461_v46, %s7798_s19  ;;  %v5367_v46 = vsel %vm5366_vm11, %v10145_v26, %v7259_v56 }
 0x670   : > { %7487 = vrot.lane.b32.xlu1 %v7486_v35, %s7799_s20  ;;  %7497 = vrot.lane.b32.xlu0 %v7481_v61, %s7797_s28  ;;  %v7511_v61 = vpack.i.bf16 %v10121_v31, %v10119_v7  ;;  %v5399_v37 = vsel %vm868_vm1, %v5367_v46, %v7264_v18  ;;  %v5433_v31 = vsel %vm5431_vm12, %v5400_v10, %v7270_v27 }
 0x671   : > { %v10321_v24 = vpop.permute.xlu2 %7317  ;;  %v5432_v7 = vsel %vm5431_vm12, %v5399_v37, %v7269_v43  ;;  %v4228_v37 = vld [vmem:[#allocation3 + $0xd9] sm:$0xff] }
 0x672   : > { %v10319_v22 = vpop.permute.xlu1 %7277  ;;  %v7283_v8 = vpop.permute.xlu0 %7282 }
 0x673   : > { %v7285_v12 = vunpack.i.h.bf16 %v7283_v8  ;;  %v7284_v14 = vunpack.i.l.bf16 %v7283_v8  ;;  %v7295_v8 = vunpack.i.h.bf16 %v10291_v47 }
 0x675   : > { %v5464_v58 = vsel %vm2487_vm3, %v5432_v7, %v7284_v14  ;;  %v5465_v23 = vsel %vm2487_vm3, %v5433_v31, %v7285_v12  ;;  %v4260_v7 = vld [vmem:[#allocation3 + $0xda] sm:$0xff]  ;;  %v4261_v31 = vld [vmem:[#allocation3 + $0xe2] sm:$0xff] }
 0x677   : > { %7492 = vrot.lane.b32.xlu2 %v7491_v52, %s7792_s29 }
 0x678   : > { %7502 = vrot.lane.b32.xlu1 %v7486_v35, %s7790_s23  ;;  %7512 = vrot.lane.b32.xlu0 %v7511_v61, %s7793_s30  ;;  %v4229_v35 = vld [vmem:[#allocation3 + $0xe1] sm:$0xff] }
 0x679   : > { %v10338_v56 = vpop.permute.xlu2 %7332  ;;  %v7516_v43 = vpack.i.bf16 %v4229_v35, %v4228_v37  ;;  %v7249_v35 = vunpack.i.l.bf16 %v10261_v0  ;;  %v4231_v37 = vld [vmem:[#allocation3 + $0xf9] sm:$0xff] }
 0x67a   : > { %v7288_v26 = vpop.permute.xlu1 %7287  ;;  %v7298_v4 = vpop.permute.xlu0 %7297 }
 0x67b   : > { %v7290_v18 = vunpack.i.h.bf16 %v7288_v26  ;;  %v7289_v5 = vunpack.i.l.bf16 %v7288_v26 }
 0x67d   : > { %v5497_v53 = vsel %vm5496_vm13, %v5464_v58, %v7289_v5  ;;  %v5498_v46 = vsel %vm5496_vm13, %v5465_v23, %v7290_v18  ;;  %v7521_v18 = vpack.i.bf16 %v4261_v31, %v4260_v7  ;;  %v7250_v5 = vunpack.i.h.bf16 %v10261_v0 }
 0x67e   : > { %v5529_v10 = vsel %vm2520_vm4, %v5497_v53, %v7294_v30  ;;  %v5530_v27 = vsel %vm2520_vm4, %v5498_v46, %v7295_v8  ;;  %v7541_v8 = vpack.i.bf16 %v10159_v60, %v10157_v25  ;;  %v7300_v30 = vunpack.i.h.bf16 %v7298_v4 }
 0x67f   : > { %v5561_v26 = vpack.c.bf16 %v5530_v27, %v5529_v10  ;;  %7507 = vrot.lane.b32.xlu2 %v7491_v52, %s7798_s19  ;;  %v7255_v52 = vunpack.i.h.bf16 %v10283_v15  ;;  %v7299_v58 = vunpack.i.l.bf16 %v7298_v4  ;;  %v5304_v0 = vsel %vm3900_vm8, %v10081_v48, %v7249_v35 }
 0x680   : > { %7517 = vrot.lane.b32.xlu1 %v7516_v43, %s7799_s20  ;;  %7527 = vrot.lane.b32.xlu0 %v7511_v61, %s7797_s28  ;;  %v7254_v61 = vunpack.i.l.bf16 %v10283_v15  ;;  %v5305_v25 = vsel %vm3900_vm8, %v10078_v11, %v7250_v5  ;;  %v7310_v11 = vunpack.i.h.bf16 %v10314_v34  ;;  %v7309_v31 = vunpack.i.l.bf16 %v10314_v34  ;;  %v4262_v34 = vld [vmem:[#allocation3 + $0xf2] sm:$0xff] }
 0x681   : > { %6370 = vmatmul.msk.bf16.vlgmr.msrb.gmra.mxu0 %vm5617_vm14, %v5561_v26  ;;  %v10352_v47 = vpop.permute.xlu2 %7347  ;;  %v5337_v4 = vsel %vm799_vm0, %v5305_v25, %v7255_v52  ;;  %v4230_v26 = vld [vmem:[#allocation3 + $0xf1] sm:$0xff]  ;;  %v4263_v25 = vld [vmem:[#allocation3 + $0xfa] sm:$0xff] }
 0x682   : > { %v7303_v14 = vpop.permute.xlu1 %7302  ;;  %v7323_v12 = vpop.permute.xlu0 %7322  ;;  %v5336_v10 = vsel %vm799_vm0, %v5304_v0, %v7254_v61  ;;  %v7546_v7 = vpack.i.bf16 %v4231_v37, %v4230_v26  ;;  %v7335_v37 = vunpack.i.h.bf16 %v10338_v56 }
 0x683   : > { %v7305_v23 = vunpack.i.h.bf16 %v7303_v14  ;;  %v7304_v53 = vunpack.i.l.bf16 %v7303_v14  ;;  %v5369_v27 = vsel %vm5366_vm11, %v5336_v10, %v7299_v58  ;;  %v7325_v52 = vunpack.i.h.bf16 %v7323_v12 }
 0x684   : > { %v7324_v61 = vunpack.i.l.bf16 %v7323_v12 }
 0x685   : > { %v5401_v14 = vsel %vm868_vm1, %v5369_v27, %v7304_v53  ;;  %v7551_v27 = vpack.i.bf16 %v4263_v25, %v4262_v34 }
 0x686   : > { %v5434_v5 = vsel %vm5431_vm12, %v5401_v14, %v7309_v31  ;;  %v7275_v14 = vunpack.i.h.bf16 %v10312_v3  ;;  %v7280_v31 = vunpack.i.h.bf16 %v10319_v22 }
 0x687   : > { %7522 = vrot.lane.b32.xlu2 %v7521_v18, %s7792_s29  ;;  %v5466_v10 = vsel %vm2487_vm3, %v5434_v5, %v7324_v61  ;;  %v7279_v5 = vunpack.i.l.bf16 %v10319_v22 }
 0x688   : > { %7532 = vrot.lane.b32.xlu1 %v7516_v43, %s7790_s23  ;;  %7542 = vrot.lane.b32.xlu0 %v7541_v8, %s7793_s30  ;;  %v5370_v43 = vsel %vm5366_vm11, %v5337_v4, %v7300_v30 }
 0x689   : > { %v10369_v15 = vpop.permute.xlu2 %7352  ;;  %v5402_v48 = vsel %vm868_vm1, %v5370_v43, %v7305_v23 }
 0x68a   : > { %v10363_v46 = vpop.permute.xlu1 %7312  ;;  %v7338_v60 = vpop.permute.xlu0 %7337  ;;  %v5435_v35 = vsel %vm5431_vm12, %v5402_v48, %v7310_v11  ;;  %v7274_v48 = vunpack.i.l.bf16 %v10312_v3  ;;  %v5307_v3 = vsel %vm3900_vm8, %v10110_v45, %v7275_v14 }
 0x68b   : > { %v5467_v4 = vsel %vm2487_vm3, %v5435_v35, %v7325_v52  ;;  %v7340_v35 = vunpack.i.h.bf16 %v7338_v60  ;;  %v7339_v52 = vunpack.i.l.bf16 %v7338_v60  ;;  %v5339_v60 = vsel %vm799_vm0, %v5307_v3, %v7280_v31 }
 0x68d   : > { %v5372_v25 = vsel %vm5366_vm11, %v5339_v60, %v7340_v35  ;;  %v4264_v35 = vld [vmem:[#allocation3 + $0x10a] sm:$0xff] }
 0x68f   : > { %7537 = vrot.lane.b32.xlu2 %v7521_v18, %s7798_s19  ;;  %v7334_v18 = vunpack.i.l.bf16 %v10338_v56  ;;  %v7571_v56 = vpack.i.bf16 %v10182_v54, %v10180_v9  ;;  %v5306_v9 = vsel %vm3900_vm8, %v10112_v17, %v7274_v48 }
 0x690   : > { %7547 = vrot.lane.b32.xlu1 %v7546_v7, %s7799_s20  ;;  %7557 = vrot.lane.b32.xlu0 %v7541_v8, %s7797_s28 }
 0x691   : > { %v10386_v0 = vpop.permute.xlu2 %7372 }
 0x692   : > { %v7328_v30 = vpop.permute.xlu1 %7327  ;;  %v10384_v53 = vpop.permute.xlu0 %7357 }
 0x693   : > { %v7330_v58 = vunpack.i.h.bf16 %v7328_v30  ;;  %v7329_v23 = vunpack.i.l.bf16 %v7328_v30 }
 0x695   : > { %v5499_v8 = vsel %vm5496_vm13, %v5466_v10, %v7329_v23  ;;  %v5500_v12 = vsel %vm5496_vm13, %v5467_v4, %v7330_v58  ;;  %v5338_v23 = vsel %vm799_vm0, %v5306_v9, %v7279_v5  ;;  %v7350_v10 = vunpack.i.h.bf16 %v10352_v47 }
 0x696   : > { %v5531_v43 = vsel %vm2520_vm4, %v5499_v8, %v7334_v18  ;;  %v5532_v26 = vsel %vm2520_vm4, %v5500_v12, %v7335_v37  ;;  %v5371_v34 = vsel %vm5366_vm11, %v5338_v23, %v7339_v52  ;;  %v4232_v37 = vld [vmem:[#allocation3 + $0x109] sm:$0xff]  ;;  %v7349_v4 = vunpack.i.l.bf16 %v10352_v47  ;;  %v4265_v47 = vld [vmem:[#allocation3 + $0x112] sm:$0xff] }
 0x697   : > { %v5562_v11 = vpack.c.bf16 %v5532_v26, %v5531_v43  ;;  %7552 = vrot.lane.b32.xlu2 %v7551_v27, %s7792_s29  ;;  %v7375_v52 = vunpack.i.h.bf16 %v10386_v0  ;;  %v7314_v9 = vunpack.i.l.bf16 %v10363_v46 }
 0x698   : > { %7562 = vrot.lane.b32.xlu1 %v7546_v7, %s7790_s23  ;;  %7572 = vrot.lane.b32.xlu0 %v7571_v56, %s7793_s30  ;;  %v4233_v7 = vld [vmem:[#allocation3 + $0x111] sm:$0xff] }
 0x699   : > { %6371 = vmatmul.msk.bf16.gmra.mxu0 %vm5617_vm14, %v5562_v11  ;;  %v10410_v58 = vpop.permute.xlu2 %7397  ;;  %v7576_v17 = vpack.i.bf16 %v4233_v7, %v4232_v37 }
 0x69a   : > { %v7343_v61 = vpop.permute.xlu1 %7342  ;;  %v7363_v22 = vpop.permute.xlu0 %7362 }
 0x69b   : > { %v7345_v54 = vunpack.i.h.bf16 %v7343_v61  ;;  %v7344_v30 = vunpack.i.l.bf16 %v7343_v61  ;;  %v7365_v43 = vunpack.i.h.bf16 %v7363_v22  ;;  %v7364_v26 = vunpack.i.l.bf16 %v7363_v22 }
 0x69c   : > { %v7581_v22 = vpack.i.bf16 %v4265_v47, %v4264_v35 }
 0x69d   : > { %v5403_v45 = vsel %vm868_vm1, %v5371_v34, %v7344_v30  ;;  %v5404_v18 = vsel %vm868_vm1, %v5372_v25, %v7345_v54  ;;  %v5308_v34 = vsel %vm3900_vm8, %v10150_v28, %v7314_v9 }
 0x69e   : > { %v5436_v8 = vsel %vm5431_vm12, %v5403_v45, %v7349_v4  ;;  %v5437_v12 = vsel %vm5431_vm12, %v5404_v18, %v7350_v10  ;;  %v7320_v45 = vunpack.i.h.bf16 %v10321_v24 }
 0x69f   : > { %7567 = vrot.lane.b32.xlu2 %v7551_v27, %s7798_s19  ;;  %v7374_v27 = vunpack.i.l.bf16 %v10386_v0  ;;  %v5468_v61 = vsel %vm2487_vm3, %v5436_v8, %v7364_v26  ;;  %v5469_v3 = vsel %vm2487_vm3, %v5437_v12, %v7365_v43  ;;  %v7601_v0 = vpack.i.bf16 %v10208_v36, %v10206_v29  ;;  %v4234_v26 = vld [vmem:[#allocation3 + $0x121] sm:$0xff] }
 0x6a0   : > { %7577 = vrot.lane.b32.xlu1 %v7576_v17, %s7799_s20  ;;  %7587 = vrot.lane.b32.xlu0 %v7571_v56, %s7797_s28  ;;  %v7315_v56 = vunpack.i.h.bf16 %v10363_v46  ;;  %v7319_v29 = vunpack.i.l.bf16 %v10321_v24 }
 0x6a1   : > { %v10425_v5 = vpop.permute.xlu2 %7402 }
 0x6a2   : > { %v7368_v14 = vpop.permute.xlu1 %7367  ;;  %v7378_v31 = vpop.permute.xlu0 %7377  ;;  %v5309_v46 = vsel %vm3900_vm8, %v10142_v13, %v7315_v56  ;;  %v4235_v13 = vld [vmem:[#allocation3 + $0x129] sm:$0xff]  ;;  %v5340_v8 = vsel %vm799_vm0, %v5308_v34, %v7319_v29  ;;  %v7354_v29 = vunpack.i.l.bf16 %v10369_v15 }
 0x6a3   : > { %v7370_v48 = vunpack.i.h.bf16 %v7368_v14  ;;  %v7369_v11 = vunpack.i.l.bf16 %v7368_v14  ;;  %v7380_v25 = vunpack.i.h.bf16 %v7378_v31  ;;  %v7379_v37 = vunpack.i.l.bf16 %v7378_v31 }
 0x6a4   : > { %v5341_v28 = vsel %vm799_vm0, %v5309_v46, %v7320_v45  ;;  %v7399_v31 = vunpack.i.l.bf16 %v10410_v58  ;;  %v7355_v45 = vunpack.i.h.bf16 %v10369_v15 }
 0x6a5   : > { %v5501_v54 = vsel %vm5496_vm13, %v5468_v61, %v7369_v11  ;;  %v5502_v30 = vsel %vm5496_vm13, %v5469_v3, %v7370_v48  ;;  %v5373_v12 = vsel %vm5366_vm11, %v5340_v8, %v7379_v37  ;;  %v5374_v43 = vsel %vm5366_vm11, %v5341_v28, %v7380_v25 }
 0x6a6   : > { %v5533_v7 = vsel %vm2520_vm4, %v5501_v54, %v7374_v27  ;;  %v5534_v23 = vsel %vm2520_vm4, %v5502_v30, %v7375_v52  ;;  %v7606_v48 = vpack.i.bf16 %v4235_v13, %v4234_v26  ;;  %v7400_v11 = vunpack.i.h.bf16 %v10410_v58  ;;  %v4266_v30 = vld [vmem:[#allocation3 + $0x122] sm:$0xff]  ;;  %v4267_v58 = vld [vmem:[#allocation3 + $0x12a] sm:$0xff] }
 0x6a7   : > { %v5563_v60 = vpack.c.bf16 %v5534_v23, %v5533_v7  ;;  %7582 = vrot.lane.b32.xlu2 %v7581_v22, %s7792_s29  ;;  %v7405_v7 = vunpack.i.h.bf16 %v10425_v5  ;;  %v7611_v34 = vpack.i.bf16 %v4267_v58, %v4266_v30  ;;  %v5311_v15 = vsel %vm3900_vm8, %v10184_v57, %v7355_v45 }
 0x6a8   : > { %7592 = vrot.lane.b32.xlu1 %v7576_v17, %s7790_s23  ;;  %7602 = vrot.lane.b32.xlu0 %v7601_v0, %s7793_s30 }
 0x6a9   : > { %6372 = vmatmul.msk.bf16.gmra.mxu0 %vm5617_vm14, %v5563_v60  ;;  %v10449_v4 = vpop.permute.xlu2 %7417 }
 0x6aa   : > { %v7388_v36 = vpop.permute.xlu1 %7387  ;;  %v7383_v10 = vpop.permute.xlu0 %7382 }
 0x6ab   : > { %v7390_v18 = vunpack.i.h.bf16 %v7388_v36  ;;  %v7389_v17 = vunpack.i.l.bf16 %v7388_v36  ;;  %v7385_v52 = vunpack.i.h.bf16 %v7383_v10  ;;  %v7384_v27 = vunpack.i.l.bf16 %v7383_v10 }
 0x6ad   : > { %v5405_v14 = vsel %vm868_vm1, %v5373_v12, %v7389_v17  ;;  %v5406_v24 = vsel %vm868_vm1, %v5374_v43, %v7390_v18  ;;  %v7360_v18 = vunpack.i.h.bf16 %v10384_v53  ;;  %v7359_v17 = vunpack.i.l.bf16 %v10384_v53  ;;  %v4237_v43 = vld [vmem:[#allocation3 + $0x141] sm:$0xff] }
 0x6ae   : > { %v5438_v35 = vsel %vm5431_vm12, %v5405_v14, %v7399_v31  ;;  %v5439_v47 = vsel %vm5431_vm12, %v5406_v24, %v7400_v11  ;;  %v4236_v11 = vld [vmem:[#allocation3 + $0x139] sm:$0xff] }
 0x6af   : > { %7597 = vrot.lane.b32.xlu2 %v7581_v22, %s7798_s19  ;;  %v7404_v22 = vunpack.i.l.bf16 %v10425_v5  ;;  %v5470_v23 = vsel %vm2487_vm3, %v5438_v35, %v7384_v27  ;;  %v5471_v60 = vsel %vm2487_vm3, %v5439_v47, %v7385_v52  ;;  %v7631_v5 = vpack.i.bf16 %v10235_v38, %v10233_v39 }
 0x6b0   : > { %7607 = vrot.lane.b32.xlu1 %v7606_v48, %s7799_s20  ;;  %7617 = vrot.lane.b32.xlu0 %v7601_v0, %s7797_s28  ;;  %v5310_v39 = vsel %vm3900_vm8, %v10196_v33, %v7354_v29  ;;  %v5343_v14 = vsel %vm799_vm0, %v5311_v15, %v7360_v18  ;;  %v7636_v35 = vpack.i.bf16 %v4237_v43, %v4236_v11  ;;  %v7420_v33 = vunpack.i.h.bf16 %v10449_v4 }
 0x6b1   : > { %v10464_v54 = vpop.permute.xlu2 %7432  ;;  %v5342_v26 = vsel %vm799_vm0, %v5310_v39, %v7359_v17  ;;  %v7419_v47 = vunpack.i.l.bf16 %v10449_v4  ;;  %v4239_v39 = vld [vmem:[#allocation3 + $0x159] sm:$0xff] }
 0x6b2   : > { %v7393_v61 = vpop.permute.xlu1 %7392  ;;  %v7408_v9 = vpop.permute.xlu0 %7407  ;;  %v7435_v4 = vunpack.i.h.bf16 %v10464_v54 }
 0x6b3   : > { %v7395_v3 = vunpack.i.h.bf16 %v7393_v61  ;;  %v7394_v56 = vunpack.i.l.bf16 %v7393_v61  ;;  %v7410_v10 = vunpack.i.h.bf16 %v7408_v9  ;;  %v7409_v13 = vunpack.i.l.bf16 %v7408_v9 }
 0x6b5   : > { %v5503_v0 = vsel %vm5496_vm13, %v5470_v23, %v7394_v56  ;;  %v5504_v46 = vsel %vm5496_vm13, %v5471_v60, %v7395_v3  ;;  %v5375_v24 = vsel %vm5366_vm11, %v5342_v26, %v7409_v13  ;;  %v4269_v23 = vld [vmem:[#allocation3 + $0x142] sm:$0xff]  ;;  %v7434_v60 = vunpack.i.l.bf16 %v10464_v54 }
 0x6b6   : > { %v5535_v25 = vsel %vm2520_vm4, %v5503_v0, %v7404_v22  ;;  %v5536_v37 = vsel %vm2520_vm4, %v5504_v46, %v7405_v7  ;;  %v4268_v22 = vld [vmem:[#allocation3 + $0x13a] sm:$0xff] }
 0x6b7   : > { %v5564_v36 = vpack.c.bf16 %v5536_v37, %v5535_v25  ;;  %7612 = vrot.lane.b32.xlu2 %v7611_v34, %s7792_s29  ;;  %v7641_v37 = vpack.i.bf16 %v4269_v23, %v4268_v22  ;;  %v7691_v23 = vpack.i.bf16 %v10295_v1, %v10293_v2 }
 0x6b8   : > { %7622 = vrot.lane.b32.xlu1 %v7606_v48, %s7790_s23  ;;  %7632 = vrot.lane.b32.xlu0 %v7631_v5, %s7793_s30  ;;  %v5376_v48 = vsel %vm5366_vm11, %v5343_v14, %v7410_v10 }
 0x6b9   : > { %6373 = vmatmul.msk.bf16.gmra.mxu0 %vm5617_vm14, %v5564_v36  ;;  %v7448_v12 = vpop.permute.xlu2 %7447 }
 0x6ba   : > { %v7413_v8 = vpop.permute.xlu1 %7412  ;;  %v7423_v53 = vpop.permute.xlu0 %7422  ;;  %v7450_v26 = vunpack.i.h.bf16 %v7448_v12  ;;  %v7449_v14 = vunpack.i.l.bf16 %v7448_v12 }
 0x6bb   : > { %v7415_v38 = vunpack.i.h.bf16 %v7413_v8  ;;  %v7414_v28 = vunpack.i.l.bf16 %v7413_v8  ;;  %v7425_v61 = vunpack.i.h.bf16 %v7423_v53  ;;  %v7424_v3 = vunpack.i.l.bf16 %v7423_v53 }
 0x6bd   : > { %v5407_v31 = vsel %vm868_vm1, %v5375_v24, %v7414_v28  ;;  %v5408_v57 = vsel %vm868_vm1, %v5376_v48, %v7415_v38  ;;  %v4238_v38 = vld [vmem:[#allocation3 + $0x151] sm:$0xff] }
 0x6be   : > { %v5440_v52 = vsel %vm5431_vm12, %v5407_v31, %v7419_v47  ;;  %v5441_v27 = vsel %vm5431_vm12, %v5408_v57, %v7420_v33  ;;  %v7666_v43 = vpack.i.bf16 %v4239_v39, %v4238_v38  ;;  %v4270_v47 = vld [vmem:[#allocation3 + $0x152] sm:$0xff] }
 0x6bf   : > { %7627 = vrot.lane.b32.xlu2 %v7611_v34, %s7798_s19  ;;  %v5472_v0 = vsel %vm2487_vm3, %v5440_v52, %v7424_v3  ;;  %v5473_v46 = vsel %vm2487_vm3, %v5441_v27, %v7425_v61  ;;  %v4271_v52 = vld [vmem:[#allocation3 + $0x15a] sm:$0xff] }
 0x6c0   : > { %7637 = vrot.lane.b32.xlu1 %v7636_v35, %s7799_s20  ;;  %7647 = vrot.lane.b32.xlu0 %v7631_v5, %s7797_s28  ;;  %v7661_v5 = vpack.i.bf16 %v10265_v50, %v10263_v55 }
 0x6c1   : > { %v7463_v7 = vpop.permute.xlu2 %7462 }
 0x6c2   : > { %v7428_v56 = vpop.permute.xlu1 %7427  ;;  %v7438_v58 = vpop.permute.xlu0 %7437  ;;  %v7465_v12 = vunpack.i.h.bf16 %v7463_v7  ;;  %v7464_v27 = vunpack.i.l.bf16 %v7463_v7 }
 0x6c3   : > { %v7430_v9 = vunpack.i.h.bf16 %v7428_v56  ;;  %v7429_v30 = vunpack.i.l.bf16 %v7428_v56  ;;  %v7440_v54 = vunpack.i.h.bf16 %v7438_v58  ;;  %v7439_v18 = vunpack.i.l.bf16 %v7438_v58 }
 0x6c5   : > { %v5505_v34 = vsel %vm5496_vm13, %v5472_v0, %v7429_v30  ;;  %v5506_v25 = vsel %vm5496_vm13, %v5473_v46, %v7430_v9  ;;  %v5378_v55 = vsel %vm5366_vm11, %v10026_v42, %v7440_v54  ;;  %v5377_v50 = vsel %vm5366_vm11, %v10029_v62, %v7439_v18 }
 0x6c6   : > { %v5537_v45 = vsel %vm2520_vm4, %v5505_v34, %v7434_v60  ;;  %v5538_v29 = vsel %vm2520_vm4, %v5506_v25, %v7435_v4  ;;  %v7671_v30 = vpack.i.bf16 %v4271_v52, %v4270_v47 }
 0x6c7   : > { %v5565_v36 = vpack.c.bf16 %v5538_v29, %v5537_v45  ;;  %7642 = vrot.lane.b32.xlu2 %v7641_v37, %s7792_s29  ;;  %v4241_v45 = vld [vmem:[#allocation3 + $0x171] sm:$0xff]  ;;  %v4240_v29 = vld [vmem:[#allocation3 + $0x169] sm:$0xff] }
 0x6c8   : > { %7652 = vrot.lane.b32.xlu1 %v7636_v35, %s7790_s23  ;;  %7662 = vrot.lane.b32.xlu0 %v7661_v5, %s7793_s30  ;;  %v7696_v54 = vpack.i.bf16 %v4241_v45, %v4240_v29  ;;  %v4212_v45 = vld [vmem:[#allocation3 + $0x198] sm:$0xff] }
 0x6c9   : > { %6374 = vmatmul.msk.bf16.gmra.mxu0 %vm5617_vm14, %v5565_v36  ;;  %v7478_v15 = vpop.permute.xlu2 %7477 }
 0x6ca   : > { %v7443_v17 = vpop.permute.xlu1 %7442  ;;  %v7453_v8 = vpop.permute.xlu0 %7452  ;;  %v7480_v18 = vunpack.i.h.bf16 %v7478_v15 }
 0x6cb   : > { %v7445_v10 = vunpack.i.h.bf16 %v7443_v17  ;;  %v7444_v13 = vunpack.i.l.bf16 %v7443_v17  ;;  %v7455_v42 = vunpack.i.h.bf16 %v7453_v8  ;;  %v7454_v62 = vunpack.i.l.bf16 %v7453_v8 }
 0x6cc   : > { %v7479_v17 = vunpack.i.l.bf16 %v7478_v15  ;;  %v4273_v15 = vld [vmem:[#allocation3 + $0x172] sm:$0xff] }
 0x6cd   : > { %v5409_v28 = vsel %vm868_vm1, %v5377_v50, %v7444_v13  ;;  %v5410_v53 = vsel %vm868_vm1, %v5378_v55, %v7445_v10 }
 0x6ce   : > { %v5442_v24 = vsel %vm5431_vm12, %v5409_v28, %v7449_v14  ;;  %v5443_v48 = vsel %vm5431_vm12, %v5410_v53, %v7450_v26  ;;  %v4272_v28 = vld [vmem:[#allocation3 + $0x16a] sm:$0xff] }
 0x6cf   : > { %7657 = vrot.lane.b32.xlu2 %v7641_v37, %s7798_s19  ;;  %v5474_v61 = vsel %vm2487_vm3, %v5442_v24, %v7454_v62  ;;  %v5475_v3 = vsel %vm2487_vm3, %v5443_v48, %v7455_v42  ;;  %v4211_v24 = vld [vmem:[#allocation3 + $0x188] sm:$0xff]  ;;  %v4210_v62 = vld [vmem:[#allocation3 + $0x180] sm:$0xff] }
 0x6d0   : > { %7667 = vrot.lane.b32.xlu1 %v7666_v43, %s7799_s20  ;;  %7677 = vrot.lane.b32.xlu0 %v7661_v5, %s7797_s28 }
 0x6d1   : > { %v7493_v33 = vpop.permute.xlu2 %7492 }
 0x6d2   : > { %v7458_v11 = vpop.permute.xlu1 %7457  ;;  %v7468_v35 = vpop.permute.xlu0 %7467  ;;  %v7495_v53 = vunpack.i.h.bf16 %v7493_v33 }
 0x6d3   : > { %v7460_v31 = vunpack.i.h.bf16 %v7458_v11  ;;  %v7459_v57 = vunpack.i.l.bf16 %v7458_v11  ;;  %v7470_v7 = vunpack.i.h.bf16 %v7468_v35  ;;  %v7469_v60 = vunpack.i.l.bf16 %v7468_v35 }
 0x6d4   : > { %v7701_v11 = vpack.i.bf16 %v4273_v15, %v4272_v28  ;;  %v7721_v35 = vpack.i.bf16 %v4211_v24, %v4210_v62 }
 0x6d5   : > { %v5507_v56 = vsel %vm5496_vm13, %v5474_v61, %v7459_v57  ;;  %v5508_v9 = vsel %vm5496_vm13, %v5475_v3, %v7460_v31  ;;  %v5380_v1 = vsel %vm5366_vm11, %v10054_v40, %v7470_v7  ;;  %v5379_v2 = vsel %vm5366_vm11, %v10051_v20, %v7469_v60 }
 0x6d6   : > { %v5539_v58 = vsel %vm2520_vm4, %v5507_v56, %v7464_v27  ;;  %v5540_v22 = vsel %vm2520_vm4, %v5508_v9, %v7465_v12  ;;  %v4243_v9 = vld [vmem:[#allocation3 + $0x189] sm:$0xff] }
 0x6d7   : > { %v5566_v4 = vpack.c.bf16 %v5540_v22, %v5539_v58  ;;  %7672 = vrot.lane.b32.xlu2 %v7671_v30, %s7792_s29  ;;  %v4242_v22 = vld [vmem:[#allocation3 + $0x181] sm:$0xff] }
 0x6d8   : > { %7682 = vrot.lane.b32.xlu1 %v7666_v43, %s7790_s23  ;;  %7692 = vrot.lane.b32.xlu0 %v7691_v23, %s7793_s30  ;;  %v7494_v43 = vunpack.i.l.bf16 %v7493_v33  ;;  %v7726_v7 = vpack.i.bf16 %v4243_v9, %v4242_v22 }
 0x6d9   : > { %6375 = vmatmul.msk.bf16.gmra.mxu0 %vm5617_vm14, %v5566_v4  ;;  %v7508_v37 = vpop.permute.xlu2 %7507 }
 0x6da   : > { %v7473_v0 = vpop.permute.xlu1 %7472  ;;  %v7483_v25 = vpop.permute.xlu0 %7482  ;;  %v7510_v60 = vunpack.i.h.bf16 %v7508_v37 }
 0x6db   : > { %v7475_v46 = vunpack.i.h.bf16 %v7473_v0  ;;  %v7474_v34 = vunpack.i.l.bf16 %v7473_v0  ;;  %v7485_v40 = vunpack.i.h.bf16 %v7483_v25  ;;  %v7484_v20 = vunpack.i.l.bf16 %v7483_v25 }
 0x6dc   : > { %v7509_v0 = vunpack.i.l.bf16 %v7508_v37  ;;  %v4274_v37 = vld [vmem:[#allocation3 + $0x182] sm:$0xff] }
 0x6dd   : > { %v5411_v5 = vsel %vm868_vm1, %v5379_v2, %v7474_v34  ;;  %v5412_v36 = vsel %vm868_vm1, %v5380_v1, %v7475_v46  ;;  %v4213_v1 = vld [vmem:[#allocation3 + $0x1a0] sm:$0xff] }
 0x6de   : > { %v5444_v10 = vsel %vm5431_vm12, %v5411_v5, %v7479_v17  ;;  %v5445_v13 = vsel %vm5431_vm12, %v5412_v36, %v7480_v18 }
 0x6df   : > { %7687 = vrot.lane.b32.xlu2 %v7671_v30, %s7798_s19  ;;  %v5476_v26 = vsel %vm2487_vm3, %v5444_v10, %v7484_v20  ;;  %v5477_v14 = vsel %vm2487_vm3, %v5445_v13, %v7485_v40 }
 0x6e0   : > { %7697 = vrot.lane.b32.xlu1 %v7696_v54, %s7799_s20  ;;  %7707 = vrot.lane.b32.xlu0 %v7691_v23, %s7797_s28 }
 0x6e1   : > { %v10549_v38 = vpop.permute.xlu2 %7522 }
 0x6e2   : > { %v7488_v8 = vpop.permute.xlu1 %7487  ;;  %v7498_v50 = vpop.permute.xlu0 %7497  ;;  %v7525_v18 = vunpack.i.h.bf16 %v10549_v38  ;;  %v7524_v17 = vunpack.i.l.bf16 %v10549_v38 }
 0x6e3   : > { %v7490_v39 = vunpack.i.h.bf16 %v7488_v8  ;;  %v7489_v55 = vunpack.i.l.bf16 %v7488_v8  ;;  %v7500_v33 = vunpack.i.h.bf16 %v7498_v50  ;;  %v7499_v52 = vunpack.i.l.bf16 %v7498_v50 }
 0x6e4   : > { %v7751_v8 = vpack.i.bf16 %v4213_v1, %v4212_v45 }
 0x6e5   : > { %v5509_v48 = vsel %vm5496_vm13, %v5476_v26, %v7489_v55  ;;  %v5510_v42 = vsel %vm5496_vm13, %v5477_v14, %v7490_v39  ;;  %v5382_v30 = vsel %vm5366_vm11, %v10073_v19, %v7500_v33  ;;  %v5381_v58 = vsel %vm5366_vm11, %v10070_v59, %v7499_v52 }
 0x6e6   : > { %v5541_v31 = vsel %vm2520_vm4, %v5509_v48, %v7494_v43  ;;  %v5542_v57 = vsel %vm2520_vm4, %v5510_v42, %v7495_v53  ;;  %v4244_v53 = vld [vmem:[#allocation3 + $0x199] sm:$0xff]  ;;  %v4245_v43 = vld [vmem:[#allocation3 + $0x1a1] sm:$0xff] }
 0x6e7   : > { %v5567_v47 = vpack.c.bf16 %v5542_v57, %v5541_v31  ;;  %7702 = vrot.lane.b32.xlu2 %v7701_v11, %s7792_s29  ;;  %v7756_v62 = vpack.i.bf16 %v4245_v43, %v4244_v53 }
 0x6e8   : > { %7712 = vrot.lane.b32.xlu1 %v7696_v54, %s7790_s23  ;;  %7722 = vrot.lane.b32.xlu0 %v7721_v35, %s7793_s30  ;;  %v4275_v54 = vld [vmem:[#allocation3 + $0x18a] sm:$0xff] }
 0x6e9   : > { %6376 = vmatmul.msk.bf16.gmra.mxu0 %vm5617_vm14, %v5567_v47  ;;  %v10561_v56 = vpop.permute.xlu2 %7537  ;;  %v7731_v39 = vpack.i.bf16 %v4275_v54, %v4274_v37 }
 0x6ea   : > { %v7503_v12 = vpop.permute.xlu1 %7502  ;;  %v7513_v3 = vpop.permute.xlu0 %7512  ;;  %v7540_v33 = vunpack.i.h.bf16 %v10561_v56  ;;  %v7539_v52 = vunpack.i.l.bf16 %v10561_v56 }
 0x6eb   : > { %v7505_v27 = vunpack.i.h.bf16 %v7503_v12  ;;  %v7504_v61 = vunpack.i.l.bf16 %v7503_v12  ;;  %v7515_v19 = vunpack.i.h.bf16 %v7513_v3  ;;  %v7514_v59 = vunpack.i.l.bf16 %v7513_v3 }
 0x6ed   : > { %v5413_v23 = vsel %vm868_vm1, %v5381_v58, %v7504_v61  ;;  %v5414_v4 = vsel %vm868_vm1, %v5382_v30, %v7505_v27  ;;  %v4276_v27 = vld [vmem:[#allocation3 + $0x19a] sm:$0xff]  ;;  %v4277_v61 = vld [vmem:[#allocation3 + $0x1a2] sm:$0xff] }
 0x6ee   : > { %v5446_v46 = vsel %vm5431_vm12, %v5413_v23, %v7509_v0  ;;  %v5447_v34 = vsel %vm5431_vm12, %v5414_v4, %v7510_v60 }
 0x6ef   : > { %7717 = vrot.lane.b32.xlu2 %v7701_v11, %s7798_s19  ;;  %v5478_v10 = vsel %vm2487_vm3, %v5446_v46, %v7514_v59  ;;  %v5479_v13 = vsel %vm2487_vm3, %v5447_v34, %v7515_v19  ;;  %v7761_v46 = vpack.i.bf16 %v4277_v61, %v4276_v27 }
 0x6f0   : > { %7727 = vrot.lane.b32.xlu1 %v7726_v7, %s7799_s20  ;;  %7737 = vrot.lane.b32.xlu0 %v7721_v35, %s7797_s28 }
 0x6f1   : > { %v7553_v36 = vpop.permute.xlu2 %7552 }
 0x6f2   : > { %v7518_v25 = vpop.permute.xlu1 %7517  ;;  %v7528_v5 = vpop.permute.xlu0 %7527  ;;  %v7555_v58 = vunpack.i.h.bf16 %v7553_v36 }
 0x6f3   : > { %v7520_v2 = vunpack.i.h.bf16 %v7518_v25  ;;  %v7519_v29 = vunpack.i.l.bf16 %v7518_v25  ;;  %v7530_v38 = vunpack.i.h.bf16 %v7528_v5  ;;  %v7529_v15 = vunpack.i.l.bf16 %v7528_v5 }
 0x6f5   : > { %v5511_v40 = vsel %vm5496_vm13, %v5478_v10, %v7519_v29  ;;  %v5512_v20 = vsel %vm5496_vm13, %v5479_v13, %v7520_v2  ;;  %v5384_v11 = vsel %vm5366_vm11, %v10102_v49, %v7530_v38  ;;  %v5383_v31 = vsel %vm5366_vm11, %v10105_v32, %v7529_v15  ;;  %v10601_v32 = vld [vmem:[%s10932_s13] ss:$0 sm:$0xff] }
 0x6f6   : > { %v5543_v55 = vsel %vm2520_vm4, %v5511_v40, %v7524_v17  ;;  %v5544_v50 = vsel %vm2520_vm4, %v5512_v20, %v7525_v18 }
 0x6f7   : > { %v5568_v28 = vpack.c.bf16 %v5544_v50, %v5543_v55  ;;  %7732 = vrot.lane.b32.xlu2 %v7731_v39, %s7792_s29 }
 0x6f8   : > { %7742 = vrot.lane.b32.xlu1 %v7726_v7, %s7790_s23  ;;  %7752 = vrot.lane.b32.xlu0 %v7751_v8, %s7793_s30  ;;  %v7554_v7 = vunpack.i.l.bf16 %v7553_v36 }
 0x6f9   : > { %6377 = vmatmul.msk.bf16.gmra.mxu0 %vm5617_vm14, %v5568_v28  ;;  %v7568_v42 = vpop.permute.xlu2 %7567 }
 0x6fa   : > { %v7533_v26 = vpop.permute.xlu1 %7532  ;;  %v7543_v48 = vpop.permute.xlu0 %7542  ;;  %v7570_v28 = vunpack.i.h.bf16 %v7568_v42  ;;  %v7569_v38 = vunpack.i.l.bf16 %v7568_v42 }
 0x6fb   : > { %v7535_v14 = vunpack.i.h.bf16 %v7533_v26  ;;  %v7534_v24 = vunpack.i.l.bf16 %v7533_v26  ;;  %v7545_v3 = vunpack.i.h.bf16 %v7543_v48  ;;  %v7544_v9 = vunpack.i.l.bf16 %v7543_v48 }
 0x6fd   : > { %v5415_v57 = vsel %vm868_vm1, %v5383_v31, %v7534_v24  ;;  %v5416_v35 = vsel %vm868_vm1, %v5384_v11, %v7535_v14 }
 0x6fe   : > { %v5679_v47 = vpop.f32.mrf.mxu0  ;;  %v5448_v12 = vsel %vm5431_vm12, %v5415_v57, %v7539_v52  ;;  %v5449_v49 = vsel %vm5431_vm12, %v5416_v35, %v7540_v33 }
 0x6ff   : > { %7747 = vrot.lane.b32.xlu2 %v7731_v39, %s7798_s19  ;;  %v5480_v60 = vsel %vm2487_vm3, %v5448_v12, %v7544_v9  ;;  %v5481_v0 = vsel %vm2487_vm3, %v5449_v49, %v7545_v3  ;;  %v5680_v34 = vadd.f32 %v10601_v32, %v5679_v47 }
 0x700   : > { %7757 = vrot.lane.b32.xlu1 %v7756_v62, %s7799_s20  ;;  %s6406_s20 = sshll.u32 %s10984_s22, 8 }
 0x701   : > { %v7583_v4 = vpop.permute.xlu2 %7582  ;;  %v5759_v5 = vmax.f32 %v5680_v34, 0.0  ;;  %s10759_s27 = scalar_lea.vmem %s10935_s16, %s6406_s20 }
 0x702   : > { %v7548_v30 = vpop.permute.xlu1 %7547  ;;  %v7558_v23 = vpop.permute.xlu0 %7557  ;;  %v7584_v11 = vunpack.i.l.bf16 %v7583_v4 }
 0x703   : > { %v7550_v56 = vunpack.i.h.bf16 %v7548_v30  ;;  %v7549_v22 = vunpack.i.l.bf16 %v7548_v30  ;;  %v7560_v36 = vunpack.i.h.bf16 %v7558_v23  ;;  %v7559_v37 = vunpack.i.l.bf16 %v7558_v23 }
 0x705   : > { %v5513_v19 = vsel %vm5496_vm13, %v5480_v60, %v7549_v22  ;;  %v5514_v59 = vsel %vm5496_vm13, %v5481_v0, %v7550_v56  ;;  %v5386_v8 = vsel %vm5366_vm11, %v10133_v6, %v7560_v36  ;;  %v5385_v39 = vsel %vm5366_vm11, %v10130_v21, %v7559_v37 }
 0x706   : > { %v5681_v25 = vpop.f32.mrf.mxu0  ;;  %v5545_v45 = vsel %vm2520_vm4, %v5513_v19, %v7554_v7  ;;  %v5546_v1 = vsel %vm2520_vm4, %v5514_v59, %v7555_v58  ;;  %v7585_v21 = vunpack.i.h.bf16 %v7583_v4 }
 0x707   : > { %v5682_v2 = vadd.f32 %v10601_v32, %v5681_v25  ;;  %v5569_v29 = vpack.c.bf16 %v5546_v1, %v5545_v45  ;;  %7762 = vrot.lane.b32.xlu2 %v7761_v46, %s7792_s29 }
 0x709   : > { %v5760_v54 = vmax.f32 %v5682_v2, 0.0  ;;  %6378 = vmatmul.msk.bf16.gmra.mxu0 %vm5617_vm14, %v5569_v29  ;;  %v7598_v20 = vpop.permute.xlu2 %7597 }
 0x70a   : > { %v7563_v18 = vpop.permute.xlu1 %7562  ;;  %v7573_v40 = vpop.permute.xlu0 %7572  ;;  %v7600_v0 = vunpack.i.h.bf16 %v7598_v20  ;;  %v7599_v46 = vunpack.i.l.bf16 %v7598_v20 }
 0x70b   : > { %v5791_v17 = vpack.c.bf16 %v5760_v54, %v5759_v5  ;;  %v7565_v10 = vunpack.i.h.bf16 %v7563_v18  ;;  %v7564_v13 = vunpack.i.l.bf16 %v7563_v18  ;;  %v7575_v43 = vunpack.i.h.bf16 %v7573_v40 }
 0x70c   : > { %v7574_v26 = vunpack.i.l.bf16 %v7573_v40 }
 0x70d   : > { %6386 = vmatmul.msk.bf16.vlgmr.msrb.gmra.mxu3 %vm3900_vm8, %v5791_v17  ;;  %v5417_v55 = vsel %vm868_vm1, %v5385_v39, %v7564_v13  ;;  %v5418_v50 = vsel %vm868_vm1, %v5386_v8, %v7565_v10 }
 0x70e   : > { %v5450_v15 = vsel %vm5431_vm12, %v5417_v55, %v7569_v38  ;;  %v5451_v53 = vsel %vm5431_vm12, %v5418_v50, %v7570_v28 }
 0x70f   : > { %v5482_v31 = vsel %vm2487_vm3, %v5450_v15, %v7574_v26  ;;  %v5483_v57 = vsel %vm2487_vm3, %v5451_v53, %v7575_v43 }
 0x711   : > { %v7613_v62 = vpop.permute.xlu2 %7612 }
 0x712   : > { %v7578_v14 = vpop.permute.xlu1 %7577  ;;  %v7588_v48 = vpop.permute.xlu0 %7587  ;;  %v7615_v54 = vunpack.i.h.bf16 %v7613_v62  ;;  %v7614_v18 = vunpack.i.l.bf16 %v7613_v62 }
 0x713   : > { %v7580_v24 = vunpack.i.h.bf16 %v7578_v14  ;;  %v7579_v6 = vunpack.i.l.bf16 %v7578_v14  ;;  %v7590_v49 = vunpack.i.h.bf16 %v7588_v48  ;;  %v7589_v27 = vunpack.i.l.bf16 %v7588_v48 }
 0x715   : > { %v5515_v35 = vsel %vm5496_vm13, %v5482_v31, %v7579_v6  ;;  %v5516_v42 = vsel %vm5496_vm13, %v5483_v57, %v7580_v24  ;;  %v5388_v56 = vsel %vm5366_vm11, %v10169_v44, %v7590_v49  ;;  %v5387_v22 = vsel %vm5366_vm11, %v10166_v63, %v7589_v27 }
 0x716   : > { %v5684_v47 = vpop.f32.mrf.mxu0  ;;  %v5547_v33 = vsel %vm2520_vm4, %v5515_v35, %v7584_v11  ;;  %v5548_v52 = vsel %vm2520_vm4, %v5516_v42, %v7585_v21 }
 0x717   : > { %v5570_v12 = vpack.c.bf16 %v5548_v52, %v5547_v33  ;;  %v5685_v23 = vadd.f32 %v10601_v32, %v5684_v47 }
 0x719   : > { %6379 = vmatmul.msk.bf16.gmra.mxu0 %vm5617_vm14, %v5570_v12  ;;  %v7628_v58 = vpop.permute.xlu2 %7627  ;;  %v5761_v19 = vmax.f32 %v5685_v23, 0.0 }
 0x71a   : > { %v7593_v61 = vpop.permute.xlu1 %7592  ;;  %v7603_v30 = vpop.permute.xlu0 %7602  ;;  %v7630_v11 = vunpack.i.h.bf16 %v7628_v58  ;;  %v7629_v31 = vunpack.i.l.bf16 %v7628_v58 }
 0x71b   : > { %v7595_v3 = vunpack.i.h.bf16 %v7593_v61  ;;  %v7594_v9 = vunpack.i.l.bf16 %v7593_v61  ;;  %v7605_v45 = vunpack.i.h.bf16 %v7603_v30  ;;  %v7604_v1 = vunpack.i.l.bf16 %v7603_v30 }
 0x71d   : > { %v5419_v4 = vsel %vm868_vm1, %v5387_v22, %v7594_v9  ;;  %v5420_v7 = vsel %vm868_vm1, %v5388_v56, %v7595_v3 }
 0x71e   : > { %v5686_v60 = vpop.f32.mrf.mxu0  ;;  %v5452_v59 = vsel %vm5431_vm12, %v5419_v4, %v7599_v46  ;;  %v5453_v25 = vsel %vm5431_vm12, %v5420_v7, %v7600_v0 }
 0x71f   : > { %v5687_v34 = vadd.f32 %v10601_v32, %v5686_v60  ;;  %v5484_v17 = vsel %vm2487_vm3, %v5452_v59, %v7604_v1  ;;  %v5485_v10 = vsel %vm2487_vm3, %v5453_v25, %v7605_v45  ;;  %v10968_v1 = vld [vmem:[#allocation12_spill] sm:$0xff] }
 0x721   : > { %v5762_v44 = vmax.f32 %v5687_v34, 0.0  ;;  %v7643_v37 = vpop.permute.xlu2 %7642 }
 0x722   : > { %v7608_v63 = vpop.permute.xlu1 %7607  ;;  %v7618_v36 = vpop.permute.xlu0 %7617  ;;  %v7645_v3 = vunpack.i.h.bf16 %v7643_v37  ;;  %v7644_v9 = vunpack.i.l.bf16 %v7643_v37 }
 0x723   : > { %v5792_v2 = vpack.c.bf16 %v5762_v44, %v5761_v19  ;;  %v7610_v29 = vunpack.i.h.bf16 %v7608_v63  ;;  %v7609_v5 = vunpack.i.l.bf16 %v7608_v63  ;;  %v7620_v50 = vunpack.i.h.bf16 %v7618_v36 }
 0x724   : > { %v7619_v28 = vunpack.i.l.bf16 %v7618_v36 }
 0x725   : > { %v5517_v13 = vsel %vm5496_vm13, %v5484_v17, %v7609_v5  ;;  %v5518_v40 = vsel %vm5496_vm13, %v5485_v10, %v7610_v29  ;;  %6387 = vmatmul.msk.bf16.gmra.mxu3 %vm3900_vm8, %v5792_v2  ;;  %v5390_v14 = vsel %vm5366_vm11, %v10191_v51, %v7620_v50 }
 0x726   : > { %v5689_v20 = vpop.f32.mrf.mxu0  ;;  %v5549_v8 = vsel %vm2520_vm4, %v5517_v13, %v7614_v18  ;;  %v5550_v39 = vsel %vm2520_vm4, %v5518_v40, %v7615_v54  ;;  %v5389_v24 = vsel %vm5366_vm11, %v10194_v16, %v7619_v28 }
 0x727   : > { %v5571_v55 = vpack.c.bf16 %v5550_v39, %v5549_v8  ;;  %v5690_v6 = vadd.f32 %v10601_v32, %v5689_v20 }
 0x729   : > { %6380 = vmatmul.msk.bf16.gmra.mxu0 %vm5617_vm14, %v5571_v55  ;;  %v7658_v26 = vpop.permute.xlu2 %7657  ;;  %v5763_v35 = vmax.f32 %v5690_v6, 0.0 }
 0x72a   : > { %v7623_v38 = vpop.permute.xlu1 %7622  ;;  %v7633_v43 = vpop.permute.xlu0 %7632  ;;  %v7660_v37 = vunpack.i.h.bf16 %v7658_v26  ;;  %v7659_v54 = vunpack.i.l.bf16 %v7658_v26 }
 0x72b   : > { %v7625_v15 = vunpack.i.h.bf16 %v7623_v38  ;;  %v7624_v53 = vunpack.i.l.bf16 %v7623_v38  ;;  %v7635_v33 = vunpack.i.h.bf16 %v7633_v43  ;;  %v7634_v52 = vunpack.i.l.bf16 %v7633_v43 }
 0x72d   : > { %v5421_v48 = vsel %vm868_vm1, %v5389_v24, %v7624_v53  ;;  %v5422_v62 = vsel %vm868_vm1, %v5390_v14, %v7625_v15 }
 0x72e   : > { %v5691_v21 = vpop.f32.mrf.mxu0  ;;  %v5454_v42 = vsel %vm5431_vm12, %v5421_v48, %v7629_v31  ;;  %v5455_v47 = vsel %vm5431_vm12, %v5422_v62, %v7630_v11 }
 0x72f   : > { %v5692_v57 = vadd.f32 %v10601_v32, %v5691_v21  ;;  %v5486_v30 = vsel %vm2487_vm3, %v5454_v42, %v7634_v52  ;;  %v5487_v58 = vsel %vm2487_vm3, %v5455_v47, %v7635_v33  ;;  %v10969_v33 = vld [vmem:[#allocation14_spill] sm:$0xff] }
 0x731   : > { %v5764_v51 = vmax.f32 %v5692_v57, 0.0  ;;  %v7673_v23 = vpop.permute.xlu2 %7672 }
 0x732   : > { %v7638_v16 = vpop.permute.xlu1 %7637  ;;  %v7648_v61 = vpop.permute.xlu0 %7647  ;;  %v7675_v15 = vunpack.i.h.bf16 %v7673_v23  ;;  %v7674_v53 = vunpack.i.l.bf16 %v7673_v23 }
 0x733   : > { %v5793_v12 = vpack.c.bf16 %v5764_v51, %v5763_v35  ;;  %v7640_v49 = vunpack.i.h.bf16 %v7638_v16  ;;  %v7639_v27 = vunpack.i.l.bf16 %v7638_v16  ;;  %v7650_v46 = vunpack.i.h.bf16 %v7648_v61  ;;  %v10970_v16 = vld [vmem:[#allocation13_spill] sm:$0xff] }
 0x734   : > { %v7649_v34 = vunpack.i.l.bf16 %v7648_v61 }
 0x735   : > { %v5519_v56 = vsel %vm5496_vm13, %v5486_v30, %v7639_v27  ;;  %v5520_v22 = vsel %vm5496_vm13, %v5487_v58, %v7640_v49  ;;  %6388 = vmatmul.msk.bf16.gmra.mxu3 %vm3900_vm8, %v5793_v12  ;;  %v5392_v45 = vsel %vm5366_vm11, %v10221_v41, %v7650_v46 }
 0x736   : > { %v5694_v4 = vpop.f32.mrf.mxu0  ;;  %v5551_v7 = vsel %vm2520_vm4, %v5519_v56, %v7644_v9  ;;  %v5552_v60 = vsel %vm2520_vm4, %v5520_v22, %v7645_v3  ;;  %v5391_v63 = vsel %vm5366_vm11, %v10968_v1, %v7649_v34 }
 0x737   : > { %v5572_v0 = vpack.c.bf16 %v5552_v60, %v5551_v7  ;;  %v5695_v2 = vadd.f32 %v10601_v32, %v5694_v4 }
 0x739   : > { %6381 = vmatmul.msk.bf16.gmra.mxu0 %vm5617_vm14, %v5572_v0  ;;  %v7688_v18 = vpop.permute.xlu2 %7687  ;;  %v5765_v10 = vmax.f32 %v5695_v2, 0.0 }
 0x73a   : > { %v7653_v19 = vpop.permute.xlu1 %7652  ;;  %v7663_v44 = vpop.permute.xlu0 %7662  ;;  %v7690_v9 = vunpack.i.h.bf16 %v7688_v18  ;;  %v7689_v30 = vunpack.i.l.bf16 %v7688_v18 }
 0x73b   : > { %v7655_v59 = vunpack.i.h.bf16 %v7653_v19  ;;  %v7654_v25 = vunpack.i.l.bf16 %v7653_v19  ;;  %v7665_v20 = vunpack.i.h.bf16 %v7663_v44  ;;  %v7664_v8 = vunpack.i.l.bf16 %v7663_v44 }
 0x73d   : > { %v5423_v29 = vsel %vm868_vm1, %v5391_v63, %v7654_v25  ;;  %v5424_v5 = vsel %vm868_vm1, %v5392_v45, %v7655_v59 }
 0x73e   : > { %v5696_v36 = vpop.f32.mrf.mxu0  ;;  %v5456_v13 = vsel %vm5431_vm12, %v5423_v29, %v7659_v54  ;;  %v5457_v41 = vsel %vm5431_vm12, %v5424_v5, %v7660_v37 }
 0x73f   : > { %v5697_v17 = vadd.f32 %v10601_v32, %v5696_v36  ;;  %v5488_v43 = vsel %vm2487_vm3, %v5456_v13, %v7664_v8  ;;  %v5489_v26 = vsel %vm2487_vm3, %v5457_v41, %v7665_v20  ;;  %v10971_v20 = vld [vmem:[#allocation15_spill] sm:$0xff] }
 0x741   : > { %v5766_v40 = vmax.f32 %v5697_v17, 0.0  ;;  %v7703_v57 = vpop.permute.xlu2 %7702 }
 0x742   : > { %v7668_v39 = vpop.permute.xlu1 %7667  ;;  %v7678_v38 = vpop.permute.xlu0 %7677  ;;  %v7705_v44 = vunpack.i.h.bf16 %v7703_v57  ;;  %v7704_v45 = vunpack.i.l.bf16 %v7703_v57 }
 0x743   : > { %v5794_v55 = vpack.c.bf16 %v5766_v40, %v5765_v10  ;;  %v7670_v50 = vunpack.i.h.bf16 %v7668_v39  ;;  %v7669_v28 = vunpack.i.l.bf16 %v7668_v39  ;;  %v7680_v11 = vunpack.i.h.bf16 %v7678_v38  ;;  %v10972_v39 = vld [vmem:[#allocation16_spill] sm:$0xff] }
 0x744   : > { %v7679_v31 = vunpack.i.l.bf16 %v7678_v38 }
 0x745   : > { %v5521_v14 = vsel %vm5496_vm13, %v5488_v43, %v7669_v28  ;;  %v5522_v24 = vsel %vm5496_vm13, %v5489_v26, %v7670_v50  ;;  %6389 = vmatmul.msk.bf16.gmra.mxu3 %vm3900_vm8, %v5794_v55  ;;  %v5394_v52 = vsel %vm5366_vm11, %v10969_v33, %v7680_v11 }
 0x746   : > { %v5699_v6 = vpop.f32.mrf.mxu0  ;;  %v5553_v48 = vsel %vm2520_vm4, %v5521_v14, %v7674_v53  ;;  %v5554_v62 = vsel %vm2520_vm4, %v5522_v24, %v7675_v15  ;;  %v5393_v12 = vsel %vm5366_vm11, %v10970_v16, %v7679_v31 }
 0x747   : > { %v5573_v21 = vpack.c.bf16 %v5554_v62, %v5553_v48  ;;  %v5700_v49 = vadd.f32 %v10601_v32, %v5699_v6 }
 0x749   : > { %6382 = vmatmul.msk.bf16.gmra.mxu0 %vm5617_vm14, %v5573_v21  ;;  %v5767_v56 = vmax.f32 %v5700_v49, 0.0  ;;  %v7718_v46 = vpop.permute.xlu2 %7717 }
 0x74a   : > { %v7683_v35 = vpop.permute.xlu1 %7682  ;;  %v7693_v51 = vpop.permute.xlu0 %7692  ;;  %v7720_v43 = vunpack.i.h.bf16 %v7718_v46  ;;  %v7719_v26 = vunpack.i.l.bf16 %v7718_v46 }
 0x74b   : > { %v7685_v42 = vunpack.i.h.bf16 %v7683_v35  ;;  %v7684_v47 = vunpack.i.l.bf16 %v7683_v35  ;;  %v7695_v7 = vunpack.i.h.bf16 %v7693_v51  ;;  %v7694_v60 = vunpack.i.l.bf16 %v7693_v51 }
 0x74d   : > { %v5425_v27 = vsel %vm868_vm1, %v5393_v12, %v7684_v47  ;;  %v5426_v61 = vsel %vm868_vm1, %v5394_v52, %v7685_v42 }
 0x74e   : > { %v5701_v3 = vpop.f32.mrf.mxu0  ;;  %v5458_v22 = vsel %vm5431_vm12, %v5425_v27, %v7689_v30  ;;  %v5459_v23 = vsel %vm5431_vm12, %v5426_v61, %v7690_v9 }
 0x74f   : > { %v5702_v58 = vadd.f32 %v10601_v32, %v5701_v3  ;;  %v5490_v1 = vsel %vm2487_vm3, %v5458_v22, %v7694_v60  ;;  %v5491_v63 = vsel %vm2487_vm3, %v5459_v23, %v7695_v7  ;;  %v10973_v7 = vld [vmem:[#allocation18_spill] sm:$0xff] }
 0x751   : > { %v5768_v4 = vmax.f32 %v5702_v58, 0.0  ;;  %v7733_v50 = vpop.permute.xlu2 %7732 }
 0x752   : > { %v7698_v0 = vpop.permute.xlu1 %7697  ;;  %v7708_v25 = vpop.permute.xlu0 %7707  ;;  %v7735_v47 = vunpack.i.h.bf16 %v7733_v50  ;;  %v7734_v51 = vunpack.i.l.bf16 %v7733_v50 }
 0x753   : > { %v5795_v34 = vpack.c.bf16 %v5768_v4, %v5767_v56  ;;  %v7700_v19 = vunpack.i.h.bf16 %v7698_v0  ;;  %v7699_v59 = vunpack.i.l.bf16 %v7698_v0  ;;  %v7710_v18 = vunpack.i.h.bf16 %v7708_v25  ;;  %v10974_v0 = vld [vmem:[#allocation17_spill] sm:$0xff] }
 0x754   : > { %v7709_v17 = vunpack.i.l.bf16 %v7708_v25 }
 0x755   : > { %v5523_v2 = vsel %vm5496_vm13, %v5490_v1, %v7699_v59  ;;  %v5524_v29 = vsel %vm5496_vm13, %v5491_v63, %v7700_v19  ;;  %6390 = vmatmul.msk.bf16.gmra.mxu3 %vm3900_vm8, %v5795_v34  ;;  %v5396_v8 = vsel %vm5366_vm11, %v10971_v20, %v7710_v18 }
 0x756   : > { %v5704_v5 = vpop.f32.mrf.mxu0  ;;  %v5555_v36 = vsel %vm2520_vm4, %v5523_v2, %v7704_v45  ;;  %v5556_v37 = vsel %vm2520_vm4, %v5524_v29, %v7705_v44  ;;  %v5395_v55 = vsel %vm5366_vm11, %v10972_v39, %v7709_v17 }
 0x757   : > { %v5574_v54 = vpack.c.bf16 %v5556_v37, %v5555_v36  ;;  %v5705_v28 = vadd.f32 %v10601_v32, %v5704_v5 }
 0x759   : > { %6383 = vmatmul.msk.bf16.gmra.mxu0 %vm5617_vm14, %v5574_v54  ;;  %v5769_v24 = vmax.f32 %v5705_v28, 0.0  ;;  %v7748_v9 = vpop.permute.xlu2 %7747 }
 0x75a   : > { %v7713_v10 = vpop.permute.xlu1 %7712  ;;  %v7723_v40 = vpop.permute.xlu0 %7722  ;;  %v7750_v45 = vunpack.i.h.bf16 %v7748_v9  ;;  %v7749_v1 = vunpack.i.l.bf16 %v7748_v9 }
 0x75b   : > { %v7715_v13 = vunpack.i.h.bf16 %v7713_v10  ;;  %v7714_v41 = vunpack.i.l.bf16 %v7713_v10  ;;  %v7725_v21 = vunpack.i.h.bf16 %v7723_v40  ;;  %v7724_v11 = vunpack.i.l.bf16 %v7723_v40 }
 0x75d   : > { %v5427_v38 = vsel %vm868_vm1, %v5395_v55, %v7714_v41  ;;  %v5428_v15 = vsel %vm868_vm1, %v5396_v8, %v7715_v13 }
 0x75e   : > { %v5706_v53 = vpop.f32.mrf.mxu0  ;;  %v5460_v6 = vsel %vm5431_vm12, %v5427_v38, %v7719_v26  ;;  %v5461_v48 = vsel %vm5431_vm12, %v5428_v15, %v7720_v43 }
 0x75f   : > { %v5707_v14 = vadd.f32 %v10601_v32, %v5706_v53  ;;  %v5492_v33 = vsel %vm2487_vm3, %v5460_v6, %v7724_v11  ;;  %v5493_v52 = vsel %vm2487_vm3, %v5461_v48, %v7725_v21  ;;  %v10743_v21 = vld [vmem:[%s10930_s11] ss:$0 sm:$0xff] }
 0x761   : > { %v5770_v62 = vmax.f32 %v5707_v14, 0.0  ;;  %v7763_v2 = vpop.permute.xlu2 %7762 }
 0x762   : > { %v7728_v31 = vpop.permute.xlu1 %7727  ;;  %v7738_v49 = vpop.permute.xlu0 %7737  ;;  %v7765_v10 = vunpack.i.h.bf16 %v7763_v2  ;;  %v7764_v13 = vunpack.i.l.bf16 %v7763_v2 }
 0x763   : > { %v5796_v57 = vpack.c.bf16 %v5770_v62, %v5769_v24  ;;  %v7730_v35 = vunpack.i.h.bf16 %v7728_v31  ;;  %v7729_v42 = vunpack.i.l.bf16 %v7728_v31  ;;  %v7740_v58 = vunpack.i.h.bf16 %v7738_v49  ;;  %v10749_v31 = vld [vmem:[%s10934_s15] ss:$0 sm:$0xff] }
 0x764   : > { %v7739_v56 = vunpack.i.l.bf16 %v7738_v49 }
 0x765   : > { %v5525_v16 = vsel %vm5496_vm13, %v5492_v33, %v7729_v42  ;;  %v5526_v12 = vsel %vm5496_vm13, %v5493_v52, %v7730_v35  ;;  %6391 = vmatmul.msk.bf16.gmra.mxu3 %vm3900_vm8, %v5796_v57  ;;  %v5398_v60 = vsel %vm5366_vm11, %v10973_v7, %v7740_v58 }
 0x766   : > { %v5709_v27 = vpop.f32.mrf.mxu0  ;;  %v5557_v61 = vsel %vm2520_vm4, %v5525_v16, %v7734_v51  ;;  %v5558_v3 = vsel %vm2520_vm4, %v5526_v12, %v7735_v47  ;;  %v5397_v46 = vsel %vm5366_vm11, %v10974_v0, %v7739_v56  ;;  %v10975_v47 = vld [vmem:[#allocation5_spill] sm:$0xff] }
 0x767   : > { %v5575_v30 = vpack.c.bf16 %v5558_v3, %v5557_v61  ;;  %v5710_v34 = vadd.f32 %v10601_v32, %v5709_v27  ;;  %v3821_v51 = vadd.f32 %v10743_v21, %v10975_v47  ;;  %v10976_v3 = vld [vmem:[#allocation6_spill] sm:$0xff] }
 0x768   : > { %v3823_v9 = vadd.f32 %v10743_v21, %v10976_v3 }
 0x769   : > { %6384 = vmatmul.msk.bf16.gmra.mxu0 %vm5617_vm14, %v5575_v30  ;;  %v5771_v36 = vmax.f32 %v5710_v34, 0.0 }
 0x76a   : > { %v7743_v22 = vpop.permute.xlu1 %7742  ;;  %v7753_v19 = vpop.permute.xlu0 %7752 }
 0x76b   : > { %v7745_v23 = vunpack.i.h.bf16 %v7743_v22  ;;  %v7744_v4 = vunpack.i.l.bf16 %v7743_v22  ;;  %v7755_v29 = vunpack.i.h.bf16 %v7753_v19  ;;  %v7754_v5 = vunpack.i.l.bf16 %v7753_v19  ;;  %v10977_v19 = vld [vmem:[#allocation4_spill] sm:$0xff] }
 0x76d   : > { %v5429_v59 = vsel %vm868_vm1, %v5397_v46, %v7744_v4  ;;  %v5430_v25 = vsel %vm868_vm1, %v5398_v60, %v7745_v23  ;;  %v3840_v46 = vpop.f32.mrf.mxu2 }
 0x76e   : > { %v5711_v44 = vpop.f32.mrf.mxu0  ;;  %v5462_v37 = vsel %vm5431_vm12, %v5429_v59, %v7749_v1  ;;  %v5463_v54 = vsel %vm5431_vm12, %v5430_v25, %v7750_v45  ;;  %v3826_v59 = vadd.f32 %v10743_v21, %v10977_v19 }
 0x76f   : > { %v5712_v63 = vadd.f32 %v10601_v32, %v5711_v44  ;;  %v5494_v8 = vsel %vm2487_vm3, %v5462_v37, %v7754_v5  ;;  %v5495_v39 = vsel %vm2487_vm3, %v5463_v54, %v7755_v29  ;;  %v10978_v29 = vld [vmem:[#allocation7_spill] sm:$0xff] }
 0x770   : > { %v3828_v5 = vadd.f32 %v10743_v21, %v10978_v29 }
 0x771   : > { %v5772_v18 = vmax.f32 %v5712_v63, 0.0 }
 0x772   : > { %v7758_v17 = vpop.permute.xlu1 %7757 }
 0x773   : > { %v5797_v41 = vpack.c.bf16 %v5772_v18, %v5771_v36  ;;  %v7760_v40 = vunpack.i.h.bf16 %v7758_v17  ;;  %v7759_v20 = vunpack.i.l.bf16 %v7758_v17 }
 0x775   : > { %v5527_v55 = vsel %vm5496_vm13, %v5494_v8, %v7759_v20  ;;  %v5528_v50 = vsel %vm5496_vm13, %v5495_v39, %v7760_v40  ;;  %6392 = vmatmul.msk.bf16.gmra.mxu3 %vm3900_vm8, %v5797_v41  ;;  %v3842_v18 = vpop.f32.mrf.mxu2  ;;  %v10979_v40 = vld [vmem:[#allocation8_spill] sm:$0xff] }
 0x776   : > { %v5559_v28 = vsel %vm2520_vm4, %v5527_v55, %v7764_v13  ;;  %v5560_v38 = vsel %vm2520_vm4, %v5528_v50, %v7765_v10  ;;  %v5714_v15 = vpop.f32.mrf.mxu0  ;;  %v3831_v20 = vadd.f32 %v10743_v21, %v10979_v40 }
 0x777   : > { %v5576_v53 = vpack.c.bf16 %v5560_v38, %v5559_v28  ;;  %v5715_v43 = vadd.f32 %v10601_v32, %v5714_v15 }
 0x779   : > { %6385 = vmatmul.msk.bf16.gmra.mxu0 %vm5617_vm14, %v5576_v53  ;;  %v5773_v24 = vmax.f32 %v5715_v43, 0.0  ;;  %v10980_v53 = vld [vmem:[#allocation9_spill] sm:$0xff] }
 0x77a   : > { %v3833_v43 = vadd.f32 %v10743_v21, %v10980_v53 }
 0x77d   : > { %v3845_v55 = vpop.f32.mrf.mxu2 }
 0x77e   : > { %v5716_v26 = vpop.f32.mrf.mxu0 }
 0x77f   : > { %v5717_v14 = vadd.f32 %v10601_v32, %v5716_v26 }
 0x781   : > { %v5774_v6 = vmax.f32 %v5717_v14, 0.0 }
 0x783   : > { %v5798_v48 = vpack.c.bf16 %v5774_v6, %v5773_v24 }
 0x785   : > { %6393 = vmatmul.msk.bf16.gmra.mxu3 %vm3900_vm8, %v5798_v48 }
 0x786   : > { %v5719_v62 = vpop.f32.mrf.mxu0 }
 0x787   : > { %v5720_v11 = vadd.f32 %v10601_v32, %v5719_v62  ;;  %v3847_v62 = vpop.f32.mrf.mxu2 }
 0x789   : > { %v5775_v33 = vmax.f32 %v5720_v11, 0.0 }
 0x78e   : > { %v5721_v57 = vpop.f32.mrf.mxu0 }
 0x78f   : > { %v5722_v35 = vadd.f32 %v10601_v32, %v5721_v57 }
 0x790   : > { %v5872_v42 = vpop.f32.mrf.mxu3 }
 0x791   : > { %v5776_v52 = vmax.f32 %v5722_v35, 0.0  ;;  %v5873_v16 = vadd.f32 %v10749_v31, %v5872_v42  ;;  %v10981_v35 = vld [vmem:[#allocation10_spill] sm:$0xff] }
 0x792   : > { %v3836_v42 = vadd.f32 %v10743_v21, %v10981_v35 }
 0x793   : > { %v5799_v12 = vpack.c.bf16 %v5776_v52, %v5775_v33  ;;  %v5952_v49 = vadd.f32 %v5873_v16, %v3821_v51 }
 0x795   : > { %5984 = vst.msk [vmem:[%s10759_s27] sm:$0xff] %vm799_vm0, %v5952_v49  ;;  %6394 = vmatmul.msk.bf16.gmra.mxu3 %vm3900_vm8, %v5799_v12  ;;  %v3850_v12 = vpop.f32.mrf.mxu2 }
 0x796   : > { %v5724_v27 = vpop.f32.mrf.mxu0 }
 0x797   : > { %v5725_v56 = vadd.f32 %v10601_v32, %v5724_v27  ;;  %v10982_v27 = vld [vmem:[#allocation11_spill] sm:$0xff] }
 0x798   : > { %v5874_v61 = vpop.f32.mrf.mxu3 }
 0x799   : > { %v5875_v30 = vadd.f32 %v10749_v31, %v5874_v61  ;;  %v5777_v4 = vmax.f32 %v5725_v56, 0.0  ;;  %v3838_v61 = vadd.f32 %v10743_v21, %v10982_v27 }
 0x79b   : > { %v5953_v58 = vadd.f32 %v5875_v30, %v3823_v9 }
 0x79d   : > { %5985 = vst.msk [vmem:[%s10759_s27 + $0x8] sm:$0xff] %vm799_vm0, %v5953_v58 }
 0x79e   : > { %v5726_v22 = vpop.f32.mrf.mxu0 }
 0x79f   : > { %v5727_v23 = vadd.f32 %v10601_v32, %v5726_v22 }
 0x7a1   : > { %v5778_v7 = vmax.f32 %v5727_v23, 0.0 }
 0x7a3   : > { %v5800_v60 = vpack.c.bf16 %v5778_v7, %v5777_v4  ;;  %v3841_v4 = vadd.f32 %v10743_v21, %v3840_v46 }
 0x7a5   : > { %6395 = vmatmul.msk.bf16.gmra.mxu3 %vm3900_vm8, %v5800_v60  ;;  %v3852_v60 = vpop.f32.mrf.mxu2 }
 0x7a6   : > { %v5729_v0 = vpop.f32.mrf.mxu0 }
 0x7a7   : > { %v5730_v45 = vadd.f32 %v10601_v32, %v5729_v0 }
 0x7a8   : > { %v5877_v34 = vpop.f32.mrf.mxu3 }
 0x7a9   : > { %v5878_v25 = vadd.f32 %v10749_v31, %v5877_v34  ;;  %v5779_v36 = vmax.f32 %v5730_v45, 0.0 }
 0x7ab   : > { %v5954_v44 = vadd.f32 %v5878_v25, %v3826_v59 }
 0x7ad   : > { %5986 = vst.msk [vmem:[%s10759_s27 + $0x10] sm:$0xff] %vm799_vm0, %v5954_v44  ;;  %v3843_v44 = vadd.f32 %v10743_v21, %v3842_v18  ;;  %v3855_v29 = vpop.f32.mrf.mxu2 }
 0x7ae   : > { %v5731_v1 = vpop.f32.mrf.mxu0 }
 0x7af   : > { %v5732_v63 = vadd.f32 %v10601_v32, %v5731_v1 }
 0x7b0   : > { %v5879_v2 = vpop.f32.mrf.mxu3 }
 0x7b1   : > { %v5780_v37 = vmax.f32 %v5732_v63, 0.0  ;;  %v5880_v54 = vadd.f32 %v10749_v31, %v5879_v2 }
 0x7b3   : > { %v5801_v17 = vpack.c.bf16 %v5780_v37, %v5779_v36  ;;  %v5955_v10 = vadd.f32 %v5880_v54, %v3828_v5  ;;  %v3846_v37 = vadd.f32 %v10743_v21, %v3845_v55 }
 0x7b5   : > { %5987 = vst.msk [vmem:[%s10759_s27 + $0x18] sm:$0xff] %vm799_vm0, %v5955_v10  ;;  %6396 = vmatmul.msk.bf16.gmra.mxu3 %vm3900_vm8, %v5801_v17  ;;  %v3857_v10 = vpop.f32.mrf.mxu2 }
 0x7b6   : > { %v5734_v13 = vpop.f32.mrf.mxu0 }
 0x7b7   : > { %v5735_v50 = vadd.f32 %v10601_v32, %v5734_v13 }
 0x7b8   : > { %v5882_v41 = vpop.f32.mrf.mxu3 }
 0x7b9   : > { %v5883_v8 = vadd.f32 %v10749_v31, %v5882_v41  ;;  %v5781_v26 = vmax.f32 %v5735_v50, 0.0 }
 0x7bb   : > { %v5956_v39 = vadd.f32 %v5883_v8, %v3831_v20  ;;  %v3848_v20 = vadd.f32 %v10743_v21, %v3847_v62 }
 0x7bd   : > { %5988 = vst.msk [vmem:[%s10759_s27 + $0x20] sm:$0xff] %vm799_vm0, %v5956_v39 }
 0x7be   : > { %v5736_v28 = vpop.f32.mrf.mxu0 }
 0x7bf   : > { %v5737_v38 = vadd.f32 %v10601_v32, %v5736_v28 }
 0x7c0   : > { %v5884_v15 = vpop.f32.mrf.mxu3 }
 0x7c1   : > { %v5782_v14 = vmax.f32 %v5737_v38, 0.0  ;;  %v5885_v24 = vadd.f32 %v10749_v31, %v5884_v15  ;;  %v3860_v15 = vpop.f32.mrf.mxu2 }
 0x7c3   : > { %v5802_v6 = vpack.c.bf16 %v5782_v14, %v5781_v26  ;;  %v5957_v48 = vadd.f32 %v5885_v24, %v3833_v43  ;;  %v3851_v43 = vadd.f32 %v10743_v21, %v3850_v12 }
 0x7c5   : > { %5989 = vst.msk [vmem:[%s10759_s27 + $0x28] sm:$0xff] %vm799_vm0, %v5957_v48  ;;  %6397 = vmatmul.msk.bf16.gmra.mxu3 %vm3900_vm8, %v5802_v6 }
 0x7c6   : > { %v5739_v11 = vpop.f32.mrf.mxu0 }
 0x7c7   : > { %v5740_v33 = vadd.f32 %v10601_v32, %v5739_v11  ;;  %v3853_v11 = vadd.f32 %v10743_v21, %v3852_v60 }
 0x7c8   : > { %v5887_v57 = vpop.f32.mrf.mxu3 }
 0x7c9   : > { %v5888_v47 = vadd.f32 %v10749_v31, %v5887_v57  ;;  %v5783_v3 = vmax.f32 %v5740_v33, 0.0 }
 0x7cb   : > { %v5958_v51 = vadd.f32 %v5888_v47, %v3836_v42  ;;  %v3862_v47 = vpop.f32.mrf.mxu2 }
 0x7cc   : > { %v3863_v60 = vadd.f32 %v10743_v21, %v3862_v47 }
 0x7cd   : > { %5990 = vst.msk [vmem:[%s10759_s27 + $0x30] sm:$0xff] %vm799_vm0, %v5958_v51 }
 0x7ce   : > { %v5741_v52 = vpop.f32.mrf.mxu0 }
 0x7cf   : > { %v5742_v16 = vadd.f32 %v10601_v32, %v5741_v52 }
 0x7d0   : > { %v5889_v49 = vpop.f32.mrf.mxu3 }
 0x7d1   : > { %v5784_v9 = vmax.f32 %v5742_v16, 0.0  ;;  %v5890_v30 = vadd.f32 %v10749_v31, %v5889_v49 }
 0x7d3   : > { %v5803_v58 = vpack.c.bf16 %v5784_v9, %v5783_v3  ;;  %v5959_v56 = vadd.f32 %v5890_v30, %v3838_v61  ;;  %v3865_v49 = vpop.f32.mrf.mxu2  ;;  %v3858_v61 = vadd.f32 %v10743_v21, %v3857_v10 }
 0x7d5   : > { %5991 = vst.msk [vmem:[%s10759_s27 + $0x38] sm:$0xff] %vm799_vm0, %v5959_v56  ;;  %6398 = vmatmul.msk.bf16.gmra.mxu3 %vm3900_vm8, %v5803_v58  ;;  %v3861_v56 = vadd.f32 %v10743_v21, %v3860_v15 }
 0x7d6   : > { %v5744_v22 = vpop.f32.mrf.mxu0 }
 0x7d7   : > { %v5745_v34 = vadd.f32 %v10601_v32, %v5744_v22 }
 0x7d8   : > { %v5892_v23 = vpop.f32.mrf.mxu3 }
 0x7d9   : > { %v5893_v7 = vadd.f32 %v10749_v31, %v5892_v23  ;;  %v5785_v45 = vmax.f32 %v5745_v34, 0.0 }
 0x7db   : > { %v5960_v0 = vadd.f32 %v5893_v7, %v3841_v4  ;;  %v3867_v30 = vpop.f32.mrf.mxu2 }
 0x7dd   : > { %5992 = vst.msk [vmem:[%s10759_s27 + $0x40] sm:$0xff] %vm799_vm0, %v5960_v0 }
 0x7de   : > { %v5746_v19 = vpop.f32.mrf.mxu0 }
 0x7df   : > { %v5747_v59 = vadd.f32 %v10601_v32, %v5746_v19 }
 0x7e0   : > { %v5894_v25 = vpop.f32.mrf.mxu3 }
 0x7e1   : > { %v5786_v1 = vmax.f32 %v5747_v59, 0.0  ;;  %v5895_v46 = vadd.f32 %v10749_v31, %v5894_v25  ;;  %v3866_v59 = vadd.f32 %v10743_v21, %v3865_v49 }
 0x7e3   : > { %v5804_v63 = vpack.c.bf16 %v5786_v1, %v5785_v45  ;;  %v5961_v2 = vadd.f32 %v5895_v46, %v3843_v44  ;;  %v3870_v4 = vpop.f32.mrf.mxu2  ;;  %v3868_v46 = vadd.f32 %v10743_v21, %v3867_v30 }
 0x7e5   : > { %5993 = vst.msk [vmem:[%s10759_s27 + $0x48] sm:$0xff] %vm799_vm0, %v5961_v2  ;;  %6399 = vmatmul.msk.bf16.gmra.mxu3 %vm3900_vm8, %v5804_v63 }
 0x7e6   : > { %v5749_v5 = vpop.f32.mrf.mxu0 }
 0x7e7   : > { %v5750_v18 = vadd.f32 %v10601_v32, %v5749_v5 }
 0x7e8   : > { %v5897_v36 = vpop.f32.mrf.mxu3 }
 0x7e9   : > { %v5898_v54 = vadd.f32 %v10749_v31, %v5897_v36  ;;  %v5787_v8 = vmax.f32 %v5750_v18, 0.0  ;;  %v3871_v36 = vadd.f32 %v10743_v21, %v3870_v4 }
 0x7eb   : > { %v5962_v17 = vadd.f32 %v5898_v54, %v3846_v37  ;;  %v3872_v44 = vpop.f32.mrf.mxu2 }
 0x7ec   : > { %v3873_v10 = vadd.f32 %v10743_v21, %v3872_v44 }
 0x7ed   : > { %5994 = vst.msk [vmem:[%s10759_s27 + $0x50] sm:$0xff] %vm799_vm0, %v5962_v17 }
 0x7ee   : > { %v5751_v13 = vpop.f32.mrf.mxu0 }
 0x7ef   : > { %v5752_v41 = vadd.f32 %v10601_v32, %v5751_v13 }
 0x7f0   : > { %v5899_v40 = vpop.f32.mrf.mxu3 }
 0x7f1   : > { %v5788_v39 = vmax.f32 %v5752_v41, 0.0  ;;  %v5900_v50 = vadd.f32 %v10749_v31, %v5899_v40 }
 0x7f3   : > { %v5805_v55 = vpack.c.bf16 %v5788_v39, %v5787_v8  ;;  %v5963_v28 = vadd.f32 %v5900_v50, %v3848_v20 }
 0x7f5   : > { %5995 = vst.msk [vmem:[%s10759_s27 + $0x58] sm:$0xff] %vm799_vm0, %v5963_v28  ;;  %6400 = vmatmul.msk.bf16.gmra.mxu3 %vm3900_vm8, %v5805_v55 }
 0x7f6   : > { %v5754_v38 = vpop.f32.mrf.mxu0 }
 0x7f7   : > { %v5755_v24 = vadd.f32 %v10601_v32, %v5754_v38 }
 0x7f8   : > { %v5902_v53 = vpop.f32.mrf.mxu3 }
 0x7f9   : > { %v5903_v26 = vadd.f32 %v10749_v31, %v5902_v53  ;;  %v5789_v57 = vmax.f32 %v5755_v24, 0.0 }
 0x7fb   : > { %v5964_v14 = vadd.f32 %v5903_v26, %v3851_v43 }
 0x7fd   : > { %5996 = vst.msk [vmem:[%s10759_s27 + $0x60] sm:$0xff] %vm799_vm0, %v5964_v14 }
 0x7fe   : > { %v5756_v6 = vpop.f32.mrf.mxu0 }
 0x7ff   : > { %v5757_v48 = vadd.f32 %v10601_v32, %v5756_v6  ;;  %v3856_v32 = vadd.f32 %v10743_v21, %v3855_v29  ;;  %v3875_v29 = vpop.f32.mrf.mxu2 }
 0x800   : > { %v5904_v62 = vpop.f32.mrf.mxu3  ;;  %v3876_v8 = vadd.f32 %v10743_v21, %v3875_v29 }
 0x801   : > { %v5790_v35 = vmax.f32 %v5757_v48, 0.0  ;;  %v5905_v42 = vadd.f32 %v10749_v31, %v5904_v62 }
 0x803   : > { %v5806_v51 = vpack.c.bf16 %v5790_v35, %v5789_v57  ;;  %v5965_v33 = vadd.f32 %v5905_v42, %v3853_v11 }
 0x805   : > { %5997 = vst.msk [vmem:[%s10759_s27 + $0x68] sm:$0xff] %vm799_vm0, %v5965_v33  ;;  %6401 = vmatmul.msk.bf16.gmra.mxu3 %vm3900_vm8, %v5806_v51 }
 0x807   : > { %v3877_v17 = vpop.f32.mrf.mxu2 }
 0x808   : > { %v5907_v52 = vpop.f32.mrf.mxu3  ;;  %v3878_v28 = vadd.f32 %v10743_v21, %v3877_v17 }
 0x809   : > { %v5908_v16 = vadd.f32 %v10749_v31, %v5907_v52 }
 0x80b   : > { %v5966_v12 = vadd.f32 %v5908_v16, %v3856_v32 }
 0x80d   : > { %5998 = vst.msk [vmem:[%s10759_s27 + $0x70] sm:$0xff] %vm799_vm0, %v5966_v12 }
 0x80f   : > { %v3880_v40 = vpop.f32.mrf.mxu2 }
 0x810   : > { %v5909_v27 = vpop.f32.mrf.mxu3  ;;  %v3881_v26 = vadd.f32 %v10743_v21, %v3880_v40 }
 0x811   : > { %v5910_v3 = vadd.f32 %v10749_v31, %v5909_v27 }
 0x813   : > { %v5967_v9 = vadd.f32 %v5910_v3, %v3858_v61 }
 0x815   : > { %5999 = vst.msk [vmem:[%s10759_s27 + $0x78] sm:$0xff] %vm799_vm0, %v5967_v9 }
 0x817   : > { %v3882_v15 = vpop.f32.mrf.mxu2 }
 0x818   : > { %v5912_v58 = vpop.f32.mrf.mxu3  ;;  %v3883_v62 = vadd.f32 %v10743_v21, %v3882_v15 }
 0x819   : > { %v5913_v22 = vadd.f32 %v10749_v31, %v5912_v58 }
 0x81b   : > { %v5968_v23 = vadd.f32 %v5913_v22, %v3861_v56 }
 0x81d   : > { %6000 = vst.msk [vmem:[%s10759_s27 + $0x80] sm:$0xff] %vm799_vm0, %v5968_v23 }
 0x81f   : > { %v3885_v6 = vpop.f32.mrf.mxu2 }
 0x820   : > { %v5914_v7 = vpop.f32.mrf.mxu3  ;;  %v3886_v47 = vadd.f32 %v10743_v21, %v3885_v6 }
 0x821   : > { %v5915_v0 = vadd.f32 %v10749_v31, %v5914_v7 }
 0x823   : > { %v5969_v34 = vadd.f32 %v5915_v0, %v3863_v60 }
 0x825   : > { %6001 = vst.msk [vmem:[%s10759_s27 + $0x88] sm:$0xff] %vm799_vm0, %v5969_v34 }
 0x827   : > { %v3887_v35 = vpop.f32.mrf.mxu2 }
 0x828   : > { %v5917_v19 = vpop.f32.mrf.mxu3  ;;  %v3888_v16 = vadd.f32 %v10743_v21, %v3887_v35 }
 0x829   : > { %v5918_v25 = vadd.f32 %v10749_v31, %v5917_v19 }
 0x82b   : > { %v5970_v45 = vadd.f32 %v5918_v25, %v3866_v59 }
 0x82d   : > { %6002 = vst.msk [vmem:[%s10759_s27 + $0x90] sm:$0xff] %vm799_vm0, %v5970_v45 }
 0x82f   : > { %v3890_v52 = vpop.f32.mrf.mxu2 }
 0x830   : > { %v5919_v1 = vpop.f32.mrf.mxu3  ;;  %v3891_v61 = vadd.f32 %v10743_v21, %v3890_v52 }
 0x831   : > { %v5920_v63 = vadd.f32 %v10749_v31, %v5919_v1 }
 0x833   : > { %v5971_v2 = vadd.f32 %v5920_v63, %v3868_v46 }
 0x835   : > { %6003 = vst.msk [vmem:[%s10759_s27 + $0x98] sm:$0xff] %vm799_vm0, %v5971_v2 }
 0x837   : > { %v3892_v9 = vpop.f32.mrf.mxu2 }
 0x838   : > { %v5922_v5 = vpop.f32.mrf.mxu3  ;;  %v3893_v56 = vadd.f32 %v10743_v21, %v3892_v9 }
 0x839   : > { %v5923_v37 = vadd.f32 %v10749_v31, %v5922_v5 }
 0x83b   : > { %v5972_v54 = vadd.f32 %v5923_v37, %v3871_v36 }
 0x83d   : > { %6004 = vst.msk [vmem:[%s10759_s27 + $0xa0] sm:$0xff] %vm799_vm0, %v5972_v54 }
 0x83f   : > { %v3895_v4 = vpop.f32.mrf.mxu2 }
 0x840   : > { %v5924_v18 = vpop.f32.mrf.mxu3  ;;  %v3896_v60 = vadd.f32 %v10743_v21, %v3895_v4 }
 0x841   : > { %v5925_v13 = vadd.f32 %v10749_v31, %v5924_v18 }
 0x843   : > { %v5973_v41 = vadd.f32 %v5925_v13, %v3873_v10 }
 0x845   : > { %6005 = vst.msk [vmem:[%s10759_s27 + $0xa8] sm:$0xff] %vm799_vm0, %v5973_v41 }
 0x847   : > { %v3897_v19 = vpop.f32.mrf.mxu2 }
 0x848   : > { %v5927_v20 = vpop.f32.mrf.mxu3  ;;  %v3898_v25 = vadd.f32 %v10743_v21, %v3897_v19 }
 0x849   : > { %v5928_v39 = vadd.f32 %v10749_v31, %v5927_v20 }
 0x84b   : > { %v5974_v50 = vadd.f32 %v5928_v39, %v3876_v8 }
 0x84d   : > { %6006 = vst.msk [vmem:[%s10759_s27 + $0xb0] sm:$0xff] %vm799_vm0, %v5974_v50 }
 0x850   : > { %v5929_v55 = vpop.f32.mrf.mxu3 }
 0x851   : > { %v5930_v38 = vadd.f32 %v10749_v31, %v5929_v55 }
 0x853   : > { %v5975_v53 = vadd.f32 %v5930_v38, %v3878_v28 }
 0x855   : > { %6007 = vst.msk [vmem:[%s10759_s27 + $0xb8] sm:$0xff] %vm799_vm0, %v5975_v53 }
 0x858   : > { %v5932_v43 = vpop.f32.mrf.mxu3 }
 0x859   : > { %v5933_v14 = vadd.f32 %v10749_v31, %v5932_v43 }
 0x85b   : > { %v5976_v24 = vadd.f32 %v5933_v14, %v3881_v26 }
 0x85d   : > { %6008 = vst.msk [vmem:[%s10759_s27 + $0xc0] sm:$0xff] %vm799_vm0, %v5976_v24 }
 0x860   : > { %v5934_v48 = vpop.f32.mrf.mxu3 }
 0x861   : > { %v5935_v11 = vadd.f32 %v10749_v31, %v5934_v48 }
 0x863   : > { %v5977_v57 = vadd.f32 %v5935_v11, %v3883_v62 }
 0x865   : > { %6009 = vst.msk [vmem:[%s10759_s27 + $0xc8] sm:$0xff] %vm799_vm0, %v5977_v57 }
 0x868   : > { %v5937_v42 = vpop.f32.mrf.mxu3 }
 0x869   : > { %v5938_v51 = vadd.f32 %v10749_v31, %v5937_v42 }
 0x86b   : > { %v5978_v33 = vadd.f32 %v5938_v51, %v3886_v47 }
 0x86d   : > { %6010 = vst.msk [vmem:[%s10759_s27 + $0xd0] sm:$0xff] %vm799_vm0, %v5978_v33 }
 0x870   : > { %v5939_v32 = vpop.f32.mrf.mxu3 }
 0x871   : > { %v5940_v12 = vadd.f32 %v10749_v31, %v5939_v32 }
 0x873   : > { %v5979_v49 = vadd.f32 %v5940_v12, %v3888_v16 }
 0x875   : > { %6011 = vst.msk [vmem:[%s10759_s27 + $0xd8] sm:$0xff] %vm799_vm0, %v5979_v49 }
 0x878   : > { %v5942_v27 = vpop.f32.mrf.mxu3 }
 0x879   : > { %v5943_v3 = vadd.f32 %v10749_v31, %v5942_v27 }
 0x87b   : > { %v5980_v30 = vadd.f32 %v5943_v3, %v3891_v61 }
 0x87d   : > { %6012 = vst.msk [vmem:[%s10759_s27 + $0xe0] sm:$0xff] %vm799_vm0, %v5980_v30 }
 0x880   : > { %v5944_v58 = vpop.f32.mrf.mxu3 }
 0x881   : > { %v5945_v22 = vadd.f32 %v10749_v31, %v5944_v58 }
 0x883   : > { %v5981_v23 = vadd.f32 %v5945_v22, %v3893_v56 }
 0x885   : > { %6013 = vst.msk [vmem:[%s10759_s27 + $0xe8] sm:$0xff] %vm799_vm0, %v5981_v23 }
 0x888   : > { %v5947_v7 = vpop.f32.mrf.mxu3 }
 0x889   : > { %v5948_v0 = vadd.f32 %v10749_v31, %v5947_v7 }
 0x88b   : > { %v5982_v34 = vadd.f32 %v5948_v0, %v3896_v60 }
 0x88d   : > { %6014 = vst.msk [vmem:[%s10759_s27 + $0xf0] sm:$0xff] %vm799_vm0, %v5982_v34 }
 0x890   : > { %v5949_v59 = vpop.f32.mrf.mxu3 }
 0x891   : > { %v5950_v44 = vadd.f32 %v10749_v31, %v5949_v59 }
 0x893   : > { %v5983_v45 = vadd.f32 %v5950_v44, %v3898_v25 }
 0x895   : > { %6015 = vst.msk [vmem:[%s10759_s27 + $0xf8] sm:$0xff] %vm799_vm0, %v5983_v45 }
 0x896 PF: > { %s26_s21 = sadd.s32 1, %s7786_s21  }
 0x897   : > { %p23_p4 = scmp.ge.s32.totalorder %s26_s21, 4  }
 0x899   :  { %25 = sbr.rel (!%p23_p4) target bundleno = 2 (0x2), region = 121 }

</bundles_post_ra>
